<compile_context>
chip_gen: v6e
topology: v6e:2x2x1
jax: 0.10.0
libtpu: 0.0.40
codegen_flags: <defaults>
</compile_context>

<pallas_src>
import math

import jax
import jax.numpy as jnp
from jax import lax
from jax.experimental import pallas as pl
from jax.experimental.pallas import tpu as pltpu

# --- small synthetic config (stands in for bert-base-chinese + config file) ---
B = 2            # batch
S = 128          # sequence length  (multiple of 128 -> lane-dense)
H = 128          # hidden_size      (multiple of 128 -> lane-dense)
N_HEADS = 2
D_HEAD = H // N_HEADS        # 64, matches real BERT head width
FFN = 4 * H                  # 512
N_LAYERS = 2
VOCAB = 100
TYPE_VOCAB = 2
MAX_CLS = 8                  # max_cls_len (multiple of 8 -> full sublanes)
CLS_PAD = MAX_CLS + 2        # cls_ids padded wider than MAX_CLS (exercises truncate)
LN_EPS = 1e-12

# Packed per-layer "small vector" layout; every offset/width is a multiple of
# 128 lanes so in-kernel slices are clean whole-vreg selections.
O_BQKV = 0
O_BO   = 3 * H
O_LN1G = 4 * H
O_LN1B = 5 * H
O_B1   = 6 * H
O_B2   = 6 * H + FFN
O_LN2G = 7 * H + FFN
O_LN2B = 8 * H + FFN
VEC_W  = 9 * H + FFN


# --------------------------- in-kernel helpers --------------------------------

def _ln(x, g, b):
    """LayerNorm with fp32 statistics."""
    mu = jnp.mean(x, axis=-1, keepdims=True)
    var = jnp.mean(jnp.square(x - mu), axis=-1, keepdims=True)
    return (x - mu) * lax.rsqrt(var + LN_EPS) * g + b


def _gelu(x):
    # erf-based GELU for parity with PyTorch/HF BERT.  (On v5e the tanh
    # approximation would route to the EUP instead of a long VALU polynomial.)
    return 0.5 * x * (1.0 + lax.erf(x * (1.0 / math.sqrt(2.0))))


# --------------------------- fused whole-model kernel --------------------------

def _bert_fused_kernel(cls_ids_ref, cls_len_ref,               # scalar prefetch (SMEM)
                       emb_ref, mask_ref, embln_ref,           # per-batch inputs
                       wqkv_ref, wo_ref, w1_ref, w2_ref, vec_ref,  # per-layer weights
                       o_ref,                                   # (MAX_CLS, H) output
                       h_ref):                                  # VMEM-resident hidden
    b = pl.program_id(0)
    l = pl.program_id(1)
    last = pl.num_programs(1) - 1

    # ---- layer 0: embedding LayerNorm, hidden becomes VMEM-resident ---------
    @pl.when(l == 0)
    def _():
        h_ref[...] = _ln(emb_ref[...], embln_ref[0:1, :], embln_ref[1:2, :])

    x = h_ref[...]                                 # (S, H) fp32
    bias = mask_ref[...]                           # (1, S) fp32 additive mask

    # Packed per-layer vectors (one DMA), sliced on 128-lane boundaries.
    bqkv = vec_ref[:, O_BQKV:O_BQKV + 3 * H]
    bo   = vec_ref[:, O_BO:O_BO + H]
    ln1g = vec_ref[:, O_LN1G:O_LN1G + H]
    ln1b = vec_ref[:, O_LN1B:O_LN1B + H]
    b1   = vec_ref[:, O_B1:O_B1 + FFN]
    b2   = vec_ref[:, O_B2:O_B2 + H]
    ln2g = vec_ref[:, O_LN2G:O_LN2G + H]
    ln2b = vec_ref[:, O_LN2B:O_LN2B + H]

    # ---- fused QKV projection (1/sqrt(d_head) pre-folded into q weights) ----
    # Single (S, 3H) downcast to bf16 right after the bias add.
    qkv = (jnp.dot(x.astype(jnp.bfloat16), wqkv_ref[...],
                   preferred_element_type=jnp.float32) + bqkv
           ).astype(jnp.bfloat16)

    # ---- multi-head attention; output projection accumulated per head -------
    attn = jnp.zeros((S, H), jnp.float32)
    for h in range(N_HEADS):                       # static unrolled head loop
        lo = h * D_HEAD
        q = qkv[:, lo:lo + D_HEAD]
        k = qkv[:, H + lo:H + lo + D_HEAD]
        v = qkv[:, 2 * H + lo:2 * H + lo + D_HEAD]
        # scores = q @ k^T (contract on d_head; no explicit transpose op)
        scores = lax.dot_general(q, k, (((1,), (1,)), ((), ())),
                                 preferred_element_type=jnp.float32) + bias
        m = jnp.max(scores, axis=-1, keepdims=True)
        p = jnp.exp(scores - m)
        denom = jnp.sum(p, axis=-1, keepdims=True)
        ctx = jnp.dot(p.astype(jnp.bfloat16), v,
                      preferred_element_type=jnp.float32) / denom   # exact softmax
        attn = attn + jnp.dot(ctx.astype(jnp.bfloat16),
                              wo_ref[lo:lo + D_HEAD, :],
                              preferred_element_type=jnp.float32)

    # ---- output-projection bias + residual + LN1 -----------------------------
    h1 = _ln(x + attn + bo, ln1g, ln1b)

    # ---- FFN (erf-GELU) + residual + LN2 -------------------------------------
    f = jnp.dot(h1.astype(jnp.bfloat16), w1_ref[...],
                preferred_element_type=jnp.float32) + b1
    f = _gelu(f)
    f = jnp.dot(f.astype(jnp.bfloat16), w2_ref[...],
                preferred_element_type=jnp.float32) + b2
    h2 = _ln(h1 + f, ln2g, ln2b)
    h_ref[...] = h2                                # stays resident in VMEM

    # ---- last layer: fused CLS gather (truncate / zero-pad to MAX_CLS) ------
    @pl.when(l == last)
    def _():
        n = jnp.minimum(cls_len_ref[b], MAX_CLS)
        row = lax.broadcasted_iota(jnp.int32, (MAX_CLS, S), 0)
        col = lax.broadcasted_iota(jnp.int32, (MAX_CLS, S), 1)
        ids = jnp.zeros((MAX_CLS, S), jnp.int32)
        for j in range(MAX_CLS):            # MAX_CLS static scalar reads from SMEM
            ids = jnp.where(row == j, cls_ids_ref[b, j], ids)
        onehot = jnp.where((col == ids) & (row < n), 1.0, 0.0).astype(jnp.float32)
        # fp32 one-hot matmul -> exact row selection; single unmasked block store.
        o_ref[...] = jnp.dot(onehot, h2, preferred_element_type=jnp.float32)


def bert_cls_encoder(params, input_ids, token_type_ids, attention_mask,
                     cls_ids, cls_len):
    # Embedding table lookups stay in JAX glue (gathers); embedding LN, all
    # transformer layers and the CLS gather run in ONE fused pallas_call.
    emb = (params["word_emb"][input_ids]
           + params["pos_emb"][None, :, :]
           + params["type_emb"][token_type_ids])
    mask_bias = ((1.0 - attention_mask.astype(jnp.float32)) * -10000.0
                 ).reshape(B, 1, S)

    grid_spec = pltpu.PrefetchScalarGridSpec(
        num_scalar_prefetch=2,
        grid=(B, N_LAYERS),                        # layer axis last ("arbitrary")
        in_specs=[
            pl.BlockSpec((None, S, H),     lambda b, l, ids, lens: (b, 0, 0)),
            pl.BlockSpec((None, 1, S),     lambda b, l, ids, lens: (b, 0, 0)),
            pl.BlockSpec((2, H),           lambda b, l, ids, lens: (0, 0)),
            pl.BlockSpec((None, H, 3 * H), lambda b, l, ids, lens: (l, 0, 0)),
            pl.BlockSpec((None, H, H),     lambda b, l, ids, lens: (l, 0, 0)),
            pl.BlockSpec((None, H, FFN),   lambda b, l, ids, lens: (l, 0, 0)),
            pl.BlockSpec((None, FFN, H),   lambda b, l, ids, lens: (l, 0, 0)),
            pl.BlockSpec((None, 1, VEC_W), lambda b, l, ids, lens: (l, 0, 0)),
        ],
        out_specs=pl.BlockSpec((None, MAX_CLS, H),
                               lambda b, l, ids, lens: (b, 0, 0)),
        scratch_shapes=[pltpu.VMEM((S, H), jnp.float32)],
    )
    return pl.pallas_call(
        _bert_fused_kernel,
        out_shape=jax.ShapeDtypeStruct((B, MAX_CLS, H), jnp.float32),
        grid_spec=grid_spec,
        compiler_params=pltpu.CompilerParams(
            dimension_semantics=("parallel", "arbitrary")),
    )(cls_ids, cls_len, emb, mask_bias, params["emb_ln"],
      params["wqkv"], params["wo"], params["w1"], params["w2"], params["vec"])


# --------------------------- parameter init (synthetic) ------------------------

def init_params(key):
    def norm(k, shape):
        return 0.02 * jax.random.normal(k, shape, jnp.float32)

    keys = jax.random.split(key, 4)
    params = {
        "word_emb": norm(keys[0], (VOCAB, H)),
        "pos_emb": norm(keys[1], (S, H)),
        "type_emb": norm(keys[2], (TYPE_VOCAB, H)),
        "emb_ln": jnp.concatenate([jnp.ones((1, H), jnp.float32),
                                   jnp.zeros((1, H), jnp.float32)], axis=0),
    }

    # Fold 1/sqrt(d_head) into the q columns of wqkv / bqkv (done in fp32,
    # before the bf16 cast) so the kernel needs no in-kernel scaling.
    scale = 1.0 / math.sqrt(D_HEAD)
    qcol = (jnp.arange(3 * H) < H).astype(jnp.float32)
    qkv_scale = qcol * scale + (1.0 - qcol)

    lkeys = jax.random.split(keys[3], N_LAYERS)
    wqkv_l, wo_l, w1_l, w2_l, vec_l = [], [], [], [], []
    for l in range(N_LAYERS):
        lk = jax.random.split(lkeys[l], 8)
        wqkv = norm(lk[0], (H, 3 * H)) * qkv_scale[None, :]
        bqkv = norm(lk[1], (3 * H,)) * qkv_scale
        wo = norm(lk[2], (H, H));   bo = norm(lk[3], (H,))
        w1 = norm(lk[4], (H, FFN)); b1 = norm(lk[5], (FFN,))
        w2 = norm(lk[6], (FFN, H)); b2 = norm(lk[7], (H,))
        ln1g = jnp.ones((H,), jnp.float32); ln1b = jnp.zeros((H,), jnp.float32)
        ln2g = jnp.ones((H,), jnp.float32); ln2b = jnp.zeros((H,), jnp.float32)
        vec = jnp.concatenate([bqkv, bo, ln1g, ln1b, b1, b2, ln2g, ln2b], axis=0)
        assert vec.shape[0] == VEC_W
        wqkv_l.append(wqkv.astype(jnp.bfloat16))
        wo_l.append(wo.astype(jnp.bfloat16))
        w1_l.append(w1.astype(jnp.bfloat16))
        w2_l.append(w2.astype(jnp.bfloat16))
        vec_l.append(vec[None, :])                 # (1, VEC_W) fp32

    params["wqkv"] = jnp.stack(wqkv_l, axis=0)     # (L, H, 3H)    bf16
    params["wo"]   = jnp.stack(wo_l, axis=0)       # (L, H, H)     bf16
    params["w1"]   = jnp.stack(w1_l, axis=0)       # (L, H, FFN)   bf16
    params["w2"]   = jnp.stack(w2_l, axis=0)       # (L, FFN, H)   bf16
    params["vec"]  = jnp.stack(vec_l, axis=0)      # (L, 1, VEC_W) fp32
    return params


# ------------------------------ main --------------------------------------------

if __name__ == "__main__":
    key = jax.random.PRNGKey(0)
    pkey, ikey, ckey = jax.random.split(key, 3)
    params = init_params(pkey)

    input_ids = jax.random.randint(ikey, (B, S), 0, VOCAB, dtype=jnp.int32)
    token_type_ids = jnp.zeros((B, S), jnp.int32)
    attention_mask = jnp.ones((B, S), jnp.int32)
    # cls_ids padded wider than MAX_CLS so both the pad and the truncate
    # branches of the original forward are exercised.
    cls_ids = jax.random.randint(ckey, (B, CLS_PAD), 0, S, dtype=jnp.int32)
    cls_len = jnp.array([3, CLS_PAD], jnp.int32)

    # TODO(synk): the PyTorch code pads missing CLS rows with torch.LongTensor
    # zeros (int dtype); here padding is float32 zeros, matching the
    # semantically intended result.

    fwd = jax.jit(bert_cls_encoder)
    out = fwd(params, input_ids, token_type_ids, attention_mask, cls_ids, cls_len)
    out = jax.block_until_ready(out)
    assert out.shape == (B, MAX_CLS, H)
    assert out.dtype == jnp.float32
    print("KERNEL_OK")
</pallas_src>

<mosaic_0001>
module attributes {stable_mosaic.version = 11 : i64} {
  func.func @_bert_fused_kernel(%arg0: i32, %arg1: i32, %arg2: memref<2x10xi32, #tpu.memory_space<smem>>, %arg3: memref<2xi32, #tpu.memory_space<smem>>, %arg4: memref<1x128x128xf32, #tpu.memory_space<vmem>>, %arg5: memref<1x1x128xf32, #tpu.memory_space<vmem>>, %arg6: memref<2x128xf32, #tpu.memory_space<vmem>>, %arg7: memref<1x128x384xbf16, #tpu.memory_space<vmem>>, %arg8: memref<1x128x128xbf16, #tpu.memory_space<vmem>>, %arg9: memref<1x128x512xbf16, #tpu.memory_space<vmem>>, %arg10: memref<1x512x128xbf16, #tpu.memory_space<vmem>>, %arg11: memref<1x1x1664xf32, #tpu.memory_space<vmem>>, %arg12: memref<1x8x128xf32, #tpu.memory_space<vmem>>, %arg13: memref<128x128xf32, #tpu.memory_space<vmem>>) attributes {dimension_semantics = [#tpu.dimension_semantics<parallel>, #tpu.dimension_semantics<arbitrary>], iteration_bounds = array<i64: 2, 2>, scalar_prefetch = 2 : i64, scratch_operands = 1 : i64, tpu.core_type = #tpu.core_type<tc>, window_params = [{transform_indices = @transform_0, window_bounds = array<i64: 1, 128, 128>}, {transform_indices = @transform_1, window_bounds = array<i64: 1, 1, 128>}, {pipeline_mode = #tpu.pipeline_mode<synchronous>, transform_indices = @transform_2, window_bounds = array<i64: 2, 128>}, {transform_indices = @transform_3, window_bounds = array<i64: 1, 128, 384>}, {transform_indices = @transform_4, window_bounds = array<i64: 1, 128, 128>}, {transform_indices = @transform_5, window_bounds = array<i64: 1, 128, 512>}, {transform_indices = @transform_6, window_bounds = array<i64: 1, 512, 128>}, {transform_indices = @transform_7, window_bounds = array<i64: 1, 1, 1664>}, {transform_indices = @transform_8, window_bounds = array<i64: 1, 8, 128>}]} {
    %c0_i32 = arith.constant 0 : i32
    %0 = arith.cmpi eq, %arg1, %c0_i32 : i32
    %1 = arith.extui %0 : i1 to i32
    %c0_i32_0 = arith.constant 0 : i32
    %2 = arith.cmpi ne, %1, %c0_i32_0 : i32
    scf.if %2 {
      %c0_65 = arith.constant 0 : index
      %c0_66 = arith.constant 0 : index
      %c0_67 = arith.constant 0 : index
      %146 = vector.load %arg4[%c0_65, %c0_66, %c0_67] : memref<1x128x128xf32, #tpu.memory_space<vmem>>, vector<1x128x128xf32>
      %147 = vector.shape_cast %146 : vector<1x128x128xf32> to vector<128x128xf32>
      %c0_68 = arith.constant 0 : index
      %c0_69 = arith.constant 0 : index
      %148 = vector.load %arg6[%c0_68, %c0_69] : memref<2x128xf32, #tpu.memory_space<vmem>>, vector<1x128xf32>
      %c1 = arith.constant 1 : index
      %c0_70 = arith.constant 0 : index
      %149 = vector.load %arg6[%c1, %c0_70] : memref<2x128xf32, #tpu.memory_space<vmem>>, vector<1x128xf32>
      %cst_71 = arith.constant dense<0.000000e+00> : vector<128xf32>
      %150 = vector.multi_reduction <add>, %147, %cst_71 [1] : vector<128x128xf32> to vector<128xf32>
      %151 = vector.shape_cast %150 : vector<128xf32> to vector<128x1xf32>
      %cst_72 = arith.constant 1.280000e+02 : f32
      %152 = vector.broadcast %cst_72 : f32 to vector<128x1xf32>
      %153 = arith.divf %151, %152 : vector<128x1xf32>
      %154 = vector.broadcast %153 : vector<128x1xf32> to vector<128x128xf32>
      %155 = arith.subf %147, %154 : vector<128x128xf32>
      %156 = arith.mulf %155, %155 : vector<128x128xf32>
      %cst_73 = arith.constant dense<0.000000e+00> : vector<128xf32>
      %157 = vector.multi_reduction <add>, %156, %cst_73 [1] : vector<128x128xf32> to vector<128xf32>
      %158 = vector.shape_cast %157 : vector<128xf32> to vector<128x1xf32>
      %cst_74 = arith.constant 1.280000e+02 : f32
      %159 = vector.broadcast %cst_74 : f32 to vector<128x1xf32>
      %160 = arith.divf %158, %159 : vector<128x1xf32>
      %161 = vector.broadcast %153 : vector<128x1xf32> to vector<128x128xf32>
      %162 = arith.subf %147, %161 : vector<128x128xf32>
      %cst_75 = arith.constant 9.99999996E-13 : f32
      %163 = vector.broadcast %cst_75 : f32 to vector<128x1xf32>
      %164 = arith.addf %160, %163 : vector<128x1xf32>
      %165 = math.rsqrt %164 : vector<128x1xf32>
      %166 = vector.broadcast %165 : vector<128x1xf32> to vector<128x128xf32>
      %167 = arith.mulf %162, %166 : vector<128x128xf32>
      %168 = vector.broadcast %148 : vector<1x128xf32> to vector<128x128xf32>
      %169 = arith.mulf %167, %168 : vector<128x128xf32>
      %170 = vector.broadcast %149 : vector<1x128xf32> to vector<128x128xf32>
      %171 = arith.addf %169, %170 : vector<128x128xf32>
      %c0_76 = arith.constant 0 : index
      %c0_77 = arith.constant 0 : index
      %172 = vector.load %arg13[%c0_76, %c0_77] : memref<128x128xf32, #tpu.memory_space<vmem>>, vector<128x128xf32>
      tpu.vector_store %arg13[%c0_76, %c0_77], %171 {strides = array<i32>} : memref<128x128xf32, #tpu.memory_space<vmem>>, vector<128x128xf32>,
    } else {
    }
    %c0 = arith.constant 0 : index
    %c0_1 = arith.constant 0 : index
    %3 = vector.load %arg13[%c0, %c0_1] : memref<128x128xf32, #tpu.memory_space<vmem>>, vector<128x128xf32>
    %c0_2 = arith.constant 0 : index
    %c0_3 = arith.constant 0 : index
    %c0_4 = arith.constant 0 : index
    %4 = vector.load %arg5[%c0_2, %c0_3, %c0_4] : memref<1x1x128xf32, #tpu.memory_space<vmem>>, vector<1x1x128xf32>
    %5 = vector.shape_cast %4 : vector<1x1x128xf32> to vector<1x128xf32>
    %c0_5 = arith.constant 0 : index
    %c0_6 = arith.constant 0 : index
    %c0_7 = arith.constant 0 : index
    %6 = vector.load %arg11[%c0_5, %c0_6, %c0_7] : memref<1x1x1664xf32, #tpu.memory_space<vmem>>, vector<1x1x384xf32>
    %7 = vector.shape_cast %6 : vector<1x1x384xf32> to vector<1x384xf32>
    %c0_8 = arith.constant 0 : index
    %c0_9 = arith.constant 0 : index
    %c384 = arith.constant 384 : index
    %8 = vector.load %arg11[%c0_8, %c0_9, %c384] : memref<1x1x1664xf32, #tpu.memory_space<vmem>>, vector<1x1x128xf32>
    %9 = vector.shape_cast %8 : vector<1x1x128xf32> to vector<1x128xf32>
    %c0_10 = arith.constant 0 : index
    %c0_11 = arith.constant 0 : index
    %c512 = arith.constant 512 : index
    %10 = vector.load %arg11[%c0_10, %c0_11, %c512] : memref<1x1x1664xf32, #tpu.memory_space<vmem>>, vector<1x1x128xf32>
    %11 = vector.shape_cast %10 : vector<1x1x128xf32> to vector<1x128xf32>
    %c0_12 = arith.constant 0 : index
    %c0_13 = arith.constant 0 : index
    %c640 = arith.constant 640 : index
    %12 = vector.load %arg11[%c0_12, %c0_13, %c640] : memref<1x1x1664xf32, #tpu.memory_space<vmem>>, vector<1x1x128xf32>
    %13 = vector.shape_cast %12 : vector<1x1x128xf32> to vector<1x128xf32>
    %c0_14 = arith.constant 0 : index
    %c0_15 = arith.constant 0 : index
    %c768 = arith.constant 768 : index
    %14 = vector.load %arg11[%c0_14, %c0_15, %c768] : memref<1x1x1664xf32, #tpu.memory_space<vmem>>, vector<1x1x512xf32>
    %15 = vector.shape_cast %14 : vector<1x1x512xf32> to vector<1x512xf32>
    %c0_16 = arith.constant 0 : index
    %c0_17 = arith.constant 0 : index
    %c1280 = arith.constant 1280 : index
    %16 = vector.load %arg11[%c0_16, %c0_17, %c1280] : memref<1x1x1664xf32, #tpu.memory_space<vmem>>, vector<1x1x128xf32>
    %17 = vector.shape_cast %16 : vector<1x1x128xf32> to vector<1x128xf32>
    %c0_18 = arith.constant 0 : index
    %c0_19 = arith.constant 0 : index
    %c1408 = arith.constant 1408 : index
    %18 = vector.load %arg11[%c0_18, %c0_19, %c1408] : memref<1x1x1664xf32, #tpu.memory_space<vmem>>, vector<1x1x128xf32>
    %19 = vector.shape_cast %18 : vector<1x1x128xf32> to vector<1x128xf32>
    %c0_20 = arith.constant 0 : index
    %c0_21 = arith.constant 0 : index
    %c1536 = arith.constant 1536 : index
    %20 = vector.load %arg11[%c0_20, %c0_21, %c1536] : memref<1x1x1664xf32, #tpu.memory_space<vmem>>, vector<1x1x128xf32>
    %21 = vector.shape_cast %20 : vector<1x1x128xf32> to vector<1x128xf32>
    %22 = arith.truncf %3 : vector<128x128xf32> to vector<128x128xbf16>
    %c0_22 = arith.constant 0 : index
    %c0_23 = arith.constant 0 : index
    %c0_24 = arith.constant 0 : index
    %23 = vector.load %arg7[%c0_22, %c0_23, %c0_24] : memref<1x128x384xbf16, #tpu.memory_space<vmem>>, vector<1x128x384xbf16>
    %24 = vector.shape_cast %23 : vector<1x128x384xbf16> to vector<128x384xbf16>
    %cst = arith.constant dense<0.000000e+00> : vector<128x384xf32>
    %25 = tpu.matmul %22, %24, %cst {dimension_numbers = #tpu.dot_dimension_numbers<[1], [0], [0], [1], [0, 0, 1, 1], [], []>} : vector<128x128xbf16>, vector<128x384xbf16>, vector<128x384xf32> -> vector<128x384xf32>
    %26 = vector.broadcast %7 : vector<1x384xf32> to vector<128x384xf32>
    %27 = arith.addf %25, %26 : vector<128x384xf32>
    %28 = arith.truncf %27 : vector<128x384xf32> to vector<128x384xbf16>
    %cst_25 = arith.constant 0.000000e+00 : f32
    %29 = vector.broadcast %cst_25 : f32 to vector<128x128xf32>
    %30 = vector.extract_strided_slice %28 {offsets = [0, 0], sizes = [128, 64], strides = [1, 1]} : vector<128x384xbf16> to vector<128x64xbf16>
    %31 = vector.extract_strided_slice %28 {offsets = [0, 128], sizes = [128, 64], strides = [1, 1]} : vector<128x384xbf16> to vector<128x64xbf16>
    %32 = vector.extract_strided_slice %28 {offsets = [0, 256], sizes = [128, 64], strides = [1, 1]} : vector<128x384xbf16> to vector<128x64xbf16>
    %cst_26 = arith.constant dense<0.000000e+00> : vector<128x128xf32>
    %33 = tpu.matmul %30, %31, %cst_26 {dimension_numbers = #tpu.dot_dimension_numbers<[1], [1], [0], [0], [0, 0, 1, 0], [], []>} : vector<128x64xbf16>, vector<128x64xbf16>, vector<128x128xf32> -> vector<128x128xf32>
    %34 = vector.broadcast %5 : vector<1x128xf32> to vector<128x128xf32>
    %35 = arith.addf %33, %34 : vector<128x128xf32>
    %cst_27 = arith.constant dense<0xFF800000> : vector<128xf32>
    %36 = vector.multi_reduction <maximumf>, %35, %cst_27 [1] : vector<128x128xf32> to vector<128xf32>
    %37 = vector.shape_cast %36 : vector<128xf32> to vector<128x1xf32>
    %38 = vector.broadcast %37 : vector<128x1xf32> to vector<128x128xf32>
    %39 = arith.subf %35, %38 : vector<128x128xf32>
    %40 = math.exp %39 : vector<128x128xf32>
    %cst_28 = arith.constant dense<0.000000e+00> : vector<128xf32>
    %41 = vector.multi_reduction <add>, %40, %cst_28 [1] : vector<128x128xf32> to vector<128xf32>
    %42 = vector.shape_cast %41 : vector<128xf32> to vector<128x1xf32>
    %43 = arith.truncf %40 : vector<128x128xf32> to vector<128x128xbf16>
    %cst_29 = arith.constant dense<0.000000e+00> : vector<128x64xf32>
    %44 = tpu.matmul %43, %32, %cst_29 {dimension_numbers = #tpu.dot_dimension_numbers<[1], [0], [0], [1], [0, 0, 1, 1], [], []>} : vector<128x128xbf16>, vector<128x64xbf16>, vector<128x64xf32> -> vector<128x64xf32>
    %45 = vector.broadcast %42 : vector<128x1xf32> to vector<128x64xf32>
    %46 = arith.divf %44, %45 : vector<128x64xf32>
    %47 = arith.truncf %46 : vector<128x64xf32> to vector<128x64xbf16>
    %c0_30 = arith.constant 0 : index
    %c0_31 = arith.constant 0 : index
    %c0_32 = arith.constant 0 : index
    %48 = vector.load %arg8[%c0_30, %c0_31, %c0_32] : memref<1x128x128xbf16, #tpu.memory_space<vmem>>, vector<1x64x128xbf16>
    %49 = vector.shape_cast %48 : vector<1x64x128xbf16> to vector<64x128xbf16>
    %cst_33 = arith.constant dense<0.000000e+00> : vector<128x128xf32>
    %50 = tpu.matmul %47, %49, %cst_33 {dimension_numbers = #tpu.dot_dimension_numbers<[1], [0], [0], [1], [0, 0, 1, 1], [], []>} : vector<128x64xbf16>, vector<64x128xbf16>, vector<128x128xf32> -> vector<128x128xf32>
    %51 = arith.addf %29, %50 : vector<128x128xf32>
    %52 = vector.extract_strided_slice %28 {offsets = [0, 64], sizes = [128, 64], strides = [1, 1]} : vector<128x384xbf16> to vector<128x64xbf16>
    %53 = vector.extract_strided_slice %28 {offsets = [0, 192], sizes = [128, 64], strides = [1, 1]} : vector<128x384xbf16> to vector<128x64xbf16>
    %54 = vector.extract_strided_slice %28 {offsets = [0, 320], sizes = [128, 64], strides = [1, 1]} : vector<128x384xbf16> to vector<128x64xbf16>
    %cst_34 = arith.constant dense<0.000000e+00> : vector<128x128xf32>
    %55 = tpu.matmul %52, %53, %cst_34 {dimension_numbers = #tpu.dot_dimension_numbers<[1], [1], [0], [0], [0, 0, 1, 0], [], []>} : vector<128x64xbf16>, vector<128x64xbf16>, vector<128x128xf32> -> vector<128x128xf32>
    %56 = vector.broadcast %5 : vector<1x128xf32> to vector<128x128xf32>
    %57 = arith.addf %55, %56 : vector<128x128xf32>
    %cst_35 = arith.constant dense<0xFF800000> : vector<128xf32>
    %58 = vector.multi_reduction <maximumf>, %57, %cst_35 [1] : vector<128x128xf32> to vector<128xf32>
    %59 = vector.shape_cast %58 : vector<128xf32> to vector<128x1xf32>
    %60 = vector.broadcast %59 : vector<128x1xf32> to vector<128x128xf32>
    %61 = arith.subf %57, %60 : vector<128x128xf32>
    %62 = math.exp %61 : vector<128x128xf32>
    %cst_36 = arith.constant dense<0.000000e+00> : vector<128xf32>
    %63 = vector.multi_reduction <add>, %62, %cst_36 [1] : vector<128x128xf32> to vector<128xf32>
    %64 = vector.shape_cast %63 : vector<128xf32> to vector<128x1xf32>
    %65 = arith.truncf %62 : vector<128x128xf32> to vector<128x128xbf16>
    %cst_37 = arith.constant dense<0.000000e+00> : vector<128x64xf32>
    %66 = tpu.matmul %65, %54, %cst_37 {dimension_numbers = #tpu.dot_dimension_numbers<[1], [0], [0], [1], [0, 0, 1, 1], [], []>} : vector<128x128xbf16>, vector<128x64xbf16>, vector<128x64xf32> -> vector<128x64xf32>
    %67 = vector.broadcast %64 : vector<128x1xf32> to vector<128x64xf32>
    %68 = arith.divf %66, %67 : vector<128x64xf32>
    %69 = arith.truncf %68 : vector<128x64xf32> to vector<128x64xbf16>
    %c0_38 = arith.constant 0 : index
    %c64 = arith.constant 64 : index
    %c0_39 = arith.constant 0 : index
    %70 = vector.load %arg8[%c0_38, %c64, %c0_39] : memref<1x128x128xbf16, #tpu.memory_space<vmem>>, vector<1x64x128xbf16>
    %71 = vector.shape_cast %70 : vector<1x64x128xbf16> to vector<64x128xbf16>
    %cst_40 = arith.constant dense<0.000000e+00> : vector<128x128xf32>
    %72 = tpu.matmul %69, %71, %cst_40 {dimension_numbers = #tpu.dot_dimension_numbers<[1], [0], [0], [1], [0, 0, 1, 1], [], []>} : vector<128x64xbf16>, vector<64x128xbf16>, vector<128x128xf32> -> vector<128x128xf32>
    %73 = arith.addf %51, %72 : vector<128x128xf32>
    %74 = arith.addf %3, %73 : vector<128x128xf32>
    %75 = vector.broadcast %9 : vector<1x128xf32> to vector<128x128xf32>
    %76 = arith.addf %74, %75 : vector<128x128xf32>
    %cst_41 = arith.constant dense<0.000000e+00> : vector<128xf32>
    %77 = vector.multi_reduction <add>, %76, %cst_41 [1] : vector<128x128xf32> to vector<128xf32>
    %78 = vector.shape_cast %77 : vector<128xf32> to vector<128x1xf32>
    %cst_42 = arith.constant 1.280000e+02 : f32
    %79 = vector.broadcast %cst_42 : f32 to vector<128x1xf32>
    %80 = arith.divf %78, %79 : vector<128x1xf32>
    %81 = vector.broadcast %80 : vector<128x1xf32> to vector<128x128xf32>
    %82 = arith.subf %76, %81 : vector<128x128xf32>
    %83 = arith.mulf %82, %82 : vector<128x128xf32>
    %cst_43 = arith.constant dense<0.000000e+00> : vector<128xf32>
    %84 = vector.multi_reduction <add>, %83, %cst_43 [1] : vector<128x128xf32> to vector<128xf32>
    %85 = vector.shape_cast %84 : vector<128xf32> to vector<128x1xf32>
    %cst_44 = arith.constant 1.280000e+02 : f32
    %86 = vector.broadcast %cst_44 : f32 to vector<128x1xf32>
    %87 = arith.divf %85, %86 : vector<128x1xf32>
    %88 = vector.broadcast %80 : vector<128x1xf32> to vector<128x128xf32>
    %89 = arith.subf %76, %88 : vector<128x128xf32>
    %cst_45 = arith.constant 9.99999996E-13 : f32
    %90 = vector.broadcast %cst_45 : f32 to vector<128x1xf32>
    %91 = arith.addf %87, %90 : vector<128x1xf32>
    %92 = math.rsqrt %91 : vector<128x1xf32>
    %93 = vector.broadcast %92 : vector<128x1xf32> to vector<128x128xf32>
    %94 = arith.mulf %89, %93 : vector<128x128xf32>
    %95 = vector.broadcast %11 : vector<1x128xf32> to vector<128x128xf32>
    %96 = arith.mulf %94, %95 : vector<128x128xf32>
    %97 = vector.broadcast %13 : vector<1x128xf32> to vector<128x128xf32>
    %98 = arith.addf %96, %97 : vector<128x128xf32>
    %99 = arith.truncf %98 : vector<128x128xf32> to vector<128x128xbf16>
    %c0_46 = arith.constant 0 : index
    %c0_47 = arith.constant 0 : index
    %c0_48 = arith.constant 0 : index
    %100 = vector.load %arg9[%c0_46, %c0_47, %c0_48] : memref<1x128x512xbf16, #tpu.memory_space<vmem>>, vector<1x128x512xbf16>
    %101 = vector.shape_cast %100 : vector<1x128x512xbf16> to vector<128x512xbf16>
    %cst_49 = arith.constant dense<0.000000e+00> : vector<128x512xf32>
    %102 = tpu.matmul %99, %101, %cst_49 {dimension_numbers = #tpu.dot_dimension_numbers<[1], [0], [0], [1], [0, 0, 1, 1], [], []>} : vector<128x128xbf16>, vector<128x512xbf16>, vector<128x512xf32> -> vector<128x512xf32>
    %103 = vector.broadcast %15 : vector<1x512xf32> to vector<128x512xf32>
    %104 = arith.addf %102, %103 : vector<128x512xf32>
    %cst_50 = arith.constant 5.000000e-01 : f32
    %105 = vector.broadcast %cst_50 : f32 to vector<128x512xf32>
    %106 = arith.mulf %105, %104 : vector<128x512xf32>
    %cst_51 = arith.constant 0.707106769 : f32
    %107 = vector.broadcast %cst_51 : f32 to vector<128x512xf32>
    %108 = arith.mulf %104, %107 : vector<128x512xf32>
    %109 = math.erf %108 : vector<128x512xf32>
    %cst_52 = arith.constant 1.000000e+00 : f32
    %110 = vector.broadcast %cst_52 : f32 to vector<128x512xf32>
    %111 = arith.addf %110, %109 : vector<128x512xf32>
    %112 = arith.mulf %106, %111 : vector<128x512xf32>
    %113 = arith.truncf %112 : vector<128x512xf32> to vector<128x512xbf16>
    %c0_53 = arith.constant 0 : index
    %c0_54 = arith.constant 0 : index
    %c0_55 = arith.constant 0 : index
    %114 = vector.load %arg10[%c0_53, %c0_54, %c0_55] : memref<1x512x128xbf16, #tpu.memory_space<vmem>>, vector<1x512x128xbf16>
    %115 = vector.shape_cast %114 : vector<1x512x128xbf16> to vector<512x128xbf16>
    %cst_56 = arith.constant dense<0.000000e+00> : vector<128x128xf32>
    %116 = tpu.matmul %113, %115, %cst_56 {dimension_numbers = #tpu.dot_dimension_numbers<[1], [0], [0], [1], [0, 0, 1, 1], [], []>} : vector<128x512xbf16>, vector<512x128xbf16>, vector<128x128xf32> -> vector<128x128xf32>
    %117 = vector.broadcast %17 : vector<1x128xf32> to vector<128x128xf32>
    %118 = arith.addf %116, %117 : vector<128x128xf32>
    %119 = arith.addf %98, %118 : vector<128x128xf32>
    %cst_57 = arith.constant dense<0.000000e+00> : vector<128xf32>
    %120 = vector.multi_reduction <add>, %119, %cst_57 [1] : vector<128x128xf32> to vector<128xf32>
    %121 = vector.shape_cast %120 : vector<128xf32> to vector<128x1xf32>
    %cst_58 = arith.constant 1.280000e+02 : f32
    %122 = vector.broadcast %cst_58 : f32 to vector<128x1xf32>
    %123 = arith.divf %121, %122 : vector<128x1xf32>
    %124 = vector.broadcast %123 : vector<128x1xf32> to vector<128x128xf32>
    %125 = arith.subf %119, %124 : vector<128x128xf32>
    %126 = arith.mulf %125, %125 : vector<128x128xf32>
    %cst_59 = arith.constant dense<0.000000e+00> : vector<128xf32>
    %127 = vector.multi_reduction <add>, %126, %cst_59 [1] : vector<128x128xf32> to vector<128xf32>
    %128 = vector.shape_cast %127 : vector<128xf32> to vector<128x1xf32>
    %cst_60 = arith.constant 1.280000e+02 : f32
    %129 = vector.broadcast %cst_60 : f32 to vector<128x1xf32>
    %130 = arith.divf %128, %129 : vector<128x1xf32>
    %131 = vector.broadcast %123 : vector<128x1xf32> to vector<128x128xf32>
    %132 = arith.subf %119, %131 : vector<128x128xf32>
    %cst_61 = arith.constant 9.99999996E-13 : f32
    %133 = vector.broadcast %cst_61 : f32 to vector<128x1xf32>
    %134 = arith.addf %130, %133 : vector<128x1xf32>
    %135 = math.rsqrt %134 : vector<128x1xf32>
    %136 = vector.broadcast %135 : vector<128x1xf32> to vector<128x128xf32>
    %137 = arith.mulf %132, %136 : vector<128x128xf32>
    %138 = vector.broadcast %19 : vector<1x128xf32> to vector<128x128xf32>
    %139 = arith.mulf %137, %138 : vector<128x128xf32>
    %140 = vector.broadcast %21 : vector<1x128xf32> to vector<128x128xf32>
    %141 = arith.addf %139, %140 : vector<128x128xf32>
    %c0_62 = arith.constant 0 : index
    %c0_63 = arith.constant 0 : index
    %142 = vector.load %arg13[%c0_62, %c0_63] : memref<128x128xf32, #tpu.memory_space<vmem>>, vector<128x128xf32>
    tpu.vector_store %arg13[%c0_62, %c0_63], %141 {strides = array<i32>} : memref<128x128xf32, #tpu.memory_space<vmem>>, vector<128x128xf32>,
    %c1_i32 = arith.constant 1 : i32
    %143 = arith.cmpi eq, %arg1, %c1_i32 : i32
    %144 = arith.extui %143 : i1 to i32
    %c0_i32_64 = arith.constant 0 : i32
    %145 = arith.cmpi ne, %144, %c0_i32_64 : i32
    scf.if %145 {
      %146 = arith.index_cast %arg0 : i32 to index
      %147 = memref.load %arg3[%146] : memref<2xi32, #tpu.memory_space<smem>>
      %c8_i32 = arith.constant 8 : i32
      %148 = arith.minsi %147, %c8_i32 : i32
      %149 = tpu.iota {dimensions = array<i32: 0>} : vector<8x128xi32>
      %150 = tpu.iota {dimensions = array<i32: 1>} : vector<8x128xi32>
      %c0_i32_65 = arith.constant 0 : i32
      %151 = vector.broadcast %c0_i32_65 : i32 to vector<8x128xi32>
      %c0_i32_66 = arith.constant 0 : i32
      %152 = vector.broadcast %c0_i32_66 : i32 to vector<8x128xi32>
      %153 = arith.cmpi eq, %149, %152 : vector<8x128xi32>
      %154 = arith.index_cast %arg0 : i32 to index
      %c0_67 = arith.constant 0 : index
      %155 = memref.load %arg2[%154, %c0_67] : memref<2x10xi32, #tpu.memory_space<smem>>
      %156 = vector.broadcast %155 : i32 to vector<8x128xi32>
      %157 = arith.select %153, %156, %151 : vector<8x128xi1>, vector<8x128xi32>
      %c1_i32_68 = arith.constant 1 : i32
      %158 = vector.broadcast %c1_i32_68 : i32 to vector<8x128xi32>
      %159 = arith.cmpi eq, %149, %158 : vector<8x128xi32>
      %160 = arith.index_cast %arg0 : i32 to index
      %c1 = arith.constant 1 : index
      %161 = memref.load %arg2[%160, %c1] : memref<2x10xi32, #tpu.memory_space<smem>>
      %162 = vector.broadcast %161 : i32 to vector<8x128xi32>
      %163 = arith.select %159, %162, %157 : vector<8x128xi1>, vector<8x128xi32>
      %c2_i32 = arith.constant 2 : i32
      %164 = vector.broadcast %c2_i32 : i32 to vector<8x128xi32>
      %165 = arith.cmpi eq, %149, %164 : vector<8x128xi32>
      %166 = arith.index_cast %arg0 : i32 to index
      %c2 = arith.constant 2 : index
      %167 = memref.load %arg2[%166, %c2] : memref<2x10xi32, #tpu.memory_space<smem>>
      %168 = vector.broadcast %167 : i32 to vector<8x128xi32>
      %169 = arith.select %165, %168, %163 : vector<8x128xi1>, vector<8x128xi32>
      %c3_i32 = arith.constant 3 : i32
      %170 = vector.broadcast %c3_i32 : i32 to vector<8x128xi32>
      %171 = arith.cmpi eq, %149, %170 : vector<8x128xi32>
      %172 = arith.index_cast %arg0 : i32 to index
      %c3 = arith.constant 3 : index
      %173 = memref.load %arg2[%172, %c3] : memref<2x10xi32, #tpu.memory_space<smem>>
      %174 = vector.broadcast %173 : i32 to vector<8x128xi32>
      %175 = arith.select %171, %174, %169 : vector<8x128xi1>, vector<8x128xi32>
      %c4_i32 = arith.constant 4 : i32
      %176 = vector.broadcast %c4_i32 : i32 to vector<8x128xi32>
      %177 = arith.cmpi eq, %149, %176 : vector<8x128xi32>
      %178 = arith.index_cast %arg0 : i32 to index
      %c4 = arith.constant 4 : index
      %179 = memref.load %arg2[%178, %c4] : memref<2x10xi32, #tpu.memory_space<smem>>
      %180 = vector.broadcast %179 : i32 to vector<8x128xi32>
      %181 = arith.select %177, %180, %175 : vector<8x128xi1>, vector<8x128xi32>
      %c5_i32 = arith.constant 5 : i32
      %182 = vector.broadcast %c5_i32 : i32 to vector<8x128xi32>
      %183 = arith.cmpi eq, %149, %182 : vector<8x128xi32>
      %184 = arith.index_cast %arg0 : i32 to index
      %c5 = arith.constant 5 : index
      %185 = memref.load %arg2[%184, %c5] : memref<2x10xi32, #tpu.memory_space<smem>>
      %186 = vector.broadcast %185 : i32 to vector<8x128xi32>
      %187 = arith.select %183, %186, %181 : vector<8x128xi1>, vector<8x128xi32>
      %c6_i32 = arith.constant 6 : i32
      %188 = vector.broadcast %c6_i32 : i32 to vector<8x128xi32>
      %189 = arith.cmpi eq, %149, %188 : vector<8x128xi32>
      %190 = arith.index_cast %arg0 : i32 to index
      %c6 = arith.constant 6 : index
      %191 = memref.load %arg2[%190, %c6] : memref<2x10xi32, #tpu.memory_space<smem>>
      %192 = vector.broadcast %191 : i32 to vector<8x128xi32>
      %193 = arith.select %189, %192, %187 : vector<8x128xi1>, vector<8x128xi32>
      %c7_i32 = arith.constant 7 : i32
      %194 = vector.broadcast %c7_i32 : i32 to vector<8x128xi32>
      %195 = arith.cmpi eq, %149, %194 : vector<8x128xi32>
      %196 = arith.index_cast %arg0 : i32 to index
      %c7 = arith.constant 7 : index
      %197 = memref.load %arg2[%196, %c7] : memref<2x10xi32, #tpu.memory_space<smem>>
      %198 = vector.broadcast %197 : i32 to vector<8x128xi32>
      %199 = arith.select %195, %198, %193 : vector<8x128xi1>, vector<8x128xi32>
      %200 = arith.cmpi eq, %150, %199 : vector<8x128xi32>
      %201 = vector.broadcast %148 : i32 to vector<8x128xi32>
      %202 = arith.cmpi slt, %149, %201 : vector<8x128xi32>
      %203 = arith.andi %200, %202 : vector<8x128xi1>
      %cst_69 = arith.constant 1.000000e+00 : f32
      %cst_70 = arith.constant 0.000000e+00 : f32
      %204 = vector.broadcast %cst_69 : f32 to vector<8x128xf32>
      %205 = vector.broadcast %cst_70 : f32 to vector<8x128xf32>
      %206 = arith.select %203, %204, %205 : vector<8x128xi1>, vector<8x128xf32>
      %cst_71 = arith.constant dense<0.000000e+00> : vector<8x128xf32>
      %207 = tpu.matmul %206, %141, %cst_71 {dimension_numbers = #tpu.dot_dimension_numbers<[1], [0], [0], [1], [0, 0, 1, 1], [], []>} : vector<8x128xf32>, vector<128x128xf32>, vector<8x128xf32> -> vector<8x128xf32>
      %c0_72 = arith.constant 0 : index
      %c0_73 = arith.constant 0 : index
      %c0_74 = arith.constant 0 : index
      %208 = vector.load %arg12[%c0_72, %c0_73, %c0_74] : memref<1x8x128xf32, #tpu.memory_space<vmem>>, vector<1x8x128xf32>
      %209 = vector.shape_cast %208 : vector<1x8x128xf32> to vector<8x128xf32>
      %210 = vector.shape_cast %207 : vector<8x128xf32> to vector<1x8x128xf32>
      tpu.vector_store %arg12[%c0_72, %c0_73, %c0_74], %210 {strides = array<i32>} : memref<1x8x128xf32, #tpu.memory_space<vmem>>, vector<1x8x128xf32>,
    } else {
    }
    return
  }
  func.func @transform_0(%arg0: i32, %arg1: i32, %arg2: memref<2x10xi32, #tpu.memory_space<smem>>, %arg3: memref<2xi32, #tpu.memory_space<smem>>) -> (i32, i32, i32) {
    %c0_i32 = arith.constant 0 : i32
    %c0_i32_0 = arith.constant 0 : i32
    %c0_i32_1 = arith.constant 0 : i32
    return %arg0, %c0_i32, %c0_i32_0 : i32, i32, i32
  }
  func.func @transform_1(%arg0: i32, %arg1: i32, %arg2: memref<2x10xi32, #tpu.memory_space<smem>>, %arg3: memref<2xi32, #tpu.memory_space<smem>>) -> (i32, i32, i32) {
    %c0_i32 = arith.constant 0 : i32
    %c0_i32_0 = arith.constant 0 : i32
    %c0_i32_1 = arith.constant 0 : i32
    return %arg0, %c0_i32, %c0_i32_0 : i32, i32, i32
  }
  func.func @transform_2(%arg0: i32, %arg1: i32, %arg2: memref<2x10xi32, #tpu.memory_space<smem>>, %arg3: memref<2xi32, #tpu.memory_space<smem>>) -> (i32, i32) {
    %c0_i32 = arith.constant 0 : i32
    %c0_i32_0 = arith.constant 0 : i32
    %c0_i32_1 = arith.constant 0 : i32
    return %c0_i32, %c0_i32_0 : i32, i32
  }
  func.func @transform_3(%arg0: i32, %arg1: i32, %arg2: memref<2x10xi32, #tpu.memory_space<smem>>, %arg3: memref<2xi32, #tpu.memory_space<smem>>) -> (i32, i32, i32) {
    %c0_i32 = arith.constant 0 : i32
    %c0_i32_0 = arith.constant 0 : i32
    %c0_i32_1 = arith.constant 0 : i32
    return %arg1, %c0_i32, %c0_i32_0 : i32, i32, i32
  }
  func.func @transform_4(%arg0: i32, %arg1: i32, %arg2: memref<2x10xi32, #tpu.memory_space<smem>>, %arg3: memref<2xi32, #tpu.memory_space<smem>>) -> (i32, i32, i32) {
    %c0_i32 = arith.constant 0 : i32
    %c0_i32_0 = arith.constant 0 : i32
    %c0_i32_1 = arith.constant 0 : i32
    return %arg1, %c0_i32, %c0_i32_0 : i32, i32, i32
  }
  func.func @transform_5(%arg0: i32, %arg1: i32, %arg2: memref<2x10xi32, #tpu.memory_space<smem>>, %arg3: memref<2xi32, #tpu.memory_space<smem>>) -> (i32, i32, i32) {
    %c0_i32 = arith.constant 0 : i32
    %c0_i32_0 = arith.constant 0 : i32
    %c0_i32_1 = arith.constant 0 : i32
    return %arg1, %c0_i32, %c0_i32_0 : i32, i32, i32
  }
  func.func @transform_6(%arg0: i32, %arg1: i32, %arg2: memref<2x10xi32, #tpu.memory_space<smem>>, %arg3: memref<2xi32, #tpu.memory_space<smem>>) -> (i32, i32, i32) {
    %c0_i32 = arith.constant 0 : i32
    %c0_i32_0 = arith.constant 0 : i32
    %c0_i32_1 = arith.constant 0 : i32
    return %arg1, %c0_i32, %c0_i32_0 : i32, i32, i32
  }
  func.func @transform_7(%arg0: i32, %arg1: i32, %arg2: memref<2x10xi32, #tpu.memory_space<smem>>, %arg3: memref<2xi32, #tpu.memory_space<smem>>) -> (i32, i32, i32) {
    %c0_i32 = arith.constant 0 : i32
    %c0_i32_0 = arith.constant 0 : i32
    %c0_i32_1 = arith.constant 0 : i32
    return %arg1, %c0_i32, %c0_i32_0 : i32, i32, i32
  }
  func.func @transform_8(%arg0: i32, %arg1: i32, %arg2: memref<2x10xi32, #tpu.memory_space<smem>>, %arg3: memref<2xi32, #tpu.memory_space<smem>>) -> (i32, i32, i32) {
    %c0_i32 = arith.constant 0 : i32
    %c0_i32_0 = arith.constant 0 : i32
    %c0_i32_1 = arith.constant 0 : i32
    return %arg0, %c0_i32, %c0_i32_0 : i32, i32, i32
  }
}

</mosaic_0001>

<bundles_post_ra>
// kernel: bert_cls_encoder.1
= control target key start
LH: loop header
LB: loop body
LE: loop exit
PB: predicated region body
PF: predicated region fallthrough
CT: control target
= control target key end

     0   :  { %s7737_s0 = inlined_call_operand.vmem [shape: s32[2,10], index: 0, kind: input, shape index: {}]   ;;  %s7738_s2 = inlined_call_operand.vmem [shape: f32[2,128,128], index: 2, kind: input, shape index: {}]   ;;  %s7739_s3 = inlined_call_operand.vmem [shape: f32[2,1,128], index: 3, kind: input, shape index: {}]   ;;  %s7740_s4 = inlined_call_operand.vmem [shape: f32[2,128], index: 4, kind: input, shape index: {}]   ;;  %s7741_s5 = inlined_call_operand.vmem [shape: bf16[2,128,384], index: 5, kind: input, shape index: {}]   ;;  %s7742_s6 = inlined_call_operand.vmem [shape: bf16[2,128,128], index: 6, kind: input, shape index: {}]   ;;  %s7743_s7 = inlined_call_operand.vmem [shape: bf16[2,128,512], index: 7, kind: input, shape index: {}]   ;;  %s7744_s8 = inlined_call_operand.vmem [shape: bf16[2,512,128], index: 8, kind: input, shape index: {}]   ;;  %s7745_s9 = inlined_call_operand.vmem [shape: f32[2,1,1664], index: 9, kind: input, shape index: {}]   ;;  %s7746_s10 = inlined_call_operand.hbm [shape: f32[2,8,128], index: 10, kind: output, shape index: {}]   ;;  %s7747_s1 = inlined_call_operand.vmem [shape: s32[2], index: 1, kind: input, shape index: {}]  }
   0x1   :  { %7772 = sst [smem:[#allocation30_spill]] %s7738_s2  ;;  %s15_s15 = sshll.u32 %s7737_s0, 4  ;;  %s16_s15 = int_to_ptr.vmem [resolvable:$true] %s15_s15 }
   0x2   :  { %7773 = sst [smem:[#allocation31_spill]] %s7746_s10  ;;  %s19_s18 = sshll.u32 %s7747_s1, 4  ;;  %s20_s18 = int_to_ptr.vmem [resolvable:$true] %s19_s18 }
   0x3   :  { %s5621_s19 = scalar_lea.vmem %s16_s15, 32  ;;  %p5626_p1 = scmp.lt.s32.totalorder %s16_s15, %s16_s15 }
   0x4   :  { %p5622_p0 = scmp.ne.s32.totalorder %s16_s15, %s5621_s19  ;;  %p5627_p2 = scmp.lt.s32.totalorder %s5621_s19, %s5621_s19 }
   0x6   :  { %p5628_p3 = por %p5627_p2, %p5626_p1 }
   0x8   :  { %p5629_p4 = pnand %p5628_p3, %p5622_p0 }
   0xa   :  { %5632 = shalt.err (!%p5629_p4)  }
   0xb   :  { %s5741_s20 = smov [#allocation4]   ;;  %s5633_s21 = scalar_lea.vmem %s20_s18, 16 }
   0xc   :  { %18 = dma.vmem_to_smem %s16_s15, 32, %s5741_s20, [#allocation3] }
   0xd   :  { %p5634_p5 = scmp.ne.s32.totalorder %s20_s18, %s5633_s21  ;;  %p5638_p6 = scmp.lt.s32.totalorder %s20_s18, %s20_s18 }
   0xe   :  { %p5639_p7 = scmp.lt.s32.totalorder %s5633_s21, %s5633_s21 }
  0x10   :  { %p5640_p8 = por %p5639_p7, %p5638_p6 }
  0x12   :  { %p5641_p9 = pnand %p5640_p8, %p5634_p5 }
  0x14   :  { %5644 = shalt.err (!%p5641_p9)  }
  0x15   :  { %s5742_s0 = smov [#allocation5]  }
  0x16   :  { %22 = dma.vmem_to_smem %s20_s18, 16, %s5742_s0, [#allocation3] }
  0x17   :  { %5703 = dma.done.wait [#allocation3], 48 }
  0x18   :  { %5704 = vsyncadd [#allocation3], 4294967248 }
  0x19   :  { %24 = sfence }
  0x1a   :  { %25 = vsyncpa [#allocation7], 0 }
  0x1b   :  { %27 = vsyncpa [#allocation7 + $0x1], 0  ;;  %s5810_s1 = smov 0   ;;  %s5812_s22 = smov 0  }
  0x1c   :  { %s5814_s23 = smov 0   ;;  %s5816_s24 = smov 0  }
  0x1d   :  { %s5818_s25 = smov 0   ;;  %s5820_s26 = smov 0  }
  0x1e   :  { %s5822_s27 = smov 0   ;;  %s5824_s28 = smov 0  }
  0x1f LB: > { %7774 = sst [smem:[#allocation10_spill]] %s5711_s1  ;;  %s4381_s29 = sadd.s32 4294967295, %s5739_s28   ;;  %s5739_s28 = sphi %s5824_s28, %s33_s28   ;;  %s5735_s27 = sphi %s5822_s27, %s7820_s27   ;;  %s5731_s26 = sphi %s5820_s26, %s7819_s26   ;;  %s5727_s25 = sphi %s5818_s25, %s7818_s25   ;;  %s5723_s24 = sphi %s5816_s24, %s7817_s24   ;;  %s5719_s23 = sphi %s5814_s23, %s7816_s23   ;;  %s5715_s22 = sphi %s5812_s22, %s7822_s22   ;;  %s5711_s1 = sphi %s5810_s1, %s7821_s1  }
  0x20   : > { %7775 = sst [smem:[#allocation11_spill]] %s5719_s23  ;;  %s4382_s30 = sadd.s32 4294967294, %s5739_s28  }
  0x21   : > { %7776 = sst [smem:[#allocation12_spill]] %s5731_s26  ;;  %s42_s11 = sadd.s32 1, %s5731_s26 }
  0x22   : > { %7777 = sst [smem:[#allocation13_spill]] %s5735_s27  ;;  %p43_p10 = scmp.ge.s32.totalorder %s42_s11, 2 }
  0x23   : > { %7778 = sst [smem:[#allocation14_spill]] %s5739_s28  ;;  %s45_s12 = sadd.s32 1, %s5735_s27 }
  0x24   : > { %p265_p11 = scmp.ne.s32.totalorder %s5719_s23, %s5715_s22  ;;  %p266_p12 = scmp.eq.s32.totalorder %s4381_s29, 3 }
  0x25   : > { %s7824_s11 = smov (%p43_p10, %s42_s11), 0  ;;  %s7826_s12 = smov (!%p43_p10, %s45_s12), %s5735_s27 }
  0x26   : > { %7779 = sst [smem:[#allocation15_spill]] %s7824_s11  ;;  %p5859_p13 = por %p266_p12, %p265_p11 }
  0x27   : > { %p271_p0 = scmp.ne.s32.totalorder %s5715_s22, %s5711_s1  ;;  %p47_p1 = scmp.ge.s32.totalorder %s7826_s12, 2 }
  0x28   : > { %s7780_s13 = scalar_select %p5859_p13, 1, 0 }
  0x29   : > { %p272_p2 = scmp.eq.s32.totalorder %s4382_s30, 3  ;;  %p4385_p3 = scmp.ge.s32.totalorder %s5739_s28, 1 }
  0x2a   : > { %7781 = sst [smem:[#allocation16_spill]] %s7780_s13  ;;  %p346_p4 = scmp.lt.s32.totalorder %s5739_s28, 5 }
  0x2b   : > { %s7828_s12 = smov (%p47_p1, %s7826_s12), 0  ;;  %p5869_p5 = por %p272_p2, %p271_p0 }
  0x2c   : > { %7782 = sst [smem:[#allocation17_spill]] %s7828_s12  ;;  %p347_p6 = pnand %p4385_p3, %p346_p4 }
  0x2d   : > { %s7783_s14 = scalar_select %p5869_p5, 1, 0 }
  0x2e   : > { %s252_s15 = ssub.s32 %s5735_s27, %s7828_s12  ;;  %s255_s16 = sadd.s32 1, %s5719_s23 }
  0x2f   : > { %7784 = sst [smem:[#allocation18_spill]] %s7783_s14  ;;  %p253_p7 = scmp.eq.s32.totalorder %s252_s15, 0 }
  0x30   : > { %350 = sbr.rel (%p347_p6) target bundleno = 3411 (0xd53), region = 52 }
  0x31   : > { %s5877_s17 = scalar_select %p253_p7, %s5719_s23, %s255_s16  }
  0x33   : > { %7785 = sst [smem:[#allocation19_spill]] %s5877_s17 }
  0x35   : > { %s7750_s18 = sand.u32 1, %s5715_s22   ;;  %p407_p8 = scmp.lt.s32.totalorder %s5727_s25, 1 }
  0x36   : > { %s5883_s19 = sshll.u32 %s7750_s18, 3  ;;  %p415_p9 = scmp.lt.s32.totalorder %s5723_s24, 1 }
  0x37   : > { %s5887_s20 = scalar_select %p407_p8, %s5727_s25, 1 }
  0x38   : > { %s416_s21 = scalar_select %p415_p9, %s5723_s24, 1 }
  0x39   : > { %s4541_s0 = sshll.u32 %s5887_s20, 7  ;;  %s7786_s2 = sld [smem:[#allocation30_spill]] }
  0x3a   : > { %s5053_s27 = smul.u32 192, %s416_s21  ;;  %s4542_s18 = sshll.u32 %s416_s21, 6 }
  0x3b   : > { %s4543_s26 = sshll.u32 %s416_s21, 8  ;;  %s5908_s10 = scalar_lea.vmem %s7742_s6, %s4542_s18 }
  0x3c   : > { %s5903_s14 = scalar_lea.vmem %s7741_s5, %s5053_s27  ;;  %s5913_s15 = scalar_lea.vmem %s7743_s7, %s4543_s26 }
  0x3d   : > { %s5918_s16 = scalar_lea.vmem %s7744_s8, %s4543_s26  ;;  %s406_s17 = scalar_lea.vmem [#allocation6], %s5883_s19 }
  0x3e   : > { %p4396_p10 = scmp.ne.s32.totalorder %s5723_s24, 0 }
  0x3f   : > { %s5898_s11 = scalar_lea.vmem %s7786_s2, %s4541_s0  ;;  %s5054_s2 = smul.u32 13, %s416_s21 }
  0x40   : > { %443 = sbr.rel (%p4396_p10) target bundleno = 409 (0x199), region = 56 }
  0x41   : > { %s5923_s27 = scalar_lea.vmem %s7745_s9, %s5054_s2 }
  0x45   : > { %v444_v0 = vld [vmem:[%s5898_s11] sm:$0xff]  ;;  %v446_v1 = vld [vmem:[%s5898_s11 + $0x10] sm:$0xff]  ;;  %v445_v2 = vld [vmem:[%s5898_s11 + $0x8] sm:$0xff] }
  0x46   : > { %462 = vadd.xlane.f32.xlu0 %v444_v0  ;;  %466 = vadd.xlane.f32.xlu1 %v446_v1  ;;  %v447_v3 = vld [vmem:[%s5898_s11 + $0x18] sm:$0xff]  ;;  %v448_v4 = vld [vmem:[%s5898_s11 + $0x20] sm:$0xff]  ;;  %v449_v5 = vld [vmem:[%s5898_s11 + $0x28] sm:$0xff] }
  0x47   : > { %v450_v6 = vld [vmem:[%s5898_s11 + $0x30] sm:$0xff]  ;;  %v451_v7 = vld [vmem:[%s5898_s11 + $0x38] sm:$0xff]  ;;  %v452_v8 = vld [vmem:[%s5898_s11 + $0x40] sm:$0xff] }
  0x48   : > { %v453_v9 = vld [vmem:[%s5898_s11 + $0x48] sm:$0xff]  ;;  %v454_v10 = vld [vmem:[%s5898_s11 + $0x50] sm:$0xff]  ;;  %v5939_v11 = vld [vmem:[%s5898_s11 + $0x58] sm:$0xff] }
  0x49   : > { %v5943_v12 = vld [vmem:[%s5898_s11 + $0x60] sm:$0xff]  ;;  %v5946_v13 = vld [vmem:[%s5898_s11 + $0x68] sm:$0xff]  ;;  %v5951_v14 = vld [vmem:[%s5898_s11 + $0x70] sm:$0xff] }
  0x4a   : > { %464 = vadd.xlane.f32.xlu0 %v445_v2  ;;  %468 = vadd.xlane.f32.xlu1 %v447_v3  ;;  %v5954_v15 = vld [vmem:[%s5898_s11 + $0x78] sm:$0xff] }
  0x4e   : > { %470 = vadd.xlane.f32.xlu0 %v448_v4  ;;  %472 = vadd.xlane.f32.xlu1 %v449_v5 }
  0x52   : > { %474 = vadd.xlane.f32.xlu0 %v450_v6  ;;  %476 = vadd.xlane.f32.xlu1 %v451_v7 }
  0x56   : > { %478 = vadd.xlane.f32.xlu0 %v452_v8  ;;  %480 = vadd.xlane.f32.xlu1 %v453_v9 }
  0x5a   : > { %482 = vadd.xlane.f32.xlu0 %v454_v10  ;;  %484 = vadd.xlane.f32.xlu1 %v5939_v11 }
  0x5e   : > { %486 = vadd.xlane.f32.xlu0 %v5943_v12  ;;  %488 = vadd.xlane.f32.xlu1 %v5946_v13 }
  0x62   : > { %490 = vadd.xlane.f32.xlu0 %v5951_v14  ;;  %492 = vadd.xlane.f32.xlu1 %v5954_v15 }
  0xcf   : > { %v463_v16 = vpop.xlane.xlu0 %462  ;;  %v467_v17 = vpop.xlane.xlu1 %466 }
  0xd0   : > { %v495_v18 = vmul.f32 0.0078125, %v463_v16  ;;  %v497_v19 = vmul.f32 0.0078125, %v467_v17 }
  0xd2   : > { %v5958_v20 = vsub.f32 %v444_v0, %v495_v18  ;;  %v5960_v21 = vsub.f32 %v446_v1, %v497_v19 }
  0xd3   : > { %v465_v22 = vpop.xlane.xlu0 %464  ;;  %v469_v23 = vpop.xlane.xlu1 %468 }
  0xd4   : > { %v496_v24 = vmul.f32 0.0078125, %v465_v22  ;;  %v527_v25 = vmul.f32 %v5958_v20, %v5958_v20  ;;  %v498_v26 = vmul.f32 0.0078125, %v469_v23  ;;  %v529_v29 = vmul.f32 %v5960_v21, %v5960_v21 }
  0xd6   : > { %v5964_v27 = vsub.f32 %v445_v2, %v496_v24  ;;  %543 = vadd.xlane.f32.xlu0 %v527_v25  ;;  %v5966_v28 = vsub.f32 %v447_v3, %v498_v26 }
  0xd7   : > { %v471_v30 = vpop.xlane.xlu0 %470  ;;  %v473_v31 = vpop.xlane.xlu1 %472 }
  0xd8   : > { %v499_v32 = vmul.f32 0.0078125, %v471_v30  ;;  %v528_v33 = vmul.f32 %v5964_v27, %v5964_v27  ;;  %v500_v34 = vmul.f32 0.0078125, %v473_v31  ;;  %v530_v37 = vmul.f32 %v5966_v28, %v5966_v28 }
  0xda   : > { %v5972_v35 = vsub.f32 %v448_v4, %v499_v32  ;;  %547 = vadd.xlane.f32.xlu0 %v529_v29  ;;  %545 = vadd.xlane.f32.xlu1 %v528_v33  ;;  %v5974_v36 = vsub.f32 %v449_v5, %v500_v34 }
  0xdb   : > { %v475_v38 = vpop.xlane.xlu0 %474  ;;  %v477_v39 = vpop.xlane.xlu1 %476 }
  0xdc   : > { %v501_v40 = vmul.f32 0.0078125, %v475_v38  ;;  %v531_v41 = vmul.f32 %v5972_v35, %v5972_v35  ;;  %v502_v42 = vmul.f32 0.0078125, %v477_v39  ;;  %v532_v45 = vmul.f32 %v5974_v36, %v5974_v36 }
  0xde   : > { %v5980_v43 = vsub.f32 %v450_v6, %v501_v40  ;;  %549 = vadd.xlane.f32.xlu1 %v530_v37  ;;  %551 = vadd.xlane.f32.xlu0 %v531_v41  ;;  %v5982_v44 = vsub.f32 %v451_v7, %v502_v42 }
  0xdf   : > { %v479_v46 = vpop.xlane.xlu0 %478  ;;  %v481_v47 = vpop.xlane.xlu1 %480 }
  0xe0   : > { %v503_v48 = vmul.f32 0.0078125, %v479_v46  ;;  %v533_v49 = vmul.f32 %v5980_v43, %v5980_v43  ;;  %v504_v50 = vmul.f32 0.0078125, %v481_v47  ;;  %v534_v53 = vmul.f32 %v5982_v44, %v5982_v44 }
  0xe2   : > { %v5988_v51 = vsub.f32 %v452_v8, %v503_v48  ;;  %553 = vadd.xlane.f32.xlu1 %v532_v45  ;;  %555 = vadd.xlane.f32.xlu0 %v533_v49  ;;  %v5990_v52 = vsub.f32 %v453_v9, %v504_v50  ;;  %v6030_v50 = vld [vmem:[%s7740_s4] ss:$0 sm:$0xff] }
  0xe3   : > { %v483_v54 = vpop.xlane.xlu0 %482  ;;  %v485_v55 = vpop.xlane.xlu1 %484 }
  0xe4   : > { %v505_v56 = vmul.f32 0.0078125, %v483_v54  ;;  %v535_v57 = vmul.f32 %v5988_v51, %v5988_v51  ;;  %v506_v58 = vmul.f32 0.0078125, %v485_v55  ;;  %v536_v61 = vmul.f32 %v5990_v52, %v5990_v52 }
  0xe6   : > { %v5996_v59 = vsub.f32 %v454_v10, %v505_v56  ;;  %557 = vadd.xlane.f32.xlu1 %v534_v53  ;;  %559 = vadd.xlane.f32.xlu0 %v535_v57  ;;  %v5999_v60 = vsub.f32 %v5939_v11, %v506_v58  ;;  %v6036_v56 = vld [vmem:[%s7740_s4 + $0x1] ss:$0 sm:$0xff] }
  0xe7   : > { %v487_v62 = vpop.xlane.xlu0 %486  ;;  %v489_v63 = vpop.xlane.xlu1 %488 }
  0xe8   : > { %v507_v0 = vmul.f32 0.0078125, %v487_v62  ;;  %v537_v1 = vmul.f32 %v5996_v59, %v5996_v59  ;;  %v508_v2 = vmul.f32 0.0078125, %v489_v63  ;;  %v538_v5 = vmul.f32 %v5999_v60, %v5999_v60 }
  0xea   : > { %v6006_v3 = vsub.f32 %v5943_v12, %v507_v0  ;;  %561 = vadd.xlane.f32.xlu1 %v536_v61  ;;  %563 = vadd.xlane.f32.xlu0 %v537_v1  ;;  %v6009_v4 = vsub.f32 %v5946_v13, %v508_v2 }
  0xeb   : > { %v491_v6 = vpop.xlane.xlu0 %490  ;;  %v493_v7 = vpop.xlane.xlu1 %492 }
  0xec   : > { %v509_v8 = vmul.f32 0.0078125, %v491_v6  ;;  %v539_v9 = vmul.f32 %v6006_v3, %v6006_v3  ;;  %v510_v10 = vmul.f32 0.0078125, %v493_v7  ;;  %v540_v13 = vmul.f32 %v6009_v4, %v6009_v4 }
  0xee   : > { %v6016_v11 = vsub.f32 %v5951_v14, %v509_v8  ;;  %565 = vadd.xlane.f32.xlu1 %v538_v5  ;;  %567 = vadd.xlane.f32.xlu0 %v539_v9  ;;  %v6019_v12 = vsub.f32 %v5954_v15, %v510_v10 }
  0xf0   : > { %v541_v16 = vmul.f32 %v6016_v11, %v6016_v11  ;;  %v542_v17 = vmul.f32 %v6019_v12, %v6019_v12 }
  0xf2   : > { %569 = vadd.xlane.f32.xlu1 %v540_v13  ;;  %571 = vadd.xlane.f32.xlu0 %v541_v16 }
  0xf6   : > { %573 = vadd.xlane.f32.xlu1 %v542_v17 }
 0x15f   : > { %v544_v18 = vpop.xlane.xlu0 %543 }
 0x160   : > { %v575_v14 = vmul.f32 0.0078125, %v544_v18 }
 0x162   : > { %v591_v19 = vadd.f32 1e-12, %v575_v14 }
 0x163   : > { %v546_v22 = vpop.xlane.xlu1 %545  ;;  %v548_v23 = vpop.xlane.xlu0 %547 }
 0x164   : > { %5133 = vrsqrt.f32 %v591_v19  ;;  %v576_v15 = vmul.f32 0.0078125, %v546_v22  ;;  %v577_v24 = vmul.f32 0.0078125, %v548_v23 }
 0x166   : > { %v592_v25 = vadd.f32 1e-12, %v576_v15  ;;  %v593_v26 = vadd.f32 1e-12, %v577_v24 }
 0x167   : > { %v550_v29 = vpop.xlane.xlu1 %549  ;;  %v552_v30 = vpop.xlane.xlu0 %551 }
 0x168   : > { %5135 = vrsqrt.f32 %v592_v25  ;;  %v578_v31 = vmul.f32 0.0078125, %v550_v29  ;;  %v579_v32 = vmul.f32 0.0078125, %v552_v30 }
 0x169   : > { %5137 = vrsqrt.f32 %v593_v26 }
 0x16a   : > { %v594_v33 = vadd.f32 1e-12, %v578_v31  ;;  %v595_v34 = vadd.f32 1e-12, %v579_v32 }
 0x16b   : > { %v554_v37 = vpop.xlane.xlu1 %553  ;;  %v556_v38 = vpop.xlane.xlu0 %555 }
 0x16c   : > { %5139 = vrsqrt.f32 %v594_v33  ;;  %v580_v39 = vmul.f32 0.0078125, %v554_v37  ;;  %v581_v40 = vmul.f32 0.0078125, %v556_v38 }
 0x16d   : > { %5141 = vrsqrt.f32 %v595_v34 }
 0x16e   : > { %v596_v41 = vadd.f32 1e-12, %v580_v39  ;;  %v597_v42 = vadd.f32 1e-12, %v581_v40 }
 0x16f   : > { %v558_v45 = vpop.xlane.xlu1 %557  ;;  %v560_v46 = vpop.xlane.xlu0 %559 }
 0x170   : > { %5143 = vrsqrt.f32 %v596_v41  ;;  %v582_v47 = vmul.f32 0.0078125, %v558_v45  ;;  %v583_v48 = vmul.f32 0.0078125, %v560_v46 }
 0x171   : > { %v5134_v49 = vpop.eup %5133  ;;  %5145 = vrsqrt.f32 %v597_v42 }
 0x172   : > { %v623_v53 = vmul.f32 %v5134_v49, %v5958_v20  ;;  %v598_v54 = vadd.f32 1e-12, %v582_v47  ;;  %v599_v55 = vadd.f32 1e-12, %v583_v48 }
 0x173   : > { %v562_v57 = vpop.xlane.xlu1 %561  ;;  %v564_v58 = vpop.xlane.xlu0 %563 }
 0x174   : > { %v643_v61 = vmul.f32 %v6030_v50, %v623_v53  ;;  %5147 = vrsqrt.f32 %v598_v54  ;;  %v584_v62 = vmul.f32 0.0078125, %v562_v57  ;;  %v585_v63 = vmul.f32 0.0078125, %v564_v58 }
 0x175   : > { %v5136_v0 = vpop.eup %5135  ;;  %5149 = vrsqrt.f32 %v599_v55 }
 0x176   : > { %v5138_v1 = vpop.eup %5137  ;;  %v663_v2 = vadd.f32 %v6036_v56, %v643_v61  ;;  %v624_v20 = vmul.f32 %v5136_v0, %v5964_v27  ;;  %v600_v5 = vadd.f32 1e-12, %v584_v62  ;;  %v601_v6 = vadd.f32 1e-12, %v585_v63 }
 0x177   : > { %v625_v7 = vmul.f32 %v5138_v1, %v5960_v21  ;;  %v566_v8 = vpop.xlane.xlu1 %565  ;;  %v568_v9 = vpop.xlane.xlu0 %567 }
 0x178   : > { %679 = vst [vmem:[#allocation2 + $0x30] sm:$0xff] %v663_v2  ;;  %v644_v10 = vmul.f32 %v6030_v50, %v624_v20  ;;  %5151 = vrsqrt.f32 %v600_v5  ;;  %v586_v13 = vmul.f32 0.0078125, %v566_v8  ;;  %v587_v16 = vmul.f32 0.0078125, %v568_v9 }
 0x179   : > { %v5140_v17 = vpop.eup %5139  ;;  %v645_v18 = vmul.f32 %v6030_v50, %v625_v7  ;;  %5153 = vrsqrt.f32 %v601_v6 }
 0x17a   : > { %v5142_v14 = vpop.eup %5141  ;;  %v664_v19 = vadd.f32 %v6036_v56, %v644_v10  ;;  %v626_v27 = vmul.f32 %v5140_v17, %v5966_v28  ;;  %v602_v22 = vadd.f32 1e-12, %v586_v13  ;;  %v603_v23 = vadd.f32 1e-12, %v587_v16 }
 0x17b   : > { %v665_v21 = vadd.f32 %v6036_v56, %v645_v18  ;;  %v627_v15 = vmul.f32 %v5142_v14, %v5972_v35  ;;  %v570_v24 = vpop.xlane.xlu1 %569  ;;  %v572_v25 = vpop.xlane.xlu0 %571 }
 0x17c   : > { %680 = vst [vmem:[#allocation2] sm:$0xff] %v664_v19  ;;  %v646_v26 = vmul.f32 %v6030_v50, %v626_v27  ;;  %5155 = vrsqrt.f32 %v602_v22  ;;  %v588_v29 = vmul.f32 0.0078125, %v570_v24  ;;  %v589_v30 = vmul.f32 0.0078125, %v572_v25 }
 0x17d   : > { %v5144_v31 = vpop.eup %5143  ;;  %681 = vst [vmem:[#allocation2 + $0x58] sm:$0xff] %v665_v21  ;;  %v647_v32 = vmul.f32 %v6030_v50, %v627_v15  ;;  %5157 = vrsqrt.f32 %v603_v23 }
 0x17e   : > { %v5146_v28 = vpop.eup %5145  ;;  %v666_v33 = vadd.f32 %v6036_v56, %v646_v26  ;;  %v628_v34 = vmul.f32 %v5144_v31, %v5974_v36  ;;  %v604_v37 = vadd.f32 1e-12, %v588_v29  ;;  %v605_v35 = vadd.f32 1e-12, %v589_v30 }
 0x17f   : > { %v667_v38 = vadd.f32 %v6036_v56, %v647_v32  ;;  %v629_v39 = vmul.f32 %v5146_v28, %v5980_v43  ;;  %v574_v40 = vpop.xlane.xlu1 %573 }
 0x180   : > { %682 = vst [vmem:[#allocation2 + $0x18] sm:$0xff] %v666_v33  ;;  %v648_v41 = vmul.f32 %v6030_v50, %v628_v34  ;;  %5159 = vrsqrt.f32 %v604_v37  ;;  %v590_v42 = vmul.f32 0.0078125, %v574_v40 }
 0x181   : > { %v5148_v45 = vpop.eup %5147  ;;  %683 = vst [vmem:[#allocation2 + $0x50] sm:$0xff] %v667_v38  ;;  %v649_v46 = vmul.f32 %v6030_v50, %v629_v39  ;;  %5161 = vrsqrt.f32 %v605_v35 }
 0x182   : > { %v5150_v47 = vpop.eup %5149  ;;  %v668_v36 = vadd.f32 %v6036_v56, %v648_v41  ;;  %v630_v48 = vmul.f32 %v5148_v45, %v5982_v44  ;;  %v606_v49 = vadd.f32 1e-12, %v590_v42 }
 0x183   : > { %v669_v53 = vadd.f32 %v6036_v56, %v649_v46  ;;  %v631_v43 = vmul.f32 %v5150_v47, %v5988_v51 }
 0x184   : > { %684 = vst [vmem:[#allocation2 + $0x68] sm:$0xff] %v668_v36  ;;  %v650_v54 = vmul.f32 %v6030_v50, %v630_v48  ;;  %5163 = vrsqrt.f32 %v606_v49 }
 0x185   : > { %v5152_v55 = vpop.eup %5151  ;;  %685 = vst [vmem:[#allocation2 + $0x8] sm:$0xff] %v669_v53  ;;  %v651_v57 = vmul.f32 %v6030_v50, %v631_v43 }
 0x186   : > { %v5154_v58 = vpop.eup %5153  ;;  %v670_v61 = vadd.f32 %v6036_v56, %v650_v54  ;;  %v632_v62 = vmul.f32 %v5152_v55, %v5990_v52 }
 0x187   : > { %v671_v44 = vadd.f32 %v6036_v56, %v651_v57  ;;  %v633_v63 = vmul.f32 %v5154_v58, %v5996_v59 }
 0x188   : > { %686 = vst [vmem:[#allocation2 + $0x48] sm:$0xff] %v670_v61  ;;  %v652_v51 = vmul.f32 %v6030_v50, %v632_v62 }
 0x189   : > { %v5156_v0 = vpop.eup %5155  ;;  %687 = vst [vmem:[#allocation2 + $0x40] sm:$0xff] %v671_v44  ;;  %v653_v1 = vmul.f32 %v6030_v50, %v633_v63 }
 0x18a   : > { %v5158_v2 = vpop.eup %5157  ;;  %v672_v20 = vadd.f32 %v6036_v56, %v652_v51  ;;  %v634_v5 = vmul.f32 %v5156_v0, %v5999_v60 }
 0x18b   : > { %v673_v6 = vadd.f32 %v6036_v56, %v653_v1  ;;  %v635_v52 = vmul.f32 %v5158_v2, %v6006_v3 }
 0x18c   : > { %688 = vst [vmem:[#allocation2 + $0x20] sm:$0xff] %v672_v20  ;;  %v654_v7 = vmul.f32 %v6030_v50, %v634_v5 }
 0x18d   : > { %v5160_v59 = vpop.eup %5159  ;;  %689 = vst [vmem:[#allocation2 + $0x10] sm:$0xff] %v673_v6  ;;  %v655_v8 = vmul.f32 %v6030_v50, %v635_v52 }
 0x18e   : > { %v5162_v9 = vpop.eup %5161  ;;  %v674_v10 = vadd.f32 %v6036_v56, %v654_v7  ;;  %v636_v13 = vmul.f32 %v5160_v59, %v6009_v4 }
 0x18f   : > { %v675_v16 = vadd.f32 %v6036_v56, %v655_v8  ;;  %v637_v60 = vmul.f32 %v5162_v9, %v6016_v11 }
 0x190   : > { %690 = vst [vmem:[#allocation2 + $0x38] sm:$0xff] %v674_v10  ;;  %v656_v17 = vmul.f32 %v6030_v50, %v636_v13 }
 0x191   : > { %v5164_v3 = vpop.eup %5163  ;;  %691 = vst [vmem:[#allocation2 + $0x60] sm:$0xff] %v675_v16  ;;  %v657_v18 = vmul.f32 %v6030_v50, %v637_v60 }
 0x192   : > { %v676_v14 = vadd.f32 %v6036_v56, %v656_v17  ;;  %v638_v19 = vmul.f32 %v5164_v3, %v6019_v12 }
 0x193   : > { %v677_v27 = vadd.f32 %v6036_v56, %v657_v18 }
 0x194   : > { %692 = vst [vmem:[#allocation2 + $0x70] sm:$0xff] %v676_v14  ;;  %v658_v4 = vmul.f32 %v6030_v50, %v638_v19 }
 0x195   : > { %693 = vst [vmem:[#allocation2 + $0x78] sm:$0xff] %v677_v27 }
 0x196   : > { %v678_v22 = vadd.f32 %v6036_v56, %v658_v4 }
 0x198   : > { %694 = vst [vmem:[#allocation2 + $0x28] sm:$0xff] %v678_v22 }
 0x199 PF: > { %v5165_v11 = vld [vmem:[%s5903_s14 + $0xac] ss:$12 sps:$4 sm:$0xff]   ;;  %v5167_v12 = vld [vmem:[%s5903_s14 + $0xa8] ss:$12 sps:$4 sm:$0xff]   ;;  %v5743_v23 = vmov 0   ;;  %v696_v29 = vld [vmem:[#allocation2] sm:$0xff]  ;;  %v7760_v59 = vlaneseq  ;;  %s7788_s18 = scalar_lea.vmem %s7739_s3, %s5887_s20 }
 0x19a   : > { %936 = vmatprep.mubr.bf16.mxu0 %v5743_v23  ;;  %904 = vmatprep.subr.bf16.mxu0 %v5165_v11  ;;  %v5168_v50 = vld [vmem:[%s5903_s14 + $0x94] ss:$12 sps:$4 sm:$0xff]   ;;  %v5170_v56 = vld [vmem:[%s5903_s14 + $0x90] ss:$12 sps:$4 sm:$0xff]   ;;  %v5173_v15 = vld [vmem:[%s5903_s14 + $0x78] ss:$12 sps:$4 sm:$0xff]  }
 0x19b   : > { %905 = vmatpush1.bf16.msra.mxu0 %v5167_v12  ;;  %v5171_v21 = vld [vmem:[%s5903_s14 + $0x7c] ss:$12 sps:$4 sm:$0xff]   ;;  %v5174_v24 = vld [vmem:[%s5903_s14 + $0x64] ss:$12 sps:$4 sm:$0xff]   ;;  %v5176_v26 = vld [vmem:[%s5903_s14 + $0x60] ss:$12 sps:$4 sm:$0xff]  }
 0x19c   : > { %906 = vmatprep.subr.bf16.mxu0 %v5168_v50  ;;  %v695_v25 = vld [vmem:[#allocation2 + $0x30] sm:$0xff]  ;;  %v5177_v30 = vld [vmem:[%s5903_s14 + $0x4c] ss:$12 sps:$4 sm:$0xff]   ;;  %v5183_v35 = vld [vmem:[%s5903_s14 + $0x1c] ss:$12 sps:$4 sm:$0xff]   ;;  %v6118_v8 = vshrl.u32 %v7760_v59, 7 }
 0x19d   : > { %v720_v31 = vpack.c.bf16 %v696_v29, %v695_v25  ;;  %v5179_v32 = vld [vmem:[%s5903_s14 + $0x48] ss:$12 sps:$4 sm:$0xff]   ;;  %v5189_v33 = vld [vmem:[%s5903_s14 + $0xb0] ss:$12 sps:$4 sm:$0xff]   ;;  %v5190_v34 = vld [vmem:[%s5903_s14 + $0x98] ss:$12 sps:$4 sm:$0xff]  }
 0x19e   : > { %v5180_v28 = vld [vmem:[%s5903_s14 + $0x34] ss:$12 sps:$4 sm:$0xff]   ;;  %v5182_v37 = vld [vmem:[%s5903_s14 + $0x30] ss:$12 sps:$4 sm:$0xff]   ;;  %4794 = vmatprep.subr.bf16.mxu1 %v5189_v33  ;;  %v5185_v39 = vld [vmem:[%s5903_s14 + $0x18] ss:$12 sps:$4 sm:$0xff]  }
 0x19f   : > { %907 = vmatpush1.bf16.msra.mxu0 %v5170_v56  ;;  %4810 = vmatprep.mubr.bf16.mxu1 %v720_v31  ;;  %v5191_v38 = vld [vmem:[%s5903_s14 + $0x80] ss:$12 sps:$4 sm:$0xff]   ;;  %v5186_v40 = vld [vmem:[%s5903_s14 + $0x4] ss:$12 sps:$4 sm:$0xff]   ;;  %v5192_v41 = vld [vmem:[%s5903_s14 + $0x68] ss:$12 sps:$4 sm:$0xff]  }
 0x1a0   : > { %908 = vmatprep.subr.bf16.mxu0 %v5171_v21  ;;  %4795 = vmatpush3.bf16.msra.mxu1 %v5189_v33  ;;  %v5188_v42 = vld [vmem:[%s5903_s14] ss:$12 sps:$4 sm:$0xff]   ;;  %v5193_v45 = vld [vmem:[%s5903_s14 + $0x50] ss:$12 sps:$4 sm:$0xff]   ;;  %v5194_v46 = vld [vmem:[%s5903_s14 + $0x38] ss:$12 sps:$4 sm:$0xff]  }
 0x1a1   : > { %4796 = vmatprep.subr.bf16.mxu1 %v5190_v34  ;;  %v697_v47 = vld [vmem:[#allocation2 + $0x58] sm:$0xff]  ;;  %v5195_v48 = vld [vmem:[%s5903_s14 + $0x20] ss:$12 sps:$4 sm:$0xff]   ;;  %v5196_v53 = vld [vmem:[%s5903_s14 + $0x8] ss:$12 sps:$4 sm:$0xff]   ;;  %7787 = vst [vmem:[#allocation20_spill] sm:$0xff] %v6118_v8 }
 0x1a2   : > { %v698_v36 = vld [vmem:[#allocation2 + $0x18] sm:$0xff]  ;;  %v699_v43 = vld [vmem:[#allocation2 + $0x50] sm:$0xff]  ;;  %v700_v54 = vld [vmem:[#allocation2 + $0x68] sm:$0xff]  ;;  %v767_v9 = vsub.s32 1, %v6118_v8  ;;  %v763_v10 = vsub.s32 0, %v6118_v8  ;;  %vm1144_vm0 = vcmask 523264  }
 0x1a3   : > { %909 = vmatpush1.bf16.msra.mxu0 %v5173_v15  ;;  %v721_v49 = vpack.c.bf16 %v698_v36, %v697_v47  ;;  %v722_v55 = vpack.c.bf16 %v700_v54, %v699_v43  ;;  %v701_v57 = vld [vmem:[#allocation2 + $0x8] sm:$0xff]  ;;  %v703_v61 = vld [vmem:[#allocation2 + $0x40] sm:$0xff]  ;;  %v705_v51 = vld [vmem:[#allocation2 + $0x10] sm:$0xff]  ;;  %s5744_s11 = smov 64   ;;  %p4534_p11 = scmp.ne.s32.totalorder %s5723_s24, 1 }
 0x1a4   : > { %910 = vmatprep.subr.bf16.mxu0 %v5174_v24  ;;  %4797 = vmatpush3.bf16.msra.mxu1 %v5190_v34  ;;  %v702_v58 = vld [vmem:[#allocation2 + $0x48] sm:$0xff]  ;;  %v704_v62 = vld [vmem:[#allocation2 + $0x20] sm:$0xff]  ;;  %v706_v0 = vld [vmem:[#allocation2 + $0x38] sm:$0xff]  ;;  %s7650_s1 = sld [smem:[#allocation5 + %s5727_s25]] (!%p4534_p11) }
 0x1a5   : > { %4798 = vmatprep.subr.bf16.mxu1 %v5191_v38  ;;  %v723_v44 = vpack.c.bf16 %v702_v58, %v701_v57  ;;  %v724_v63 = vpack.c.bf16 %v704_v62, %v703_v61  ;;  %v707_v1 = vld [vmem:[#allocation2 + $0x60] sm:$0xff]  ;;  %v708_v2 = vld [vmem:[#allocation2 + $0x70] sm:$0xff]  ;;  %v725_v20 = vpack.c.bf16 %v706_v0, %v705_v51  ;;  %v709_v6 = vld [vmem:[#allocation2 + $0x78] sm:$0xff]  ;;  %v771_v62 = vsub.s32 2, %v6118_v8 }
 0x1a6   : > { %v726_v5 = vpack.c.bf16 %v708_v2, %v707_v1  ;;  %v710_v52 = vld [vmem:[#allocation2 + $0x28] sm:$0xff]  ;;  %v712_v13 = vld [vmem:[%s5923_s27] sm:$0x7] }
 0x1a7   : > { %911 = vmatpush1.bf16.msra.mxu0 %v5176_v26  ;;  %v727_v7 = vpack.c.bf16 %v710_v52, %v709_v6  ;;  %v6125_v16 = vrot.slane %v712_v13, %v767_v9  ;;  %v6129_v17 = vrot.slane %v712_v13, %v763_v10 }
 0x1a8   : > { %912 = vmatprep.subr.bf16.mxu0 %v5177_v30  ;;  %4799 = vmatpush3.bf16.msra.mxu1 %v5191_v38 }
 0x1a9   : > { %4800 = vmatprep.subr.bf16.mxu1 %v5192_v41 }
 0x1aa   : > { %p4106_p12 = scmp.lt.s32.totalorder (!%p4534_p11), %s7650_s1, 8 }
 0x1ab   : > { %913 = vmatpush1.bf16.msra.mxu0 %v5179_v32 }
 0x1ac   : > { %914 = vmatprep.subr.bf16.mxu0 %v5180_v28  ;;  %4801 = vmatpush3.bf16.msra.mxu1 %v5192_v41 }
 0x1ad   : > { %4802 = vmatprep.subr.bf16.mxu1 %v5193_v45 }
 0x1af   : > { %915 = vmatpush1.bf16.msra.mxu0 %v5182_v37 }
 0x1b0   : > { %916 = vmatprep.subr.bf16.mxu0 %v5183_v35  ;;  %4803 = vmatpush3.bf16.msra.mxu1 %v5193_v45 }
 0x1b1   : > { %4804 = vmatprep.subr.bf16.mxu1 %v5194_v46 }
 0x1b3   : > { %917 = vmatpush1.bf16.msra.mxu0 %v5185_v39 }
 0x1b4   : > { %918 = vmatprep.subr.bf16.mxu0 %v5186_v40  ;;  %4805 = vmatpush3.bf16.msra.mxu1 %v5194_v46 }
 0x1b5   : > { %4806 = vmatprep.subr.bf16.mxu1 %v5195_v48 }
 0x1b7   : > { %919 = vmatpush1.bf16.msra.mxu0 %v5188_v42 }
 0x1b8   : > { %4807 = vmatpush3.bf16.msra.mxu1 %v5195_v48 }
 0x1b9   : > { %4808 = vmatprep.subr.bf16.mxu1 %v5196_v53 }
 0x1ba   : > { %937 = vmatmul.mubr.bf16.vlgmr.msra.gmra.mxu0 %v720_v31 }
 0x1bb   : > { %946 = vmatprep.mubr.bf16.mxu0 %v5743_v23 }
 0x1bc   : > { %4809 = vmatpush3.bf16.msra.mxu1 %v5196_v53 }
 0x1bf   : > { %4811 = vmatmul.mubr.bf16.vlgmr.msra.gmra.mxu1 %v721_v49 }
 0x1c0   : > { %4814 = vmatprep.mubr.bf16.mxu1 %v722_v55 }
 0x1c2   : > { %947 = vmatmul.mubr.bf16.gmra.mxu0 %v721_v49 }
 0x1c3   : > { %956 = vmatprep.mubr.bf16.mxu0 %v5743_v23 }
 0x1c7   : > { %4815 = vmatmul.mubr.bf16.gmra.mxu1 %v723_v44 }
 0x1c8   : > { %4818 = vmatprep.mubr.bf16.mxu1 %v724_v63 }
 0x1ca   : > { %957 = vmatmul.mubr.bf16.gmra.mxu0 %v722_v55 }
 0x1cb   : > { %966 = vmatprep.mubr.bf16.mxu0 %v5743_v23 }
 0x1cf   : > { %4819 = vmatmul.mubr.bf16.gmra.mxu1 %v725_v20 }
 0x1d0   : > { %4822 = vmatprep.mubr.bf16.mxu1 %v726_v5 }
 0x1d2   : > { %967 = vmatmul.mubr.bf16.gmra.mxu0 %v723_v44 }
 0x1d3   : > { %976 = vmatprep.mubr.bf16.mxu0 %v5743_v23 }
 0x1d7   : > { %4823 = vmatmul.mubr.bf16.gmra.mxu1 %v727_v7 }
 0x1da   : > { %977 = vmatmul.mubr.bf16.gmra.mxu0 %v724_v63 }
 0x1db   : > { %986 = vmatprep.mubr.bf16.mxu0 %v5743_v23 }
 0x1e2   : > { %987 = vmatmul.mubr.bf16.gmra.mxu0 %v725_v20  ;;  %v6188_v20 = vrot.slane %v712_v13, %v771_v62 }
 0x1e3   : > { %996 = vmatprep.mubr.bf16.mxu0 %v5743_v23 }
 0x1ea   : > { %997 = vmatmul.mubr.bf16.gmra.mxu0 %v726_v5 }
 0x1eb   : > { %1006 = vmatprep.mubr.bf16.mxu0 %v5743_v23 }
 0x1f2   : > { %1007 = vmatmul.mubr.bf16.gmra.mxu0 %v727_v7 }
 0x27a   : > { %v938_v60 = vpop.f32.mrf.mxu0 }
 0x27b   : > { %v939_v19 = vadd.f32 %v938_v60, %v6129_v17 }
 0x27c   : > { %v940_v3 = vpop.f32.mrf.mxu0 }
 0x27d   : > { %v941_v18 = vadd.f32 %v940_v3, %v6125_v16 }
 0x27e   : > { %v942_v14 = vpop.f32.mrf.mxu0 }
 0x27f   : > { %v943_v27 = vadd.f32 %v942_v14, %v6129_v17  ;;  %v6149_v30 = vpop.f32.mrf.mxu1 }
 0x280   : > { %v944_v4 = vpop.f32.mrf.mxu0 }
 0x281   : > { %v6134_v22 = vpack.c.bf16 %v943_v27, %v939_v19  ;;  %v945_v11 = vadd.f32 %v944_v4, %v6125_v16  ;;  %v6154_v28 = vpop.f32.mrf.mxu1 }
 0x282   : > { %v948_v12 = vpop.f32.mrf.mxu0 }
 0x283   : > { %v6137_v50 = vpack.c.bf16 %v945_v11, %v941_v18  ;;  %v949_v56 = vadd.f32 %v948_v12, %v6129_v17  ;;  %4842 = vmatprep.mubr.msk.bf16.mxu0 %vm1144_vm0, %v6134_v22  ;;  %v6156_v34 = vpop.f32.mrf.mxu1 }
 0x284   : > { %v6142_v21 = vpop.f32.mrf.mxu0 }
 0x285   : > { %v6161_v38 = vpop.f32.mrf.mxu1 }
 0x286   : > { %v952_v15 = vpop.f32.mrf.mxu0 }
 0x287   : > { %v953_v24 = vadd.f32 %v952_v15, %v6129_v17  ;;  %v4816_v41 = vpop.f32.mrf.mxu1 }
 0x288   : > { %v6145_v25 = vpop.f32.mrf.mxu0 }
 0x289   : > { %v6147_v26 = vpack.c.bf16 %v953_v24, %v949_v56  ;;  %v6168_v46 = vpop.f32.mrf.mxu1 }
 0x28a   : > { %v958_v29 = vpop.f32.mrf.mxu0 }
 0x28b   : > { %v959_v31 = vadd.f32 %v958_v29, %v6129_v17  ;;  %v4817_v36 = vpop.f32.mrf.mxu1 }
 0x28c   : > { %v6152_v32 = vpop.f32.mrf.mxu0 }
 0x28d   : > { %v6173_v53 = vpop.f32.mrf.mxu1 }
 0x28e   : > { %v962_v33 = vpop.f32.mrf.mxu0 }
 0x28f   : > { %v963_v37 = vadd.f32 %v962_v33, %v6129_v17  ;;  %v4820_v55 = vpop.f32.mrf.mxu1 }
 0x290   : > { %v6159_v35 = vpop.f32.mrf.mxu0  ;;  %v1092_v12 = vadd.f32 %v4820_v55, %v6188_v20 }
 0x291   : > { %v6163_v39 = vpack.c.bf16 %v963_v37, %v959_v31  ;;  %v1083_v61 = vpop.f32.mrf.mxu1 }
 0x292   : > { %v968_v40 = vpop.f32.mrf.mxu0 }
 0x293   : > { %v969_v42 = vadd.f32 %v968_v40, %v6129_v17  ;;  %v4821_v63 = vpop.f32.mrf.mxu1 }
 0x294   : > { %v6166_v45 = vpop.f32.mrf.mxu0  ;;  %v1095_v56 = vadd.f32 %v4821_v63, %v6188_v20 }
 0x295   : > { %v1086_v1 = vpop.f32.mrf.mxu1 }
 0x296   : > { %v972_v47 = vpop.f32.mrf.mxu0  ;;  %v6214_v55 = vpack.c.bf16 %v1095_v56, %v1092_v12 }
 0x297   : > { %v973_v48 = vadd.f32 %v972_v47, %v6129_v17  ;;  %v4824_v6 = vpop.f32.mrf.mxu1 }
 0x298   : > { %v6171_v49 = vpop.f32.mrf.mxu0  ;;  %v1108_v3 = vadd.f32 %v4824_v6, %v6188_v20  ;;  %v1079_v6 = vadd.f32 %v4817_v36, %v6188_v20 }
 0x299   : > { %v6175_v43 = vpack.c.bf16 %v973_v48, %v969_v42  ;;  %v1099_v60 = vpop.f32.mrf.mxu1 }
 0x29a   : > { %v978_v54 = vpop.f32.mrf.mxu0  ;;  %v1100_v27 = vadd.f32 %v1099_v60, %v6188_v20 }
 0x29b   : > { %v979_v57 = vadd.f32 %v978_v54, %v6129_v17  ;;  %v4825_v14 = vpop.f32.mrf.mxu1  ;;  %v1084_v54 = vadd.f32 %v1083_v61, %v6188_v20 }
 0x29c   : > { %v6178_v58 = vpop.f32.mrf.mxu0  ;;  %v1111_v4 = vadd.f32 %v4825_v14, %v6188_v20 }
 0x29d   : > { %v1102_v15 = vpop.f32.mrf.mxu1 }
 0x29e   : > { %v982_v44 = vpop.f32.mrf.mxu0  ;;  %v6201_v31 = vpack.c.bf16 %v1111_v4, %v1108_v3  ;;  %v1103_v33 = vadd.f32 %v1102_v15, %v6188_v20 }
 0x29f   : > { %v983_v51 = vadd.f32 %v982_v44, %v6129_v17 }
 0x2a0   : > { %v6182_v0 = vpop.f32.mrf.mxu0  ;;  %v6207_v47 = vpack.c.bf16 %v1103_v33, %v1100_v27  ;;  %4858 = vmatprep.subr.bf16.mxu1 %v6201_v31  ;;  %v1071_v27 = vadd.f32 %v6173_v53, %v6188_v20 }
 0x2a1   : > { %v6184_v2 = vpack.c.bf16 %v983_v51, %v979_v57  ;;  %4859 = vmatpush3.bf16.msra.mxu1 %v6201_v31  ;;  %v1087_v57 = vadd.f32 %v1086_v1, %v6188_v20 }
 0x2a2   : > { %v988_v5 = vpop.f32.mrf.mxu0  ;;  %4860 = vmatprep.subr.bf16.mxu1 %v6207_v47 }
 0x2a3   : > { %v989_v52 = vadd.f32 %v988_v5, %v6129_v17  ;;  %v1076_v5 = vadd.f32 %v4816_v41, %v6188_v20  ;;  %v6226_v60 = vpack.c.bf16 %v1087_v57, %v1084_v54  ;;  %v975_v54 = vadd.f32 %v6171_v49, %v6125_v16 }
 0x2a4   : > { %v990_v7 = vpop.f32.mrf.mxu0  ;;  %v971_v57 = vadd.f32 %v6166_v45, %v6125_v16  ;;  %v955_v49 = vadd.f32 %v6145_v25, %v6125_v16 }
 0x2a5   : > { %v991_v11 = vadd.f32 %v990_v7, %v6125_v16  ;;  %4861 = vmatpush3.bf16.msra.mxu1 %v6207_v47  ;;  %v6232_v41 = vpack.c.bf16 %v1079_v6, %v1076_v5  ;;  %v6345_v6 = vld [vmem:[%s7788_s18] ss:$0 sm:$0xff] }
 0x2a6   : > { %v992_v18 = vpop.f32.mrf.mxu0  ;;  %4862 = vmatprep.subr.bf16.mxu1 %v6214_v55 }
 0x2a7   : > { %v993_v19 = vadd.f32 %v992_v18, %v6129_v17 }
 0x2a8   : > { %v994_v13 = vpop.f32.mrf.mxu0 }
 0x2a9   : > { %v6198_v24 = vpack.c.bf16 %v993_v19, %v989_v52  ;;  %v995_v29 = vadd.f32 %v994_v13, %v6125_v16  ;;  %4863 = vmatpush3.bf16.msra.mxu1 %v6214_v55  ;;  %v1068_v19 = vadd.f32 %v6168_v46, %v6188_v20  ;;  %v1060_v13 = vadd.f32 %v6149_v30, %v6188_v20 }
 0x2aa   : > { %v998_v37 = vpop.f32.mrf.mxu0  ;;  %4864 = vmatprep.subr.bf16.mxu1 %v6226_v60  ;;  %v1063_v46 = vadd.f32 %v6156_v34, %v6188_v20  ;;  %v1055_v34 = vadd.f32 %v6161_v38, %v6188_v20  ;;  %v985_v38 = vadd.f32 %v6182_v0, %v6125_v16  ;;  %v965_v0 = vadd.f32 %v6159_v35, %v6125_v16 }
 0x2ab   : > { %v6204_v40 = vpack.c.bf16 %v995_v29, %v991_v11  ;;  %v999_v42 = vadd.f32 %v998_v37, %v6129_v17  ;;  %v6250_v53 = vpack.c.bf16 %v1071_v27, %v1068_v19  ;;  %v1052_v29 = vadd.f32 %v6154_v28, %v6188_v20 }
 0x2ac   : > { %v1000_v48 = vpop.f32.mrf.mxu0  ;;  %v6258_v33 = vpack.c.bf16 %v1063_v46, %v1060_v13  ;;  %v981_v20 = vadd.f32 %v6178_v58, %v6125_v16 }
 0x2ad   : > { %1597 = vrot.lane.b32.xlu0 %v6204_v40, %s5744_s11  ;;  %v1001_v52 = vadd.f32 %v1000_v48, %v6125_v16  ;;  %4865 = vmatpush3.bf16.msra.mxu1 %v6226_v60  ;;  %v6265_v37 = vpack.c.bf16 %v1055_v34, %v1052_v29  ;;  %v1185_v48 = vsel %vm1144_vm0, %v6204_v40, 0 }
 0x2ae   : > { %v1002_v44 = vpop.f32.mrf.mxu0  ;;  %4866 = vmatprep.subr.bf16.mxu1 %v6232_v41 }
 0x2af   : > { %v1003_v63 = vadd.f32 %v1002_v44, %v6129_v17  ;;  %v6288_v44 = vpack.c.bf16 %v975_v54, %v971_v57 }
 0x2b0   : > { %v1004_v51 = vpop.f32.mrf.mxu0 }
 0x2b1   : > { %v6223_v7 = vpack.c.bf16 %v1003_v63, %v999_v42  ;;  %v1005_v61 = vadd.f32 %v1004_v51, %v6125_v16  ;;  %4867 = vmatpush3.bf16.msra.mxu1 %v6232_v41  ;;  %v6278_v42 = vpack.c.bf16 %v985_v38, %v981_v20  ;;  %v1179_v45 = vsel %vm1144_vm0, %v6288_v44, 0 }
 0x2b2   : > { %v1008_v1 = vpop.f32.mrf.mxu0  ;;  %4868 = vmatprep.subr.bf16.mxu1 %v6250_v53  ;;  %v951_v51 = vadd.f32 %v6142_v21, %v6125_v16 }
 0x2b3   : > { %v1133_v3 = vpack.c.bf16 %v1005_v61, %v1001_v52  ;;  %v1009_v18 = vadd.f32 %v1008_v1, %v6129_v17  ;;  %v1182_v58 = vsel %vm1144_vm0, %v6278_v42, 0 }
 0x2b4   : > { %v1010_v14 = vpop.f32.mrf.mxu0  ;;  %v6308_v5 = vpack.c.bf16 %v955_v49, %v951_v51 }
 0x2b5   : > { %1599 = vrot.lane.b32.xlu1 %v1133_v3, %s5744_s11  ;;  %v1011_v12 = vadd.f32 %v1010_v14, %v6125_v16  ;;  %4869 = vmatpush3.bf16.msra.mxu1 %v6250_v53  ;;  %v1188_v28 = vsel %vm1144_vm0, %v1133_v3, 0 }
 0x2b6   : > { %v1012_v36 = vpop.f32.mrf.mxu0  ;;  %4870 = vmatprep.subr.bf16.mxu1 %v6258_v33  ;;  %v1173_v35 = vsel %vm1144_vm0, %v6308_v5, 0 }
 0x2b7   : > { %v1013_v4 = vadd.f32 %v1012_v36, %v6129_v17 }
 0x2b8   : > { %v1014_v11 = vpop.f32.mrf.mxu0 }
 0x2b9   : > { %v6244_v56 = vpack.c.bf16 %v1013_v4, %v1009_v18  ;;  %v1015_v15 = vadd.f32 %v1014_v11, %v6125_v16  ;;  %4871 = vmatpush3.bf16.msra.mxu1 %v6258_v33 }
 0x2ba   : > { %4872 = vmatprep.subr.bf16.mxu1 %v6265_v37 }
 0x2bb   : > { %v1136_v17 = vpack.c.bf16 %v1015_v15, %v1011_v12 }
 0x2bd   : > { %5037 = vmatprep.subr.msk.bf16.mxu0 %vm1144_vm0, %v1136_v17  ;;  %1601 = vrot.lane.b32.xlu0 %v1136_v17, %s5744_s11  ;;  %v1191_v30 = vsel %vm1144_vm0, %v1136_v17, 0 }
 0x2be   : > { %4827 = vmatpush3.bf16.xpose.msra.mxu0 %v1191_v30  ;;  %4873 = vmatpush3.bf16.msra.mxu1 %v6265_v37 }
 0x2bf   : > { %5038 = vmatprep.subr.msk.bf16.mxu0 %vm1144_vm0, %v1133_v3 }
 0x2c6   : > { %4829 = vmatpush3.bf16.xpose.msra.mxu0 %v1188_v28 }
 0x2c7   : > { %5039 = vmatprep.subr.msk.bf16.mxu0 %vm1144_vm0, %v6204_v40  ;;  %v961_v40 = vadd.f32 %v6152_v32, %v6125_v16  ;;  %v1170_v16 = vsel %vm1144_vm0, %v6137_v50, 0 }
 0x2c9   : > { %v6298_v63 = vpack.c.bf16 %v965_v0, %v961_v40 }
 0x2cb   : > { %v1176_v32 = vsel %vm1144_vm0, %v6298_v63, 0 }
 0x2ce   : > { %4831 = vmatpush3.bf16.xpose.msra.mxu0 %v1185_v48 }
 0x2cf   : > { %5040 = vmatprep.subr.msk.bf16.mxu0 %vm1144_vm0, %v6278_v42 }
 0x2d6   : > { %4833 = vmatpush3.bf16.xpose.msra.mxu0 %v1182_v58 }
 0x2d7   : > { %5041 = vmatprep.subr.msk.bf16.mxu0 %vm1144_vm0, %v6288_v44 }
 0x2de   : > { %4835 = vmatpush3.bf16.xpose.msra.mxu0 %v1179_v45 }
 0x2df   : > { %5042 = vmatprep.subr.msk.bf16.mxu0 %vm1144_vm0, %v6298_v63 }
 0x2e6   : > { %4837 = vmatpush3.bf16.xpose.msra.mxu0 %v1176_v32 }
 0x2e7   : > { %5043 = vmatprep.subr.msk.bf16.mxu0 %vm1144_vm0, %v6308_v5 }
 0x2ee   : > { %4839 = vmatpush3.bf16.xpose.msra.mxu0 %v1173_v35 }
 0x2ef   : > { %5044 = vmatprep.subr.msk.bf16.mxu0 %vm1144_vm0, %v6137_v50 }
 0x2f6   : > { %4841 = vmatpush3.bf16.xpose.msra.mxu0 %v1170_v16 }
 0x2fd   : > { %4843 = vmatmul.mubr.msk.bf16.vlgmr.msra.gmra.mxu0 %vm1144_vm0, %v6147_v26 }
 0x2fe   : > { %4846 = vmatprep.mubr.msk.bf16.mxu0 %vm1144_vm0, %v6163_v39 }
 0x305   : > { %4847 = vmatmul.mubr.msk.bf16.gmra.mxu0 %vm1144_vm0, %v6175_v43 }
 0x306   : > { %4850 = vmatprep.mubr.msk.bf16.mxu0 %vm1144_vm0, %v6184_v2 }
 0x30d   : > { %4851 = vmatmul.mubr.msk.bf16.gmra.mxu0 %vm1144_vm0, %v6198_v24 }
 0x30e   : > { %4854 = vmatprep.mubr.msk.bf16.mxu0 %vm1144_vm0, %v6223_v7 }
 0x315   : > { %4855 = vmatmul.mubr.msk.bf16.gmra.mxu0 %vm1144_vm0, %v6244_v56 }
 0x31f   : > { %v6334_v21 = vpop.permute.xlu0 %1597 }
 0x32f   : > { %v6336_v25 = vpop.permute.xlu0 %1601 }
 0x330   : > { %5045 = vmatprep.subr.msk.bf16.mxu1 %vm1144_vm0, %v6336_v25 }
 0x3bd   : > { %v4844_v52 = vpop.f32.mrf.mxu0 }
 0x3be   : > { %v6348_v61 = vadd.f32 %v4844_v52, %v6345_v6 }
 0x3bf   : > { %v1227_v1 = vpop.f32.mrf.mxu0 }
 0x3c0   : > { %v6351_v3 = vadd.f32 %v6345_v6, %v1227_v1  ;;  %1294 = vmax.xlane.f32.xlu1 %v6348_v61 }
 0x3c1   : > { %v4845_v18 = vpop.f32.mrf.mxu0 }
 0x3c2   : > { %v6355_v14 = vadd.f32 %v4845_v18, %v6345_v6  ;;  %1290 = vmax.xlane.f32.xlu0 %v6351_v3 }
 0x3c3   : > { %v1230_v36 = vpop.f32.mrf.mxu0 }
 0x3c4   : > { %v6359_v19 = vadd.f32 %v6345_v6, %v1230_v36  ;;  %1296 = vmax.xlane.f32.xlu1 %v6355_v14 }
 0x3c5   : > { %v4848_v27 = vpop.f32.mrf.mxu0 }
 0x3c6   : > { %v6363_v4 = vadd.f32 %v4848_v27, %v6345_v6  ;;  %1292 = vmax.xlane.f32.xlu0 %v6359_v19 }
 0x3c7   : > { %v1243_v11 = vpop.f32.mrf.mxu0 }
 0x3c8   : > { %1302 = vmax.xlane.f32.xlu1 %v6363_v4  ;;  %v6368_v12 = vadd.f32 %v6345_v6, %v1243_v11 }
 0x3c9   : > { %v4849_v13 = vpop.f32.mrf.mxu0 }
 0x3ca   : > { %v6372_v17 = vadd.f32 %v4849_v13, %v6345_v6 }
 0x3cb   : > { %v1246_v15 = vpop.f32.mrf.mxu0 }
 0x3cc   : > { %1298 = vmax.xlane.f32.xlu1 %v6368_v12  ;;  %v6376_v34 = vadd.f32 %v6345_v6, %v1246_v15  ;;  %v1649_v15 = vsel %vm1144_vm0, %v6336_v25, 0 }
 0x3cd   : > { %v4852_v46 = vpop.f32.mrf.mxu0 }
 0x3ce   : > { %v6402_v49 = vadd.f32 %v4852_v46, %v6345_v6 }
 0x3cf   : > { %v1259_v30 = vpop.f32.mrf.mxu0 }
 0x3d0   : > { %1304 = vmax.xlane.f32.xlu1 %v6372_v17 }
 0x3d1   : > { %v4853_v29 = vpop.f32.mrf.mxu0 }
 0x3d2   : > { %v6414_v51 = vadd.f32 %v4853_v29, %v6345_v6 }
 0x3d3   : > { %v1262_v28 = vpop.f32.mrf.mxu0 }
 0x3d4   : > { %1300 = vmax.xlane.f32.xlu1 %v6376_v34  ;;  %v6380_v38 = vadd.f32 %v6345_v6, %v1262_v28 }
 0x3d5   : > { %v4856_v20 = vpop.f32.mrf.mxu0 }
 0x3d6   : > { %v6384_v48 = vadd.f32 %v4856_v20, %v6345_v6 }
 0x3d7   : > { %v1275_v54 = vpop.f32.mrf.mxu0 }
 0x3d8   : > { %1308 = vmax.xlane.f32.xlu1 %v6380_v38  ;;  %v6390_v57 = vadd.f32 %v6345_v6, %v1275_v54 }
 0x3d9   : > { %v4857_v58 = vpop.f32.mrf.mxu0 }
 0x3da   : > { %v6394_v0 = vadd.f32 %v4857_v58, %v6345_v6 }
 0x3db   : > { %v1278_v40 = vpop.f32.mrf.mxu0 }
 0x3dc   : > { %1318 = vmax.xlane.f32.xlu1 %v6384_v48  ;;  %1595 = vrot.lane.b32.xlu0 %v6278_v42, %s5744_s11  ;;  %v6398_v45 = vadd.f32 %v6345_v6, %v1278_v40  ;;  %v6408_v42 = vadd.f32 %v6345_v6, %v1259_v30  ;;  %v1643_v40 = vsel %vm1144_vm0, %v6334_v21, 0 }
 0x3e0   : > { %1314 = vmax.xlane.f32.xlu1 %v6390_v57 }
 0x3e4   : > { %1320 = vmax.xlane.f32.xlu1 %v6394_v0 }
 0x3e8   : > { %1316 = vmax.xlane.f32.xlu1 %v6398_v45 }
 0x3f9   : > { %1593 = vrot.lane.b32.xlu1 %v6288_v44, %s5744_s11 }
 0x3fb   : > { %1310 = vmax.xlane.f32.xlu0 %v6402_v49 }
 0x3fd   : > { %1565 = vrot.lane.b32.xlu1 %v6147_v26, %s5744_s11  ;;  %v1600_v26 = vpop.permute.xlu1 %1599 }
 0x3fe   : > { %v1646_v29 = vsel %vm1144_vm0, %v1600_v26, 0 }
 0x3ff   : > { %1306 = vmax.xlane.f32.xlu0 %v6408_v42 }
 0x401   : > { %1569 = vrot.lane.b32.xlu1 %v6175_v43, %s5744_s11 }
 0x403   : > { %1312 = vmax.xlane.f32.xlu0 %v6414_v51 }
 0x405   : > { %1573 = vrot.lane.b32.xlu1 %v6198_v24, %s5744_s11 }
 0x409   : > { %1577 = vrot.lane.b32.xlu1 %v6244_v56, %s5744_s11 }
 0x40d   : > { %1888 = vrot.lane.b32.xlu1 %v6207_v47, %s5744_s11 }
 0x411   : > { %1886 = vrot.lane.b32.xlu1 %v6214_v55, %s5744_s11 }
 0x415   : > { %1884 = vrot.lane.b32.xlu1 %v6226_v60, %s5744_s11 }
 0x419   : > { %1591 = vrot.lane.b32.xlu0 %v6298_v63, %s5744_s11 }
 0x41d   : > { %1589 = vrot.lane.b32.xlu0 %v6308_v5, %s5744_s11 }
 0x421   : > { %1587 = vrot.lane.b32.xlu0 %v6137_v50, %s5744_s11 }
 0x425   : > { %1563 = vrot.lane.b32.xlu0 %v6134_v22, %s5744_s11 }
 0x429   : > { %1567 = vrot.lane.b32.xlu0 %v6163_v39, %s5744_s11 }
 0x42d   : > { %1571 = vrot.lane.b32.xlu0 %v6184_v2, %s5744_s11 }
 0x431   : > { %1575 = vrot.lane.b32.xlu0 %v6223_v7, %s5744_s11 }
 0x435   : > { %1890 = vrot.lane.b32.xlu0 %v6201_v31, %s5744_s11 }
 0x449   : > { %v1295_v43 = vpop.xlane.xlu1 %1294 }
 0x44a   : > { %v1324_v47 = vsub.f32 %v6348_v61, %v1295_v43 }
 0x44b   : > { %v1291_v24 = vpop.xlane.xlu0 %1290 }
 0x44c   : > { %v1322_v50 = vsub.f32 %v6351_v3, %v1291_v24  ;;  %v1342_v44 = vmul.f32 1.442695, %v1324_v47 }
 0x44d   : > { %v1297_v22 = vpop.xlane.xlu1 %1296 }
 0x44e   : > { %v1338_v55 = vmul.f32 1.442695, %v1322_v50  ;;  %v1325_v39 = vsub.f32 %v6355_v14, %v1297_v22 }
 0x44f   : > { %v1293_v60 = vpop.xlane.xlu0 %1292 }
 0x450   : > { %v1344_v56 = vmul.f32 1.442695, %v1325_v39  ;;  %v1323_v2 = vsub.f32 %v6359_v19, %v1293_v60  ;;  %5285 = vpow2.f32 %v1338_v55 }
 0x451   : > { %v1303_v7 = vpop.xlane.xlu1 %1302 }
 0x452   : > { %v1340_v63 = vmul.f32 1.442695, %v1323_v2  ;;  %5287 = vpow2.f32 %v1344_v56  ;;  %v1328_v16 = vsub.f32 %v6363_v4, %v1303_v7 }
 0x454   : > { %5289 = vpow2.f32 %v1340_v63  ;;  %v1350_v14 = vmul.f32 1.442695, %v1328_v16 }
 0x455   : > { %5291 = vpow2.f32 %v1342_v44  ;;  %v1299_v31 = vpop.xlane.xlu1 %1298 }
 0x456   : > { %v1326_v5 = vsub.f32 %v6368_v12, %v1299_v31 }
 0x458   : > { %v1346_v52 = vmul.f32 1.442695, %v1326_v5 }
 0x459   : > { %v1305_v32 = vpop.xlane.xlu1 %1304 }
 0x45a   : > { %v1329_v35 = vsub.f32 %v6372_v17, %v1305_v32  ;;  %5293 = vpow2.f32 %v1346_v52 }
 0x45c   : > { %v1352_v61 = vmul.f32 1.442695, %v1329_v35 }
 0x45d   : > { %v1301_v1 = vpop.xlane.xlu1 %1300  ;;  %v6453_v18 = vpop.eup %5285 }
 0x45e   : > { %v1327_v3 = vsub.f32 %v6376_v34, %v1301_v1  ;;  %5295 = vpow2.f32 %v1352_v61 }
 0x45f   : > { %v6455_v36 = vpop.eup %5287 }
 0x460   : > { %v1348_v19 = vmul.f32 1.442695, %v1327_v3 }
 0x461   : > { %v6457_v27 = vpop.eup %5289  ;;  %v1309_v11 = vpop.xlane.xlu1 %1308 }
 0x462   : > { %v6459_v13 = vpop.eup %5291  ;;  %5297 = vpow2.f32 %v1348_v19  ;;  %v1402_v4 = vpack.c.bf16 %v6457_v27, %v6453_v18  ;;  %v1331_v47 = vsub.f32 %v6380_v38, %v1309_v11 }
 0x463   : > { %5299 = vpow2.f32 %v1350_v14  ;;  %v1403_v12 = vpack.c.bf16 %v6455_v36, %v6459_v13 }
 0x464   : > { %4874 = vmatprep.mubr.bf16.mxu1 %v1402_v4 }
 0x465   : > { %4875 = vmatmul.mubr.bf16.vlgmr.msra.gmra.mxu1 %v1403_v12  ;;  %v1319_v46 = vpop.xlane.xlu1 %1318 }
 0x466   : > { %4891 = vmatpush3.bf16.xpose.msra.mxu1 %v1649_v15  ;;  %v1336_v16 = vsub.f32 %v6384_v48, %v1319_v46 }
 0x467   : > { %5046 = vmatprep.subr.msk.bf16.mxu1 %vm1144_vm0, %v1600_v26  ;;  %v6468_v30 = vpop.eup %5293  ;;  %v1596_v26 = vpop.permute.xlu0 %1595 }
 0x468   : > { %v1640_v24 = vsel %vm1144_vm0, %v1596_v26, 0 }
 0x469   : > { %v1315_v17 = vpop.xlane.xlu1 %1314 }
 0x46a   : > { %v1334_v44 = vsub.f32 %v6390_v57, %v1315_v17 }
 0x46b   : > { %v6471_v34 = vpop.eup %5295 }
 0x46c   : > { %v1362_v32 = vmul.f32 1.442695, %v1334_v44 }
 0x46d   : > { %v1321_v58 = vpop.xlane.xlu1 %1320 }
 0x46e   : > { %4893 = vmatpush3.bf16.xpose.msra.mxu1 %v1646_v29  ;;  %v1337_v35 = vsub.f32 %v6394_v0, %v1321_v58 }
 0x46f   : > { %v6473_v28 = vpop.eup %5297  ;;  %5047 = vmatprep.subr.msk.bf16.mxu1 %vm1144_vm0, %v6334_v21  ;;  %v1356_v21 = vmul.f32 1.442695, %v1331_v47 }
 0x470   : > { %v6477_v20 = vpop.eup %5299  ;;  %v1404_v25 = vpack.c.bf16 %v6473_v28, %v6468_v30  ;;  %v1368_v52 = vmul.f32 1.442695, %v1337_v35 }
 0x471   : > { %v1405_v54 = vpack.c.bf16 %v6471_v34, %v6477_v20  ;;  %v1317_v43 = vpop.xlane.xlu1 %1316  ;;  %5301 = vpow2.f32 %v1356_v21 }
 0x472   : > { %4878 = vmatprep.mubr.bf16.mxu1 %v1404_v25  ;;  %v1335_v39 = vsub.f32 %v6398_v45, %v1317_v43 }
 0x473   : > { %4879 = vmatmul.mubr.bf16.gmra.mxu1 %v1405_v54 }
 0x474   : > { %v1364_v7 = vmul.f32 1.442695, %v1335_v39 }
 0x475   : > { %v1594_v50 = vpop.permute.xlu1 %1593 }
 0x476   : > { %4895 = vmatpush3.bf16.xpose.msra.mxu1 %v1643_v40  ;;  %v1637_v55 = vsel %vm1144_vm0, %v1594_v50, 0 }
 0x477   : > { %5048 = vmatprep.subr.msk.bf16.mxu1 %vm1144_vm0, %v1596_v26 }
 0x47e   : > { %4897 = vmatpush3.bf16.xpose.msra.mxu1 %v1640_v24  ;;  %v6500_v3 = vpop.eup %5301 }
 0x47f   : > { %5049 = vmatprep.subr.msk.bf16.mxu1 %vm1144_vm0, %v1594_v50 }
 0x484   : > { %v1311_v22 = vpop.xlane.xlu0 %1310 }
 0x485   : > { %v1332_v60 = vsub.f32 %v6402_v49, %v1311_v22 }
 0x486   : > { %4899 = vmatpush3.bf16.xpose.msra.mxu1 %v1637_v55 }
 0x487   : > { %v1358_v31 = vmul.f32 1.442695, %v1332_v60 }
 0x488   : > { %v1307_v56 = vpop.xlane.xlu0 %1306 }
 0x489   : > { %v1330_v2 = vsub.f32 %v6408_v42, %v1307_v56  ;;  %v1566_v42 = vpop.permute.xlu1 %1565 }
 0x48b   : > { %v1354_v63 = vmul.f32 1.442695, %v1330_v2 }
 0x48c   : > { %v1313_v5 = vpop.xlane.xlu0 %1312 }
 0x48d   : > { %5303 = vpow2.f32 %v1354_v63  ;;  %v1333_v38 = vsub.f32 %v6414_v51, %v1313_v5  ;;  %v1366_v51 = vmul.f32 1.442695, %v1336_v16  ;;  %v1570_v0 = vpop.permute.xlu1 %1569 }
 0x48e   : > { %5305 = vpow2.f32 %v1364_v7 }
 0x48f   : > { %v1360_v45 = vmul.f32 1.442695, %v1333_v38  ;;  %5307 = vpow2.f32 %v1358_v31 }
 0x490   : > { %v1592_v49 = vpop.permute.xlu0 %1591 }
 0x491   : > { %5309 = vpow2.f32 %v1360_v45  ;;  %5050 = vmatprep.subr.msk.bf16.mxu1 %vm1144_vm0, %v1592_v49  ;;  %v1634_v57 = vsel %vm1144_vm0, %v1592_v49, 0  ;;  %v1574_v46 = vpop.permute.xlu1 %1573 }
 0x492   : > { %5311 = vpow2.f32 %v1362_v32  ;;  %4901 = vmatpush3.bf16.xpose.msra.mxu1 %v1634_v57 }
 0x493   : > { %5313 = vpow2.f32 %v1368_v52 }
 0x494   : > { %v1590_v61 = vpop.permute.xlu0 %1589  ;;  %5315 = vpow2.f32 %v1366_v51 }
 0x495   : > { %5051 = vmatprep.subr.msk.bf16.mxu1 %vm1144_vm0, %v1590_v61  ;;  %v1631_v48 = vsel %vm1144_vm0, %v1590_v61, 0  ;;  %v1578_v26 = vpop.permute.xlu1 %1577 }
 0x498   : > { %v1588_v1 = vpop.permute.xlu0 %1587 }
 0x499   : > { %v1628_v58 = vsel %vm1144_vm0, %v1588_v1, 0  ;;  %v1889_v22 = vpop.permute.xlu1 %1888 }
 0x49a   : > { %v6503_v14 = vpop.eup %5303  ;;  %4903 = vmatpush3.bf16.xpose.msra.mxu1 %v1631_v48 }
 0x49b   : > { %5052 = vmatprep.subr.msk.bf16.mxu1 %vm1144_vm0, %v1588_v1  ;;  %v1406_v19 = vpack.c.bf16 %v6500_v3, %v6503_v14  ;;  %v6508_v11 = vpop.eup %5305 }
 0x49c   : > { %v1564_v4 = vpop.permute.xlu0 %1563  ;;  %v6510_v12 = vpop.eup %5307 }
 0x49d   : > { %4882 = vmatprep.mubr.bf16.mxu1 %v1406_v19  ;;  %v1887_v39 = vpop.permute.xlu1 %1886 }
 0x49e   : > { %v6512_v15 = vpop.eup %5309 }
 0x49f   : > { %v6514_v17 = vpop.eup %5311  ;;  %v1407_v29 = vpack.c.bf16 %v6512_v15, %v6510_v12 }
 0x4a0   : > { %v1568_v25 = vpop.permute.xlu0 %1567  ;;  %v1408_v54 = vpack.c.bf16 %v6508_v11, %v6514_v17  ;;  %v6521_v40 = vpop.eup %5313 }
 0x4a1   : > { %4883 = vmatmul.mubr.bf16.gmra.mxu1 %v1407_v29  ;;  %v6523_v24 = vpop.eup %5315  ;;  %v1885_v21 = vpop.permute.xlu1 %1884 }
 0x4a2   : > { %4886 = vmatprep.mubr.bf16.mxu1 %v1408_v54  ;;  %4905 = vmatpush3.bf16.xpose.msra.mxu1 %v1628_v58  ;;  %v1409_v50 = vpack.c.bf16 %v6521_v40, %v6523_v24 }
 0x4a4   : > { %v1572_v43 = vpop.permute.xlu0 %1571 }
 0x4a8   : > { %v1576_v47 = vpop.permute.xlu0 %1575 }
 0x4a9   : > { %4887 = vmatmul.mubr.bf16.gmra.mxu1 %v1409_v50 }
 0x4aa   : > { %4906 = vmatprep.mubr.msk.bf16.mxu1 %vm1144_vm0, %v1564_v4 }
 0x4ac   : > { %v1891_v55 = vpop.permute.xlu0 %1890 }
 0x4ad   : > { %4922 = vmatprep.subr.bf16.mxu0 %v1891_v55 }
 0x4ae   : > { %4923 = vmatpush3.bf16.msra.mxu0 %v1891_v55 }
 0x4af   : > { %4924 = vmatprep.subr.bf16.mxu0 %v1889_v22 }
 0x4b1   : > { %4907 = vmatmul.mubr.msk.bf16.vlgmr.msra.gmra.mxu1 %vm1144_vm0, %v1566_v42 }
 0x4b2   : > { %4910 = vmatprep.mubr.msk.bf16.mxu1 %vm1144_vm0, %v1568_v25  ;;  %4925 = vmatpush3.bf16.msra.mxu0 %v1889_v22 }
 0x4b3   : > { %4926 = vmatprep.subr.bf16.mxu0 %v1887_v39 }
 0x4b6   : > { %4927 = vmatpush3.bf16.msra.mxu0 %v1887_v39 }
 0x4b7   : > { %4928 = vmatprep.subr.bf16.mxu0 %v1885_v21 }
 0x4b9   : > { %4911 = vmatmul.mubr.msk.bf16.gmra.mxu1 %vm1144_vm0, %v1570_v0 }
 0x4ba   : > { %4914 = vmatprep.mubr.msk.bf16.mxu1 %vm1144_vm0, %v1572_v43  ;;  %4929 = vmatpush3.bf16.msra.mxu0 %v1885_v21 }
 0x4c1   : > { %4915 = vmatmul.mubr.msk.bf16.gmra.mxu1 %vm1144_vm0, %v1574_v46 }
 0x4c2   : > { %4918 = vmatprep.mubr.msk.bf16.mxu1 %vm1144_vm0, %v1576_v47 }
 0x4c9   : > { %4919 = vmatmul.mubr.msk.bf16.gmra.mxu1 %vm1144_vm0, %v1578_v26 }
 0x525   : > { %v6535_v60 = vpop.f32.mrf.mxu1 }
 0x527   : > { %v6537_v56 = vpop.f32.mrf.mxu1 }
 0x529   : > { %v6539_v2 = vpop.f32.mrf.mxu1 }
 0x52b   : > { %v6541_v44 = vpop.f32.mrf.mxu1 }
 0x533   : > { %v6543_v7 = vpop.f32.mrf.mxu1 }
 0x535   : > { %v6545_v63 = vpop.f32.mrf.mxu1 }
 0x537   : > { %v6547_v31 = vpop.f32.mrf.mxu1 }
 0x539   : > { %v6549_v5 = vpop.f32.mrf.mxu1 }
 0x561   : > { %v6551_v38 = vpop.f32.mrf.mxu1 }
 0x563   : > { %v6553_v32 = vpop.f32.mrf.mxu1 }
 0x565   : > { %v6555_v35 = vpop.f32.mrf.mxu1 }
 0x567   : > { %v6557_v45 = vpop.f32.mrf.mxu1 }
 0x569   : > { %v6559_v49 = vpop.f32.mrf.mxu1 }
 0x56b   : > { %v6561_v16 = vpop.f32.mrf.mxu1 }
 0x56d   : > { %v6563_v57 = vpop.f32.mrf.mxu1 }
 0x56f   : > { %v6565_v42 = vpop.f32.mrf.mxu1 }
 0x571   : > { %v4908_v52 = vpop.f32.mrf.mxu1 }
 0x572   : > { %v6568_v61 = vadd.f32 %v4908_v52, %v6345_v6 }
 0x573   : > { %v1685_v51 = vpop.f32.mrf.mxu1 }
 0x574   : > { %1752 = vmax.xlane.f32.xlu0 %v6568_v61  ;;  %v1686_v1 = vadd.f32 %v6345_v6, %v1685_v51 }
 0x575   : > { %v4909_v0 = vpop.f32.mrf.mxu1 }
 0x576   : > { %v6574_v4 = vadd.f32 %v4909_v0, %v6345_v6 }
 0x577   : > { %v1688_v48 = vpop.f32.mrf.mxu1 }
 0x578   : > { %v1689_v19 = vadd.f32 %v6345_v6, %v1688_v48  ;;  %1748 = vmax.xlane.f32.xlu0 %v1686_v1 }
 0x579   : > { %v4912_v46 = vpop.f32.mrf.mxu1 }
 0x57a   : > { %1750 = vmax.xlane.f32.xlu1 %v1689_v19  ;;  %v6578_v29 = vadd.f32 %v4912_v46, %v6345_v6 }
 0x57b   : > { %v1701_v25 = vpop.f32.mrf.mxu1 }
 0x57c   : > { %1754 = vmax.xlane.f32.xlu0 %v6574_v4  ;;  %v6582_v54 = vadd.f32 %v6345_v6, %v1701_v25 }
 0x57d   : > { %v4913_v58 = vpop.f32.mrf.mxu1 }
 0x57e   : > { %v6586_v26 = vadd.f32 %v4913_v58, %v6345_v6 }
 0x57f   : > { %v1704_v43 = vpop.f32.mrf.mxu1 }
 0x580   : > { %1760 = vmax.xlane.f32.xlu0 %v6578_v29  ;;  %v6596_v47 = vadd.f32 %v6345_v6, %v1704_v43 }
 0x581   : > { %v4916_v50 = vpop.f32.mrf.mxu1 }
 0x583   : > { %v1717_v22 = vpop.f32.mrf.mxu1 }
 0x584   : > { %1756 = vmax.xlane.f32.xlu0 %v6582_v54  ;;  %v6600_v39 = vadd.f32 %v6345_v6, %v1717_v22 }
 0x585   : > { %v4917_v55 = vpop.f32.mrf.mxu1 }
 0x587   : > { %v1720_v21 = vpop.f32.mrf.mxu1 }
 0x588   : > { %1762 = vmax.xlane.f32.xlu0 %v6586_v26 }
 0x58b   : > { %1880 = vrot.lane.b32.xlu1 %v6250_v53, %s5744_s11  ;;  %v6604_v53 = vadd.f32 %v4916_v50, %v6345_v6 }
 0x58f   : > { %1878 = vrot.lane.b32.xlu1 %v6258_v33, %s5744_s11  ;;  %v4920_v33 = vpop.f32.mrf.mxu1 }
 0x590   : > { %v6618_v0 = vadd.f32 %v4920_v33, %v6345_v6 }
 0x591   : > { %v1733_v52 = vpop.f32.mrf.mxu1 }
 0x592   : > { %v6614_v51 = vadd.f32 %v6345_v6, %v1733_v52 }
 0x593   : > { %v4921_v48 = vpop.f32.mrf.mxu1 }
 0x594   : > { %v6632_v58 = vadd.f32 %v4921_v48, %v6345_v6 }
 0x595   : > { %v1736_v46 = vpop.f32.mrf.mxu1 }
 0x596   : > { %v6628_v25 = vadd.f32 %v6345_v6, %v1736_v46 }
 0x59e   : > { %1882 = vrot.lane.b32.xlu0 %v6232_v41, %s5744_s11  ;;  %v6608_v41 = vadd.f32 %v4917_v55, %v6345_v6  ;;  %v5197_v55 = vld [vmem:[%s5908_s10 + $0x18] sm:$0xff]  }
 0x59f   : > { %4978 = vmatprep.subr.bf16.mxu1 %v5197_v55 }
 0x5a0   : > { %4979 = vmatpush3.bf16.msra.mxu1 %v5197_v55 }
 0x5b3   : > { %1758 = vmax.xlane.f32.xlu1 %v6596_v47 }
 0x5bd   : > { %1764 = vmax.xlane.f32.xlu0 %v6600_v39 }
 0x5c1   : > { %1768 = vmax.xlane.f32.xlu0 %v6604_v53 }
 0x5c4   : > { %1876 = vrot.lane.b32.xlu1 %v6265_v37, %s5744_s11  ;;  %v6624_v37 = vadd.f32 %v6345_v6, %v1720_v21 }
 0x5c5   : > { %1770 = vmax.xlane.f32.xlu0 %v6608_v41 }
 0x5c9   : > { %1772 = vmax.xlane.f32.xlu0 %v6614_v51 }
 0x5cd   : > { %1776 = vmax.xlane.f32.xlu0 %v6618_v0 }
 0x5d1   : > { %1370 = vadd.xlane.f32.xlu0 %v6453_v18 }
 0x5d5   : > { %1374 = vadd.xlane.f32.xlu0 %v6459_v13 }
 0x5e8   : > { %1766 = vmax.xlane.f32.xlu1 %v6624_v37 }
 0x5ec   : > { %1774 = vmax.xlane.f32.xlu1 %v6628_v25 }
 0x5f0   : > { %1778 = vmax.xlane.f32.xlu1 %v6632_v58 }
 0x5f4   : > { %1372 = vadd.xlane.f32.xlu1 %v6457_v27 }
 0x5f8   : > { %1376 = vadd.xlane.f32.xlu1 %v6455_v36  ;;  %v5198_v36 = vld [vmem:[%s5908_s10 + $0x10] sm:$0xff]  }
 0x5f9   : > { %4980 = vmatprep.subr.bf16.mxu1 %v5198_v36 }
 0x5fa   : > { %4981 = vmatpush3.bf16.msra.mxu1 %v5198_v36 }
 0x5fd   : > { %v1753_v18 = vpop.xlane.xlu0 %1752 }
 0x5fe   : > { %v1782_v43 = vsub.f32 %v6568_v61, %v1753_v18  ;;  %v5199_v61 = vld [vmem:[%s5908_s10 + $0x8] sm:$0xff]   ;;  %v5200_v18 = vld [vmem:[%s5908_s10] sm:$0xff]  }
 0x5ff   : > { %4982 = vmatprep.subr.bf16.mxu1 %v5199_v61 }
 0x600   : > { %v1800_v6 = vmul.f32 1.442695, %v1782_v43  ;;  %4983 = vmatpush3.bf16.msra.mxu1 %v5199_v61 }
 0x601   : > { %v1749_v13 = vpop.xlane.xlu0 %1748  ;;  %4984 = vmatprep.subr.bf16.mxu1 %v5200_v18 }
 0x602   : > { %v1780_v50 = vsub.f32 %v1686_v1, %v1749_v13 }
 0x603   : > { %v1751_v22 = vpop.xlane.xlu1 %1750 }
 0x604   : > { %v1796_v21 = vmul.f32 1.442695, %v1780_v50  ;;  %v1781_v33 = vsub.f32 %v1689_v19, %v1751_v22  ;;  %4985 = vmatpush3.bf16.msra.mxu1 %v5200_v18 }
 0x605   : > { %v1755_v52 = vpop.xlane.xlu0 %1754 }
 0x606   : > { %5317 = vpow2.f32 %v1796_v21  ;;  %v1798_v48 = vmul.f32 1.442695, %v1781_v33  ;;  %v1783_v27 = vsub.f32 %v6574_v4, %v1755_v52 }
 0x607   : > { %v1881_v55 = vpop.permute.xlu1 %1880 }
 0x608   : > { %5319 = vpow2.f32 %v1798_v48  ;;  %v1802_v46 = vmul.f32 1.442695, %v1783_v27 }
 0x609   : > { %v1761_v59 = vpop.xlane.xlu0 %1760  ;;  %5321 = vpow2.f32 %v1800_v6 }
 0x60a   : > { %5323 = vpow2.f32 %v1802_v46  ;;  %v1786_v4 = vsub.f32 %v6578_v29, %v1761_v59 }
 0x60b   : > { %v1879_v59 = vpop.permute.xlu1 %1878 }
 0x60c   : > { %v1808_v33 = vmul.f32 1.442695, %v1786_v4 }
 0x60d   : > { %v1757_v1 = vpop.xlane.xlu0 %1756 }
 0x60e   : > { %v1784_v19 = vsub.f32 %v6582_v54, %v1757_v1 }
 0x610   : > { %v1804_v43 = vmul.f32 1.442695, %v1784_v19 }
 0x611   : > { %v1763_v13 = vpop.xlane.xlu0 %1762 }
 0x612   : > { %5325 = vpow2.f32 %v1804_v43  ;;  %v1787_v27 = vsub.f32 %v6586_v26, %v1763_v13 }
 0x613   : > { %v5318_v50 = vpop.eup %5317  ;;  %5327 = vpow2.f32 %v1808_v33 }
 0x614   : > { %1828 = vadd.xlane.f32.xlu0 %v5318_v50  ;;  %v1810_v36 = vmul.f32 1.442695, %v1787_v27  ;;  %v5201_v27 = vld [vmem:[%s5908_s10 + $0x38] sm:$0xff]  }
 0x615   : > { %v5320_v22 = vpop.eup %5319  ;;  %v1883_v21 = vpop.permute.xlu0 %1882 }
 0x616   : > { %1830 = vadd.xlane.f32.xlu1 %v5320_v22  ;;  %4930 = vmatprep.subr.bf16.mxu0 %v1883_v21  ;;  %v1860_v52 = vpack.c.bf16 %v5320_v22, %v5318_v50  ;;  %v5322_v6 = vpop.eup %5321  ;;  %5329 = vpow2.f32 %v1810_v36 }
 0x617   : > { %4931 = vmatpush3.bf16.msra.mxu0 %v1883_v21  ;;  %v5324_v54 = vpop.eup %5323 }
 0x618   : > { %1832 = vadd.xlane.f32.xlu0 %v5322_v6  ;;  %4932 = vmatprep.subr.bf16.mxu0 %v1881_v55 }
 0x619   : > { %4938 = vmatprep.mubr.bf16.mxu0 %v1860_v52 }
 0x61a   : > { %1834 = vadd.xlane.f32.xlu1 %v5324_v54 }
 0x61b   : > { %4933 = vmatpush3.bf16.msra.mxu0 %v1881_v55 }
 0x61c   : > { %1378 = vadd.xlane.f32.xlu0 %v6468_v30  ;;  %4934 = vmatprep.subr.bf16.mxu0 %v1879_v59 }
 0x61e   : > { %1380 = vadd.xlane.f32.xlu1 %v6473_v28 }
 0x61f   : > { %4935 = vmatpush3.bf16.msra.mxu0 %v1879_v59  ;;  %v5326_v29 = vpop.eup %5325 }
 0x620   : > { %1382 = vadd.xlane.f32.xlu0 %v6477_v20  ;;  %v5328_v48 = vpop.eup %5327 }
 0x622   : > { %1384 = vadd.xlane.f32.xlu1 %v6471_v34  ;;  %v1861_v34 = vpack.c.bf16 %v5324_v54, %v5322_v6 }
 0x623   : > { %v5330_v26 = vpop.eup %5329 }
 0x624   : > { %1836 = vadd.xlane.f32.xlu0 %v5326_v29  ;;  %v1863_v43 = vpack.c.bf16 %v5330_v26, %v5328_v48 }
 0x628   : > { %1840 = vadd.xlane.f32.xlu0 %v5328_v48 }
 0x62c   : > { %1386 = vadd.xlane.f32.xlu0 %v6503_v14 }
 0x630   : > { %1390 = vadd.xlane.f32.xlu0 %v6510_v12 }
 0x63c   : > { %v1759_v30 = vpop.xlane.xlu1 %1758 }
 0x63d   : > { %v1785_v46 = vsub.f32 %v6596_v47, %v1759_v30 }
 0x63f   : > { %v1806_v28 = vmul.f32 1.442695, %v1785_v46 }
 0x640   : > { %v1877_v61 = vpop.permute.xlu1 %1876 }
 0x641   : > { %5331 = vpow2.f32 %v1806_v28  ;;  %4936 = vmatprep.subr.bf16.mxu0 %v1877_v61 }
 0x642   : > { %4937 = vmatpush3.bf16.msra.mxu0 %v1877_v61 }
 0x643   : > { %4954 = vmatprep.subr.bf16.mxu0 %v5201_v27 }
 0x645   : > { %4939 = vmatmul.mubr.bf16.vlgmr.msra.gmra.mxu0 %v1861_v34 }
 0x646   : > { %v1765_v20 = vpop.xlane.xlu0 %1764  ;;  %4955 = vmatpush3.bf16.msra.mxu0 %v5201_v27 }
 0x647   : > { %v1788_v1 = vsub.f32 %v6600_v39, %v1765_v20  ;;  %v5202_v20 = vld [vmem:[%s5908_s10 + $0x30] sm:$0xff]  }
 0x648   : > { %4956 = vmatprep.subr.bf16.mxu0 %v5202_v20 }
 0x649   : > { %v1812_v14 = vmul.f32 1.442695, %v1788_v1 }
 0x64a   : > { %v1769_v19 = vpop.xlane.xlu0 %1768  ;;  %4957 = vmatpush3.bf16.msra.mxu0 %v5202_v20 }
 0x64b   : > { %5333 = vpow2.f32 %v1812_v14  ;;  %v1790_v12 = vsub.f32 %v6604_v53, %v1769_v19  ;;  %v5203_v19 = vld [vmem:[%s5908_s10 + $0x28] sm:$0xff]  }
 0x64c   : > { %4958 = vmatprep.subr.bf16.mxu0 %v5203_v19 }
 0x64d   : > { %v1816_v18 = vmul.f32 1.442695, %v1790_v12 }
 0x64e   : > { %v5332_v13 = vpop.eup %5331  ;;  %v1771_v47 = vpop.xlane.xlu0 %1770  ;;  %4959 = vmatpush3.bf16.msra.mxu0 %v5203_v19 }
 0x64f   : > { %5335 = vpow2.f32 %v1816_v18  ;;  %1838 = vadd.xlane.f32.xlu1 %v5332_v13  ;;  %v1862_v4 = vpack.c.bf16 %v5332_v13, %v5326_v29 }
 0x651   : > { %4942 = vmatprep.mubr.bf16.mxu0 %v1862_v4 }
 0x652   : > { %4943 = vmatmul.mubr.bf16.gmra.mxu0 %v1863_v43  ;;  %v1773_v50 = vpop.xlane.xlu0 %1772 }
 0x653   : > { %v1792_v22 = vsub.f32 %v6614_v51, %v1773_v50  ;;  %1842 = vadd.xlane.f32.xlu1 %v5330_v26 }
 0x655   : > { %v1820_v55 = vmul.f32 1.442695, %v1792_v22 }
 0x656   : > { %v1777_v39 = vpop.xlane.xlu0 %1776 }
 0x657   : > { %v1794_v21 = vsub.f32 %v6618_v0, %v1777_v39  ;;  %1388 = vadd.xlane.f32.xlu1 %v6500_v3  ;;  %5337 = vpow2.f32 %v1820_v55  ;;  %v1791_v0 = vsub.f32 %v6608_v41, %v1771_v47  ;;  %v5204_v47 = vld [vmem:[%s5908_s10 + $0x20] sm:$0xff]   ;;  %s7628_s10 = sshll.u32 (!%p4534_p11), %s5727_s25, 7 }
 0x658   : > { %v5334_v53 = vpop.eup %5333  ;;  %4960 = vmatprep.subr.bf16.mxu0 %v5204_v47  ;;  %s4114_s20 = sld [smem:[#allocation4 + %s7628_s10]] (!%p4534_p11)  ;;  %s4118_s21 = sadd.s32 (!%p4534_p11), 1, %s7628_s10 }
 0x659   : > { %1844 = vadd.xlane.f32.xlu0 %v5334_v53  ;;  %v1824_v33 = vmul.f32 1.442695, %v1794_v21  ;;  %v1818_v3 = vmul.f32 1.442695, %v1791_v0  ;;  %4961 = vmatpush3.bf16.msra.mxu0 %v5204_v47  ;;  %s4119_s24 = sld [smem:[#allocation4 + %s4118_s21]] (!%p4534_p11)  ;;  %s4128_s30 = sadd.s32 (!%p4534_p11), 3, %s7628_s10 }
 0x65a   : > { %s4129_s12 = sld [smem:[#allocation4 + %s4128_s30]] (!%p4534_p11)  ;;  %s4133_s0 = sadd.s32 (!%p4534_p11), 4, %s7628_s10 }
 0x65b   : > { %1392 = vadd.xlane.f32.xlu1 %v6512_v15  ;;  %5339 = vpow2.f32 %v1824_v33  ;;  %s4138_s23 = sadd.s32 (!%p4534_p11), 5, %s7628_s10  ;;  %s4143_s2 = sadd.s32 (!%p4534_p11), 6, %s7628_s10 }
 0x65c   : > { %v5336_v52 = vpop.eup %5335  ;;  %5341 = vpow2.f32 %v1818_v3  ;;  %s4144_s26 = sld [smem:[#allocation4 + %s4143_s2]] (!%p4534_p11)  ;;  %s4148_s28 = sadd.s32 (!%p4534_p11), 7, %s7628_s10 }
 0x65d   : > { %1848 = vadd.xlane.f32.xlu0 %v5336_v52  ;;  %s4149_s11 = sld [smem:[#allocation4 + %s4148_s28]] (!%p4534_p11) }
 0x661   : > { %1394 = vadd.xlane.f32.xlu0 %v6514_v17  ;;  %v1371_v17 = vpop.xlane.xlu0 %1370 }
 0x664   : > { %v5338_v51 = vpop.eup %5337 }
 0x665   : > { %1398 = vadd.xlane.f32.xlu0 %v6523_v24  ;;  %v1375_v46 = vpop.xlane.xlu0 %1374 }
 0x668   : > { %v5340_v6 = vpop.eup %5339 }
 0x669   : > { %1852 = vadd.xlane.f32.xlu0 %v5338_v51 }
 0x66d   : > { %1856 = vadd.xlane.f32.xlu0 %v5340_v6 }
 0x671   : > { %v1767_v54 = vpop.xlane.xlu1 %1766 }
 0x672   : > { %v1789_v59 = vsub.f32 %v6624_v37, %v1767_v54 }
 0x674   : > { %v1814_v29 = vmul.f32 1.442695, %v1789_v59 }
 0x675   : > { %v1775_v15 = vpop.xlane.xlu1 %1774 }
 0x676   : > { %5343 = vpow2.f32 %v1814_v29  ;;  %v1793_v48 = vsub.f32 %v6628_v25, %v1775_v15  ;;  %v5342_v25 = vpop.eup %5341 }
 0x677   : > { %v1865_v1 = vpack.c.bf16 %v5342_v25, %v5336_v52 }
 0x678   : > { %v1822_v36 = vmul.f32 1.442695, %v1793_v48 }
 0x679   : > { %v1779_v24 = vpop.xlane.xlu1 %1778 }
 0x67a   : > { %5345 = vpow2.f32 %v1822_v36  ;;  %v1795_v41 = vsub.f32 %v6632_v58, %v1779_v24 }
 0x67b   : > { %5347 = vrcp.f32 %v1371_v17 }
 0x67c   : > { %v1826_v30 = vmul.f32 1.442695, %v1795_v41 }
 0x67d   : > { %v1373_v37 = vpop.xlane.xlu1 %1372 }
 0x67e   : > { %5349 = vpow2.f32 %v1826_v30 }
 0x67f   : > { %5351 = vrcp.f32 %v1373_v37 }
 0x680   : > { %5353 = vrcp.f32 %v1375_v46 }
 0x681   : > { %v1377_v28 = vpop.xlane.xlu1 %1376 }
 0x682   : > { %5355 = vrcp.f32 %v1377_v28 }
 0x683   : > { %v5344_v61 = vpop.eup %5343 }
 0x684   : > { %1846 = vadd.xlane.f32.xlu1 %v5344_v61  ;;  %v1864_v34 = vpack.c.bf16 %v5344_v61, %v5334_v53 }
 0x686   : > { %4946 = vmatprep.mubr.bf16.mxu0 %v1864_v34 }
 0x687   : > { %v5346_v58 = vpop.eup %5345  ;;  %4947 = vmatmul.mubr.bf16.gmra.mxu0 %v1865_v1 }
 0x688   : > { %1850 = vadd.xlane.f32.xlu1 %v5342_v25  ;;  %v1866_v14 = vpack.c.bf16 %v5346_v58, %v5338_v51  ;;  %v5348_v12 = vpop.eup %5347 }
 0x689   : > { %v1508_v43 = vmul.f32 %v5348_v12, %v6537_v56 }
 0x68a   : > { %4950 = vmatprep.mubr.bf16.mxu0 %v1866_v14 }
 0x68b   : > { %v5350_v26 = vpop.eup %5349 }
 0x68c   : > { %v5352_v18 = vpop.eup %5351  ;;  %1396 = vadd.xlane.f32.xlu1 %v6508_v11  ;;  %v1867_v13 = vpack.c.bf16 %v5350_v26, %v5340_v6 }
 0x68d   : > { %v5354_v4 = vpop.eup %5353  ;;  %v1510_v50 = vmul.f32 %v5352_v18, %v6541_v44 }
 0x68e   : > { %v1512_v55 = vmul.f32 %v5354_v4, %v6535_v60 }
 0x68f   : > { %v5356_v22 = vpop.eup %5355  ;;  %4951 = vmatmul.mubr.bf16.gmra.mxu0 %v1867_v13  ;;  %v1539_v39 = vpack.c.bf16 %v1510_v50, %v1508_v43 }
 0x690   : > { %v1514_v21 = vmul.f32 %v5356_v22, %v6539_v2  ;;  %1400 = vadd.xlane.f32.xlu1 %v6521_v40 }
 0x691   : > { %4986 = vmatprep.mubr.msk.bf16.mxu1 %vm1144_vm0, %v1539_v39 }
 0x692   : > { %v1540_v11 = vpack.c.bf16 %v1514_v21, %v1512_v55 }
 0x694   : > { %1854 = vadd.xlane.f32.xlu1 %v5346_v58  ;;  %4987 = vmatmul.mubr.msk.bf16.vlgmr.msra.gmra.mxu1 %vm1144_vm0, %v1540_v11 }
 0x698   : > { %1858 = vadd.xlane.f32.xlu1 %v5350_v26 }
 0x69d   : > { %v1829_v56 = vpop.xlane.xlu0 %1828 }
 0x69f   : > { %v1831_v44 = vpop.xlane.xlu1 %1830 }
 0x6a1   : > { %v1833_v53 = vpop.xlane.xlu0 %1832 }
 0x6a3   : > { %v1835_v33 = vpop.xlane.xlu1 %1834 }
 0x6a5   : > { %v1379_v52 = vpop.xlane.xlu0 %1378 }
 0x6a6   : > { %5357 = vrcp.f32 %v1379_v52 }
 0x6a7   : > { %v1381_v51 = vpop.xlane.xlu1 %1380 }
 0x6a8   : > { %5359 = vrcp.f32 %v1381_v51 }
 0x6a9   : > { %v1383_v60 = vpop.xlane.xlu0 %1382 }
 0x6aa   : > { %5361 = vrcp.f32 %v1383_v60 }
 0x6ab   : > { %v1385_v2 = vpop.xlane.xlu1 %1384 }
 0x6ac   : > { %5363 = vrcp.f32 %v1385_v2 }
 0x6ad   : > { %v1837_v27 = vpop.xlane.xlu0 %1836 }
 0x6b1   : > { %v1841_v36 = vpop.xlane.xlu0 %1840 }
 0x6b3   : > { %v5358_v40 = vpop.eup %5357 }
 0x6b4   : > { %v1516_v0 = vmul.f32 %v5358_v40, %v6545_v63 }
 0x6b5   : > { %v5360_v6 = vpop.eup %5359  ;;  %v1387_v41 = vpop.xlane.xlu0 %1386 }
 0x6b6   : > { %v1518_v3 = vmul.f32 %v5360_v6, %v6549_v5  ;;  %5365 = vrcp.f32 %v1387_v41 }
 0x6b7   : > { %v5362_v54 = vpop.eup %5361 }
 0x6b8   : > { %v1541_v59 = vpack.c.bf16 %v1518_v3, %v1516_v0  ;;  %v1520_v15 = vmul.f32 %v5362_v54, %v6543_v7 }
 0x6b9   : > { %v5364_v29 = vpop.eup %5363  ;;  %v1391_v63 = vpop.xlane.xlu0 %1390 }
 0x6ba   : > { %4990 = vmatprep.mubr.msk.bf16.mxu1 %vm1144_vm0, %v1541_v59  ;;  %v1522_v48 = vmul.f32 %v5364_v29, %v6547_v31 }
 0x6bc   : > { %v1542_v17 = vpack.c.bf16 %v1522_v48, %v1520_v15 }
 0x6be   : > { %4991 = vmatmul.mubr.msk.bf16.gmra.mxu1 %vm1144_vm0, %v1542_v17 }
 0x6c3   : > { %v5366_v37 = vpop.eup %5365 }
 0x6c4   : > { %v1524_v7 = vmul.f32 %v5366_v37, %v6553_v32 }
 0x6d8   : > { %v1839_v24 = vpop.xlane.xlu1 %1838 }
 0x6dc   : > { %v1843_v30 = vpop.xlane.xlu1 %1842 }
 0x6e0   : > { %v1389_v5 = vpop.xlane.xlu1 %1388 }
 0x6e1   : > { %5367 = vrcp.f32 %v1389_v5 }
 0x6e2   : > { %5369 = vrcp.f32 %v1391_v63  ;;  %v1845_v14 = vpop.xlane.xlu0 %1844 }
 0x6e4   : > { %v1393_v46 = vpop.xlane.xlu1 %1392 }
 0x6e5   : > { %5371 = vrcp.f32 %v1393_v46 }
 0x6e6   : > { %5373 = vrcp.f32 %v1833_v53  ;;  %v1849_v26 = vpop.xlane.xlu0 %1848 }
 0x6e7   : > { %5375 = vrcp.f32 %v1835_v33 }
 0x6e8   : > { %5377 = vrcp.f32 %v1829_v56 }
 0x6e9   : > { %5379 = vrcp.f32 %v1831_v44 }
 0x6ea   : > { %5381 = vrcp.f32 %v1837_v27  ;;  %v1395_v21 = vpop.xlane.xlu0 %1394 }
 0x6eb   : > { %5383 = vrcp.f32 %v1843_v30 }
 0x6ec   : > { %5385 = vrcp.f32 %v1839_v24 }
 0x6ed   : > { %5387 = vrcp.f32 %v1841_v36 }
 0x6ee   : > { %v5368_v28 = vpop.eup %5367  ;;  %5389 = vrcp.f32 %v1395_v21  ;;  %v1399_v53 = vpop.xlane.xlu0 %1398 }
 0x6ef   : > { %v1526_v31 = vmul.f32 %v5368_v28, %v6557_v45  ;;  %v5370_v25 = vpop.eup %5369 }
 0x6f0   : > { %v1528_v20 = vmul.f32 %v5370_v25, %v6551_v38 }
 0x6f1   : > { %v1543_v61 = vpack.c.bf16 %v1526_v31, %v1524_v7 }
 0x6f2   : > { %v5372_v34 = vpop.eup %5371 }
 0x6f3   : > { %4994 = vmatprep.mubr.msk.bf16.mxu1 %vm1144_vm0, %v1543_v61  ;;  %v1530_v1 = vmul.f32 %v5372_v34, %v6555_v35  ;;  %v5374_v45 = vpop.eup %5373 }
 0x6f4   : > { %v5376_v12 = vpop.eup %5375 }
 0x6f5   : > { %v1544_v58 = vpack.c.bf16 %v1530_v1, %v1528_v20  ;;  %v5378_v13 = vpop.eup %5377 }
 0x6f6   : > { %v5380_v35 = vpop.eup %5379 }
 0x6f7   : > { %4995 = vmatmul.mubr.msk.bf16.gmra.mxu1 %vm1144_vm0, %v1544_v58  ;;  %v5382_v52 = vpop.eup %5381 }
 0x6f8   : > { %v5384_v60 = vpop.eup %5383 }
 0x6f9   : > { %v5386_v2 = vpop.eup %5385 }
 0x6fa   : > { %v5388_v0 = vpop.eup %5387 }
 0x6fb   : > { %v5390_v17 = vpop.eup %5389 }
 0x6fc   : > { %v1532_v36 = vmul.f32 %v5390_v17, %v6561_v16  ;;  %v1853_v16 = vpop.xlane.xlu0 %1852 }
 0x700   : > { %v1857_v7 = vpop.xlane.xlu0 %1856 }
 0x705   : > { %v4940_v32 = vpop.f32.mrf.mxu0 }
 0x706   : > { %v2002_v38 = vmul.f32 %v5374_v45, %v4940_v32 }
 0x707   : > { %v1934_v19 = vpop.f32.mrf.mxu0 }
 0x708   : > { %v1998_v43 = vmul.f32 %v5378_v13, %v1934_v19 }
 0x709   : > { %v4941_v18 = vpop.f32.mrf.mxu0 }
 0x70a   : > { %v2004_v47 = vmul.f32 %v5376_v12, %v4941_v18 }
 0x70b   : > { %v1937_v4 = vpop.f32.mrf.mxu0 }
 0x70c   : > { %v2030_v50 = vpack.c.bf16 %v2004_v47, %v2002_v38  ;;  %v2000_v22 = vmul.f32 %v5380_v35, %v1937_v4 }
 0x70d   : > { %v1847_v39 = vpop.xlane.xlu1 %1846 }
 0x70e   : > { %v2029_v55 = vpack.c.bf16 %v2000_v22, %v1998_v43 }
 0x710   : > { %4962 = vmatprep.mubr.msk.bf16.mxu0 %vm1144_vm0, %v2029_v55 }
 0x711   : > { %v1851_v11 = vpop.xlane.xlu1 %1850  ;;  %4963 = vmatmul.mubr.msk.bf16.vlgmr.msra.gmra.mxu0 %vm1144_vm0, %v2030_v50 }
 0x712   : > { %v4944_v56 = vpop.f32.mrf.mxu0 }
 0x713   : > { %v2010_v29 = vmul.f32 %v5388_v0, %v4944_v56 }
 0x714   : > { %v1950_v44 = vpop.f32.mrf.mxu0 }
 0x715   : > { %v1397_v33 = vpop.xlane.xlu1 %1396  ;;  %v2006_v3 = vmul.f32 %v5382_v52, %v1950_v44 }
 0x716   : > { %5391 = vrcp.f32 %v1397_v33  ;;  %v4945_v51 = vpop.f32.mrf.mxu0 }
 0x717   : > { %5393 = vrcp.f32 %v1399_v53  ;;  %v2012_v40 = vmul.f32 %v5384_v60, %v4945_v51 }
 0x718   : > { %v1953_v6 = vpop.f32.mrf.mxu0 }
 0x719   : > { %v2008_v54 = vmul.f32 %v5386_v2, %v1953_v6  ;;  %v1401_v59 = vpop.xlane.xlu1 %1400  ;;  %v2032_v48 = vpack.c.bf16 %v2012_v40, %v2010_v29  ;;  %v5605_v6 = vld [vmem:[#allocation2 + $0x30] sm:$0xff]  ;;  %v5606_v29 = vld [vmem:[#allocation2 + $0x58] sm:$0xff] }
 0x71a   : > { %5395 = vrcp.f32 %v1401_v59 }
 0x71b   : > { %v2031_v15 = vpack.c.bf16 %v2008_v54, %v2006_v3  ;;  %5397 = vrcp.f32 %v1845_v14  ;;  %v6706_v54 = vld [vmem:[%s5923_s27 + $0x3] ss:$0 sm:$0xff] }
 0x71c   : > { %5399 = vrcp.f32 %v1851_v11 }
 0x71d   : > { %4966 = vmatprep.mubr.msk.bf16.mxu0 %vm1144_vm0, %v2031_v15  ;;  %v1855_v28 = vpop.xlane.xlu1 %1854  ;;  %5401 = vrcp.f32 %v1847_v39 }
 0x71e   : > { %4967 = vmatmul.mubr.msk.bf16.gmra.mxu0 %vm1144_vm0, %v2032_v48  ;;  %5403 = vrcp.f32 %v1849_v26 }
 0x71f   : > { %5405 = vrcp.f32 %v1853_v16 }
 0x723   : > { %v5392_v27 = vpop.eup %5391 }
 0x724   : > { %v1534_v24 = vmul.f32 %v5392_v27, %v6565_v42  ;;  %v5394_v41 = vpop.eup %5393  ;;  %v1859_v42 = vpop.xlane.xlu1 %1858 }
 0x725   : > { %v1536_v5 = vmul.f32 %v5394_v41, %v6559_v49  ;;  %5407 = vrcp.f32 %v1859_v42 }
 0x726   : > { %v1545_v30 = vpack.c.bf16 %v1534_v24, %v1532_v36  ;;  %5409 = vrcp.f32 %v1855_v28  ;;  %v5607_v36 = vld [vmem:[#allocation2] sm:$0xff] }
 0x727   : > { %v5396_v63 = vpop.eup %5395  ;;  %5411 = vrcp.f32 %v1857_v7 }
 0x728   : > { %4998 = vmatprep.mubr.msk.bf16.mxu1 %vm1144_vm0, %v1545_v30  ;;  %v1538_v46 = vmul.f32 %v5396_v63, %v6563_v57  ;;  %v5398_v57 = vpop.eup %5397  ;;  %v5608_v30 = vld [vmem:[#allocation2 + $0x18] sm:$0xff] }
 0x729   : > { %v5400_v61 = vpop.eup %5399 }
 0x72a   : > { %v1546_v37 = vpack.c.bf16 %v1538_v46, %v1536_v5  ;;  %v5402_v34 = vpop.eup %5401 }
 0x72b   : > { %v5404_v58 = vpop.eup %5403 }
 0x72c   : > { %4999 = vmatmul.mubr.msk.bf16.gmra.mxu1 %vm1144_vm0, %v1546_v37  ;;  %v5406_v13 = vpop.eup %5405 }
 0x72d   : > { %2960 = vmatprep.mubr.bf16.mxu1 %v5743_v23 }
 0x732   : > { %v5408_v47 = vpop.eup %5407 }
 0x733   : > { %v5410_v35 = vpop.eup %5409 }
 0x734   : > { %v5412_v50 = vpop.eup %5411 }
 0x747   : > { %v4948_v31 = vpop.f32.mrf.mxu0 }
 0x748   : > { %v2018_v19 = vmul.f32 %v5404_v58, %v4948_v31 }
 0x749   : > { %v1966_v49 = vpop.f32.mrf.mxu0 }
 0x74a   : > { %v2014_v14 = vmul.f32 %v5398_v57, %v1966_v49  ;;  %v5609_v57 = vld [vmem:[#allocation2 + $0x50] sm:$0xff] }
 0x74b   : > { %v4949_v25 = vpop.f32.mrf.mxu0 }
 0x74c   : > { %v2020_v20 = vmul.f32 %v5400_v61, %v4949_v25 }
 0x74d   : > { %v1969_v1 = vpop.f32.mrf.mxu0 }
 0x74e   : > { %v2016_v32 = vmul.f32 %v5402_v34, %v1969_v1  ;;  %v2034_v26 = vpack.c.bf16 %v2020_v20, %v2018_v19  ;;  %v5610_v20 = vld [vmem:[#allocation2 + $0x8] sm:$0xff] }
 0x74f   : > { %v4952_v45 = vpop.f32.mrf.mxu0  ;;  %v5611_v19 = vld [vmem:[#allocation2 + $0x68] sm:$0xff] }
 0x750   : > { %v2033_v12 = vpack.c.bf16 %v2016_v32, %v2014_v14  ;;  %v2026_v55 = vmul.f32 %v5412_v50, %v4952_v45 }
 0x751   : > { %v1982_v18 = vpop.f32.mrf.mxu0 }
 0x752   : > { %4970 = vmatprep.mubr.msk.bf16.mxu0 %vm1144_vm0, %v2033_v12  ;;  %v2022_v22 = vmul.f32 %v5406_v13, %v1982_v18  ;;  %v5612_v12 = vld [vmem:[#allocation2 + $0x48] sm:$0xff] }
 0x753   : > { %v4953_v38 = vpop.f32.mrf.mxu0  ;;  %4971 = vmatmul.mubr.msk.bf16.gmra.mxu0 %vm1144_vm0, %v2034_v26 }
 0x754   : > { %v2028_v4 = vmul.f32 %v5408_v47, %v4953_v38  ;;  %v4988_v56 = vpop.f32.mrf.mxu1 }
 0x755   : > { %v1985_v43 = vpop.f32.mrf.mxu0 }
 0x756   : > { %v2024_v39 = vmul.f32 %v5410_v35, %v1985_v43  ;;  %v2036_v11 = vpack.c.bf16 %v2028_v4, %v2026_v55  ;;  %v2272_v44 = vpop.f32.mrf.mxu1 }
 0x758   : > { %v2035_v21 = vpack.c.bf16 %v2024_v39, %v2022_v22  ;;  %v4989_v33 = vpop.f32.mrf.mxu1 }
 0x75a   : > { %4974 = vmatprep.mubr.msk.bf16.mxu0 %vm1144_vm0, %v2035_v21  ;;  %v2275_v40 = vpop.f32.mrf.mxu1 }
 0x75b   : > { %4975 = vmatmul.mubr.msk.bf16.gmra.mxu0 %vm1144_vm0, %v2036_v11 }
 0x75c   : > { %2847 = vmatprep.mubr.bf16.mxu0 %v5743_v23 }
 0x77e   : > { %v4992_v59 = vpop.f32.mrf.mxu1 }
 0x780   : > { %v2288_v41 = vpop.f32.mrf.mxu1 }
 0x782   : > { %v4993_v28 = vpop.f32.mrf.mxu1 }
 0x784   : > { %v2291_v61 = vpop.f32.mrf.mxu1 }
 0x7b7   : > { %v4996_v47 = vpop.f32.mrf.mxu1 }
 0x7b9   : > { %v2304_v35 = vpop.f32.mrf.mxu1 }
 0x7bb   : > { %v4997_v4 = vpop.f32.mrf.mxu1 }
 0x7bd   : > { %v2307_v43 = vpop.f32.mrf.mxu1 }
 0x7d1   : > { %v4964_v53 = vpop.f32.mrf.mxu0 }
 0x7d2   : > { %v2281_v51 = vadd.f32 %v4988_v56, %v4964_v53  ;;  %v5613_v56 = vld [vmem:[#allocation2 + $0x40] sm:$0xff] }
 0x7d3   : > { %v2127_v52 = vpop.f32.mrf.mxu0 }
 0x7d4   : > { %v2273_v60 = vadd.f32 %v2272_v44, %v2127_v52  ;;  %v2337_v15 = vadd.f32 %v5606_v29, %v2281_v51  ;;  %v5614_v51 = vld [vmem:[#allocation2 + $0x10] sm:$0xff]  ;;  %v5616_v29 = vld [vmem:[#allocation2 + $0x38] sm:$0xff] }
 0x7d5   : > { %v4965_v2 = vpop.f32.mrf.mxu0 }
 0x7d6   : > { %v2335_v0 = vadd.f32 %v5605_v6, %v2273_v60  ;;  %v2284_v48 = vadd.f32 %v4989_v33, %v4965_v2  ;;  %v6713_v5 = vadd.f32 %v6706_v54, %v2337_v15 }
 0x7d7   : > { %v2130_v3 = vpop.f32.mrf.mxu0 }
 0x7d8   : > { %v2276_v17 = vadd.f32 %v2275_v40, %v2130_v3  ;;  %v6709_v27 = vadd.f32 %v6706_v54, %v2335_v0  ;;  %v2338_v63 = vadd.f32 %v5608_v30, %v2284_v48  ;;  %v5615_v0 = vld [vmem:[#allocation2 + $0x20] sm:$0xff] }
 0x7da   : > { %v2336_v24 = vadd.f32 %v5607_v36, %v2276_v17  ;;  %2373 = vadd.xlane.f32.xlu0 %v6709_v27  ;;  %v6721_v42 = vadd.f32 %v6706_v54, %v2338_v63  ;;  %v5617_v63 = vld [vmem:[#allocation2 + $0x60] sm:$0xff] }
 0x7dc   : > { %v6716_v46 = vadd.f32 %v6706_v54, %v2336_v24 }
 0x7de   : > { %2377 = vadd.xlane.f32.xlu0 %v6713_v5  ;;  %2375 = vadd.xlane.f32.xlu1 %v6716_v46  ;;  %v4968_v37 = vpop.f32.mrf.mxu0 }
 0x7df   : > { %v2297_v7 = vadd.f32 %v4992_v59, %v4968_v37 }
 0x7e0   : > { %v2143_v16 = vpop.f32.mrf.mxu0 }
 0x7e1   : > { %v2289_v31 = vadd.f32 %v2288_v41, %v2143_v16  ;;  %v2341_v1 = vadd.f32 %v5610_v20, %v2297_v7 }
 0x7e2   : > { %2379 = vadd.xlane.f32.xlu1 %v6721_v42  ;;  %v4969_v49 = vpop.f32.mrf.mxu0 }
 0x7e3   : > { %v2339_v25 = vadd.f32 %v5609_v57, %v2289_v31  ;;  %v2300_v58 = vadd.f32 %v4993_v28, %v4969_v49  ;;  %v6729_v18 = vadd.f32 %v6706_v54, %v2341_v1  ;;  %v5618_v31 = vld [vmem:[#allocation2 + $0x78] sm:$0xff]  ;;  %v5620_v1 = vld [vmem:[#allocation2 + $0x28] sm:$0xff] }
 0x7e4   : > { %v2146_v34 = vpop.f32.mrf.mxu0 }
 0x7e5   : > { %v2292_v14 = vadd.f32 %v2291_v61, %v2146_v34  ;;  %v6725_v32 = vadd.f32 %v6706_v54, %v2339_v25  ;;  %v2342_v26 = vadd.f32 %v5612_v12, %v2300_v58  ;;  %v5619_v34 = vld [vmem:[#allocation2 + $0x70] sm:$0xff] }
 0x7e6   : > { %v5205_v12 = vld [vmem:[%s5913_s15 + $0xe0] ss:$16 sps:$4 sm:$0xff]  }
 0x7e7   : > { %v2340_v45 = vadd.f32 %v5611_v19, %v2292_v14  ;;  %2381 = vadd.xlane.f32.xlu0 %v6725_v32  ;;  %v6737_v38 = vadd.f32 %v6706_v54, %v2342_v26  ;;  %v5207_v26 = vld [vmem:[%s5913_s15 + $0xe4] ss:$16 sps:$4 sm:$0xff]  }
 0x7e8   : > { %2815 = vmatprep.subr.bf16.mxu0 %v5207_v26  ;;  %v5237_v26 = vld [vmem:[%s5913_s15 + $0x44] ss:$16 sps:$4 sm:$0xff]  }
 0x7e9   : > { %v6732_v13 = vadd.f32 %v6706_v54, %v2340_v45  ;;  %2816 = vmatpush1.bf16.msra.mxu0 %v5205_v12  ;;  %v5232_v12 = vld [vmem:[%s5913_s15 + $0x68] ss:$16 sps:$4 sm:$0xff]  }
 0x7eb   : > { %2385 = vadd.xlane.f32.xlu0 %v6729_v18  ;;  %2383 = vadd.xlane.f32.xlu1 %v6732_v13 }
 0x7ec   : > { %v5000_v22 = vpop.f32.mrf.mxu1 }
 0x7ee   : > { %v2320_v53 = vpop.f32.mrf.mxu1 }
 0x7ef   : > { %2387 = vadd.xlane.f32.xlu1 %v6737_v38 }
 0x7f0   : > { %v5001_v59 = vpop.f32.mrf.mxu1 }
 0x7f2   : > { %v2323_v28 = vpop.f32.mrf.mxu1 }
 0x813   : > { %v4972_v50 = vpop.f32.mrf.mxu0 }
 0x814   : > { %v2313_v55 = vadd.f32 %v4996_v47, %v4972_v50  ;;  %v5208_v47 = vld [vmem:[%s5913_s15 + $0xe8] ss:$16 sps:$4 sm:$0xff]  }
 0x815   : > { %v2159_v39 = vpop.f32.mrf.mxu0 }
 0x816   : > { %v2305_v21 = vadd.f32 %v2304_v35, %v2159_v39  ;;  %v2345_v60 = vadd.f32 %v5614_v51, %v2313_v55  ;;  %v5210_v35 = vld [vmem:[%s5913_s15 + $0xec] ss:$16 sps:$4 sm:$0xff]  }
 0x817   : > { %v4973_v11 = vpop.f32.mrf.mxu0  ;;  %2928 = vmatprep.subr.bf16.mxu1 %v5210_v35  ;;  %v5235_v35 = vld [vmem:[%s5913_s15 + $0x40] ss:$16 sps:$4 sm:$0xff]  }
 0x818   : > { %v2343_v44 = vadd.f32 %v5613_v56, %v2305_v21  ;;  %v2316_v33 = vadd.f32 %v4997_v4, %v4973_v11  ;;  %v6745_v24 = vadd.f32 %v6706_v54, %v2345_v60  ;;  %2929 = vmatpush1.bf16.msra.mxu1 %v5208_v47  ;;  %v5240_v47 = vld [vmem:[%s5913_s15 + $0x4c] ss:$16 sps:$4 sm:$0xff]  }
 0x819   : > { %v2162_v52 = vpop.f32.mrf.mxu0 }
 0x81a   : > { %v2308_v2 = vadd.f32 %v2307_v43, %v2162_v52  ;;  %v6741_v40 = vadd.f32 %v6706_v54, %v2343_v44  ;;  %v2346_v15 = vadd.f32 %v5616_v29, %v2316_v33  ;;  %v5216_v29 = vld [vmem:[%s5913_s15 + $0xcc] ss:$16 sps:$4 sm:$0xff]  }
 0x81b   : > { %v4976_v6 = vpop.f32.mrf.mxu0  ;;  %2930 = vmatprep.subr.bf16.mxu1 %v5216_v29 }
 0x81c   : > { %v2344_v3 = vadd.f32 %v5615_v0, %v2308_v2  ;;  %2389 = vadd.xlane.f32.xlu0 %v6741_v40  ;;  %v2329_v17 = vadd.f32 %v5000_v22, %v4976_v6  ;;  %v6753_v7 = vadd.f32 %v6706_v54, %v2346_v15  ;;  %v5211_v15 = vld [vmem:[%s5913_s15 + $0xc0] ss:$16 sps:$4 sm:$0xff]  }
 0x81d   : > { %v2175_v48 = vpop.f32.mrf.mxu0 }
 0x81e   : > { %v2321_v36 = vadd.f32 %v2320_v53, %v2175_v48  ;;  %v6748_v41 = vadd.f32 %v6706_v54, %v2344_v3  ;;  %v2349_v49 = vadd.f32 %v5618_v31, %v2329_v17  ;;  %v5214_v48 = vld [vmem:[%s5913_s15 + $0xc8] ss:$16 sps:$4 sm:$0xff]  }
 0x81f   : > { %v4977_v30 = vpop.f32.mrf.mxu0  ;;  %2931 = vmatpush1.bf16.msra.mxu1 %v5214_v48 }
 0x820   : > { %v2347_v37 = vadd.f32 %v5617_v63, %v2321_v36  ;;  %2393 = vadd.xlane.f32.xlu0 %v6745_v24  ;;  %2391 = vadd.xlane.f32.xlu1 %v6748_v41  ;;  %v2332_v57 = vadd.f32 %v5001_v59, %v4977_v30  ;;  %v6761_v14 = vadd.f32 %v6706_v54, %v2349_v49  ;;  %v5213_v59 = vld [vmem:[%s5913_s15 + $0xc4] ss:$16 sps:$4 sm:$0xff]  }
 0x821   : > { %v2178_v16 = vpop.f32.mrf.mxu0  ;;  %2817 = vmatprep.subr.bf16.mxu0 %v5213_v59 }
 0x822   : > { %v2324_v25 = vadd.f32 %v2323_v28, %v2178_v16  ;;  %v6756_v61 = vadd.f32 %v6706_v54, %v2347_v37  ;;  %v2350_v58 = vadd.f32 %v5620_v1, %v2332_v57  ;;  %2818 = vmatpush1.bf16.msra.mxu0 %v5211_v15  ;;  %v5217_v28 = vld [vmem:[%s5913_s15 + $0xa0] ss:$16 sps:$4 sm:$0xff]   ;;  %v5220_v16 = vld [vmem:[%s5913_s15 + $0xa8] ss:$16 sps:$4 sm:$0xff]   ;;  %v5225_v57 = vld [vmem:[%s5913_s15 + $0x84] ss:$16 sps:$4 sm:$0xff]  }
 0x823   : > { %v5234_v1 = vld [vmem:[%s5913_s15 + $0x6c] ss:$16 sps:$4 sm:$0xff]  }
 0x824   : > { %v2348_v20 = vadd.f32 %v5619_v34, %v2324_v25  ;;  %2395 = vadd.xlane.f32.xlu1 %v6753_v7  ;;  %2397 = vadd.xlane.f32.xlu0 %v6756_v61  ;;  %v6769_v45 = vadd.f32 %v6706_v54, %v2350_v58  ;;  %v5228_v25 = vld [vmem:[%s5913_s15 + $0x8c] ss:$16 sps:$4 sm:$0xff]   ;;  %v5223_v34 = vld [vmem:[%s5913_s15 + $0x80] ss:$16 sps:$4 sm:$0xff]  }
 0x825   : > { %v5229_v58 = vld [vmem:[%s5913_s15 + $0x60] ss:$16 sps:$4 sm:$0xff]  }
 0x826   : > { %v6764_v19 = vadd.f32 %v6706_v54, %v2348_v20  ;;  %v5231_v20 = vld [vmem:[%s5913_s15 + $0x64] ss:$16 sps:$4 sm:$0xff]  }
 0x828   : > { %2401 = vadd.xlane.f32.xlu0 %v6761_v14  ;;  %2399 = vadd.xlane.f32.xlu1 %v6764_v19 }
 0x82c   : > { %2403 = vadd.xlane.f32.xlu1 %v6769_v45 }
 0x863   : > { %v2374_v4 = vpop.xlane.xlu0 %2373 }
 0x864   : > { %v2406_v43 = vmul.f32 0.0078125, %v2374_v4  ;;  %v5238_v4 = vld [vmem:[%s5913_s15 + $0x48] ss:$16 sps:$4 sm:$0xff]  }
 0x866   : > { %v6777_v50 = vsub.f32 %v6709_v27, %v2406_v43  ;;  %v5243_v43 = vld [vmem:[%s5913_s15 + $0x24] ss:$16 sps:$4 sm:$0xff]  }
 0x867   : > { %v2376_v22 = vpop.xlane.xlu1 %2375  ;;  %v2378_v39 = vpop.xlane.xlu0 %2377 }
 0x868   : > { %v2407_v55 = vmul.f32 0.0078125, %v2376_v22  ;;  %v2408_v54 = vmul.f32 0.0078125, %v2378_v39  ;;  %v2438_v21 = vmul.f32 %v6777_v50, %v6777_v50  ;;  %v5246_v22 = vld [vmem:[%s5913_s15 + $0x2c] ss:$16 sps:$4 sm:$0xff]   ;;  %v5241_v39 = vld [vmem:[%s5913_s15 + $0x20] ss:$16 sps:$4 sm:$0xff]  }
 0x86a   : > { %v6782_v11 = vsub.f32 %v6716_v46, %v2407_v55  ;;  %v6785_v56 = vsub.f32 %v6713_v5, %v2408_v54  ;;  %2454 = vadd.xlane.f32.xlu0 %v2438_v21  ;;  %v5244_v55 = vld [vmem:[%s5913_s15 + $0x28] ss:$16 sps:$4 sm:$0xff]   ;;  %v5247_v54 = vld [vmem:[%s5913_s15] ss:$16 sps:$4 sm:$0xff]   ;;  %v5249_v21 = vld [vmem:[%s5913_s15 + $0x4] ss:$16 sps:$4 sm:$0xff]  }
 0x86b   : > { %v2380_v44 = vpop.xlane.xlu1 %2379 }
 0x86c   : > { %v2409_v53 = vmul.f32 0.0078125, %v2380_v44  ;;  %v2439_v27 = vmul.f32 %v6782_v11, %v6782_v11  ;;  %v2440_v33 = vmul.f32 %v6785_v56, %v6785_v56  ;;  %v5250_v44 = vld [vmem:[%s5913_s15 + $0x8] ss:$16 sps:$4 sm:$0xff]  }
 0x86e   : > { %v6792_v52 = vsub.f32 %v6721_v42, %v2409_v53  ;;  %2456 = vadd.xlane.f32.xlu1 %v2439_v27  ;;  %2458 = vadd.xlane.f32.xlu0 %v2440_v33  ;;  %v5252_v53 = vld [vmem:[%s5913_s15 + $0xc] ss:$16 sps:$4 sm:$0xff]  }
 0x870   : > { %v2382_v5 = vpop.xlane.xlu0 %2381  ;;  %v2441_v46 = vmul.f32 %v6792_v52, %v6792_v52 }
 0x871   : > { %v2410_v51 = vmul.f32 0.0078125, %v2382_v5 }
 0x872   : > { %2460 = vadd.xlane.f32.xlu1 %v2441_v46 }
 0x873   : > { %v6797_v60 = vsub.f32 %v6725_v32, %v2410_v51 }
 0x874   : > { %v2384_v2 = vpop.xlane.xlu1 %2383  ;;  %v2386_v6 = vpop.xlane.xlu0 %2385 }
 0x875   : > { %v2411_v0 = vmul.f32 0.0078125, %v2384_v2  ;;  %v2412_v3 = vmul.f32 0.0078125, %v2386_v6  ;;  %v2442_v42 = vmul.f32 %v6797_v60, %v6797_v60 }
 0x877   : > { %v6806_v17 = vsub.f32 %v6732_v13, %v2411_v0  ;;  %v6809_v32 = vsub.f32 %v6729_v18, %v2412_v3  ;;  %2462 = vadd.xlane.f32.xlu0 %v2442_v42  ;;  %v5219_v13 = vld [vmem:[%s5913_s15 + $0xa4] ss:$16 sps:$4 sm:$0xff]   ;;  %v5222_v18 = vld [vmem:[%s5913_s15 + $0xac] ss:$16 sps:$4 sm:$0xff]  }
 0x878   : > { %v2388_v36 = vpop.xlane.xlu1 %2387  ;;  %2819 = vmatprep.subr.bf16.mxu0 %v5219_v13  ;;  %2932 = vmatprep.subr.bf16.mxu1 %v5222_v18 }
 0x879   : > { %v2413_v30 = vmul.f32 0.0078125, %v2388_v36  ;;  %v2443_v63 = vmul.f32 %v6806_v17, %v6806_v17  ;;  %v2444_v37 = vmul.f32 %v6809_v32, %v6809_v32  ;;  %2820 = vmatpush1.bf16.msra.mxu0 %v5217_v28  ;;  %2933 = vmatpush1.bf16.msra.mxu1 %v5220_v16 }
 0x87a   : > { %2821 = vmatprep.subr.bf16.mxu0 %v5225_v57  ;;  %2934 = vmatprep.subr.bf16.mxu1 %v5228_v25 }
 0x87b   : > { %v6820_v31 = vsub.f32 %v6737_v38, %v2413_v30  ;;  %2464 = vadd.xlane.f32.xlu1 %v2443_v63  ;;  %2466 = vadd.xlane.f32.xlu0 %v2444_v37  ;;  %v5226_v38 = vld [vmem:[%s5913_s15 + $0x88] ss:$16 sps:$4 sm:$0xff]   ;;  %s4123_s15 = sadd.s32 (!%p4534_p11), 2, %s7628_s10 }
 0x87c   : > { %s4124_s29 = sld [smem:[#allocation4 + %s4123_s15]] (!%p4534_p11) }
 0x87d   : > { %v2445_v49 = vmul.f32 %v6820_v31, %v6820_v31  ;;  %2822 = vmatpush1.bf16.msra.mxu0 %v5223_v34  ;;  %2935 = vmatpush1.bf16.msra.mxu1 %v5226_v38 }
 0x87e   : > { %2823 = vmatprep.subr.bf16.mxu0 %v5231_v20  ;;  %2936 = vmatprep.subr.bf16.mxu1 %v5234_v1 }
 0x87f   : > { %2468 = vadd.xlane.f32.xlu1 %v2445_v49 }
 0x881   : > { %2824 = vmatpush1.bf16.msra.mxu0 %v5229_v58  ;;  %2937 = vmatpush1.bf16.msra.mxu1 %v5232_v12 }
 0x882   : > { %2825 = vmatprep.subr.bf16.mxu0 %v5237_v26  ;;  %2938 = vmatprep.subr.bf16.mxu1 %v5240_v47 }
 0x885   : > { %2826 = vmatpush1.bf16.msra.mxu0 %v5235_v35  ;;  %2939 = vmatpush1.bf16.msra.mxu1 %v5238_v4 }
 0x886   : > { %2827 = vmatprep.subr.bf16.mxu0 %v5243_v43  ;;  %2940 = vmatprep.subr.bf16.mxu1 %v5246_v22 }
 0x889   : > { %2828 = vmatpush1.bf16.msra.mxu0 %v5241_v39  ;;  %2941 = vmatpush1.bf16.msra.mxu1 %v5244_v55 }
 0x88a   : > { %2829 = vmatprep.subr.bf16.mxu0 %v5249_v21  ;;  %2942 = vmatprep.subr.bf16.mxu1 %v5252_v53 }
 0x88d   : > { %2830 = vmatpush1.bf16.msra.mxu0 %v5247_v54  ;;  %2943 = vmatpush1.bf16.msra.mxu1 %v5250_v44 }
 0x8a5   : > { %v2390_v27 = vpop.xlane.xlu0 %2389 }
 0x8a6   : > { %v2414_v33 = vmul.f32 0.0078125, %v2390_v27 }
 0x8a8   : > { %v6845_v5 = vsub.f32 %v6741_v40, %v2414_v33 }
 0x8a9   : > { %v2392_v46 = vpop.xlane.xlu1 %2391  ;;  %v2394_v51 = vpop.xlane.xlu0 %2393 }
 0x8aa   : > { %v2415_v2 = vmul.f32 0.0078125, %v2392_v46  ;;  %v2416_v6 = vmul.f32 0.0078125, %v2394_v51  ;;  %v2446_v0 = vmul.f32 %v6845_v5, %v6845_v5  ;;  %v6886_v51 = vld [vmem:[%s5923_s27 + $0x4] ss:$0 sm:$0xff] }
 0x8ac   : > { %v6850_v3 = vsub.f32 %v6748_v41, %v2415_v2  ;;  %v6853_v42 = vsub.f32 %v6745_v24, %v2416_v6  ;;  %2470 = vadd.xlane.f32.xlu0 %v2446_v0 }
 0x8ad   : > { %v2396_v59 = vpop.xlane.xlu1 %2395  ;;  %v2398_v29 = vpop.xlane.xlu0 %2397 }
 0x8ae   : > { %v2417_v15 = vmul.f32 0.0078125, %v2396_v59  ;;  %v2418_v48 = vmul.f32 0.0078125, %v2398_v29  ;;  %v2447_v40 = vmul.f32 %v6850_v3, %v6850_v3  ;;  %v2448_v36 = vmul.f32 %v6853_v42, %v6853_v42 }
 0x8b0   : > { %v6860_v30 = vsub.f32 %v6753_v7, %v2417_v15  ;;  %v6863_v41 = vsub.f32 %v6756_v61, %v2418_v48  ;;  %2472 = vadd.xlane.f32.xlu1 %v2447_v40  ;;  %2474 = vadd.xlane.f32.xlu0 %v2448_v36  ;;  %v6891_v36 = vld [vmem:[%s5923_s27 + $0x5] ss:$0 sm:$0xff] }
 0x8b1   : > { %v2400_v24 = vpop.xlane.xlu1 %2399  ;;  %v2402_v63 = vpop.xlane.xlu0 %2401 }
 0x8b2   : > { %v2419_v37 = vmul.f32 0.0078125, %v2400_v24  ;;  %v2420_v13 = vmul.f32 0.0078125, %v2402_v63  ;;  %v2449_v18 = vmul.f32 %v6860_v30, %v6860_v30  ;;  %v2450_v28 = vmul.f32 %v6863_v41, %v6863_v41 }
 0x8b4   : > { %v6870_v16 = vsub.f32 %v6764_v19, %v2419_v37  ;;  %v6873_v7 = vsub.f32 %v6761_v14, %v2420_v13  ;;  %2476 = vadd.xlane.f32.xlu1 %v2449_v18  ;;  %2478 = vadd.xlane.f32.xlu0 %v2450_v28 }
 0x8b5   : > { %v2404_v61 = vpop.xlane.xlu1 %2403 }
 0x8b6   : > { %v2421_v49 = vmul.f32 0.0078125, %v2404_v61  ;;  %v2451_v57 = vmul.f32 %v6870_v16, %v6870_v16  ;;  %v2452_v25 = vmul.f32 %v6873_v7, %v6873_v7 }
 0x8b8   : > { %v6880_v34 = vsub.f32 %v6769_v45, %v2421_v49  ;;  %2480 = vadd.xlane.f32.xlu1 %v2451_v57  ;;  %2482 = vadd.xlane.f32.xlu0 %v2452_v25 }
 0x8ba   : > { %v2453_v19 = vmul.f32 %v6880_v34, %v6880_v34 }
 0x8bc   : > { %2484 = vadd.xlane.f32.xlu1 %v2453_v19 }
 0x8f3   : > { %v2455_v14 = vpop.xlane.xlu0 %2454 }
 0x8f4   : > { %v2486_v38 = vmul.f32 0.0078125, %v2455_v14 }
 0x8f6   : > { %v2502_v20 = vadd.f32 1e-12, %v2486_v38 }
 0x8f7   : > { %v2457_v1 = vpop.xlane.xlu1 %2456  ;;  %v2459_v58 = vpop.xlane.xlu0 %2458 }
 0x8f8   : > { %5413 = vrsqrt.f32 %v2502_v20  ;;  %v2487_v12 = vmul.f32 0.0078125, %v2457_v1  ;;  %v2488_v26 = vmul.f32 0.0078125, %v2459_v58 }
 0x8fa   : > { %v2503_v47 = vadd.f32 1e-12, %v2487_v12  ;;  %v2504_v35 = vadd.f32 1e-12, %v2488_v26 }
 0x8fb   : > { %v2461_v4 = vpop.xlane.xlu1 %2460 }
 0x8fc   : > { %5415 = vrsqrt.f32 %v2503_v47  ;;  %v2489_v45 = vmul.f32 0.0078125, %v2461_v4 }
 0x8fd   : > { %5417 = vrsqrt.f32 %v2504_v35 }
 0x8fe   : > { %v2505_v43 = vadd.f32 1e-12, %v2489_v45 }
 0x900   : > { %5419 = vrsqrt.f32 %v2505_v43  ;;  %v2463_v22 = vpop.xlane.xlu0 %2462 }
 0x901   : > { %v2490_v39 = vmul.f32 0.0078125, %v2463_v22 }
 0x903   : > { %v2506_v55 = vadd.f32 1e-12, %v2490_v39 }
 0x904   : > { %v2465_v54 = vpop.xlane.xlu1 %2464  ;;  %v2467_v21 = vpop.xlane.xlu0 %2466 }
 0x905   : > { %v5414_v44 = vpop.eup %5413  ;;  %v2491_v53 = vmul.f32 0.0078125, %v2465_v54  ;;  %v2492_v27 = vmul.f32 0.0078125, %v2467_v21  ;;  %5421 = vrsqrt.f32 %v2506_v55 }
 0x906   : > { %v2534_v33 = vmul.f32 %v5414_v44, %v6777_v50 }
 0x907   : > { %v2507_v46 = vadd.f32 1e-12, %v2491_v53  ;;  %v2508_v2 = vadd.f32 1e-12, %v2492_v27 }
 0x908   : > { %v2469_v6 = vpop.xlane.xlu1 %2468  ;;  %v2556_v15 = vmul.f32 %v6886_v51, %v2534_v33 }
 0x909   : > { %v5416_v0 = vpop.eup %5415  ;;  %5423 = vrsqrt.f32 %v2507_v46  ;;  %v2493_v59 = vmul.f32 0.0078125, %v2469_v6 }
 0x90a   : > { %v2535_v29 = vmul.f32 %v5416_v0, %v6782_v11  ;;  %v5418_v48 = vpop.eup %5417  ;;  %5425 = vrsqrt.f32 %v2508_v2  ;;  %v6895_v63 = vadd.f32 %v6891_v36, %v2556_v15 }
 0x90b   : > { %v2509_v40 = vadd.f32 1e-12, %v2493_v59  ;;  %v2536_v13 = vmul.f32 %v5418_v48, %v6785_v56 }
 0x90c   : > { %v2557_v50 = vmul.f32 %v6886_v51, %v2535_v29 }
 0x90d   : > { %v5420_v24 = vpop.eup %5419  ;;  %5427 = vrsqrt.f32 %v2509_v40  ;;  %v2558_v61 = vmul.f32 %v6886_v51, %v2536_v13 }
 0x90e   : > { %v6898_v37 = vadd.f32 %v6891_v36, %v2557_v50  ;;  %v2537_v11 = vmul.f32 %v5420_v24, %v6792_v52 }
 0x90f   : > { %v6912_v52 = vadd.f32 %v6891_v36, %v2558_v61 }
 0x910   : > { %v2594_v18 = vpack.c.bf16 %v6898_v37, %v6895_v63  ;;  %v2559_v28 = vmul.f32 %v6886_v51, %v2537_v11 }
 0x912   : > { %2848 = vmatmul.mubr.bf16.vlgmr.msra.gmra.mxu0 %v2594_v18  ;;  %2961 = vmatmul.mubr.bf16.vlgmr.msra.gmra.mxu1 %v2594_v18  ;;  %v5422_v49 = vpop.eup %5421  ;;  %v6909_v57 = vadd.f32 %v6891_v36, %v2559_v28 }
 0x913   : > { %2857 = vmatprep.mubr.bf16.mxu0 %v5743_v23  ;;  %2970 = vmatprep.mubr.bf16.mxu1 %v5743_v23  ;;  %v2538_v25 = vmul.f32 %v5422_v49, %v6797_v60 }
 0x914   : > { %v2595_v14 = vpack.c.bf16 %v6909_v57, %v6912_v52 }
 0x915   : > { %v2560_v58 = vmul.f32 %v6886_v51, %v2538_v25 }
 0x916   : > { %v5424_v56 = vpop.eup %5423 }
 0x917   : > { %v2539_v19 = vmul.f32 %v5424_v56, %v6806_v17  ;;  %v5426_v38 = vpop.eup %5425  ;;  %v6927_v17 = vadd.f32 %v6891_v36, %v2560_v58 }
 0x918   : > { %v2540_v26 = vmul.f32 %v5426_v38, %v6809_v32 }
 0x919   : > { %v2561_v20 = vmul.f32 %v6886_v51, %v2539_v19 }
 0x91a   : > { %v5428_v1 = vpop.eup %5427  ;;  %2858 = vmatmul.mubr.bf16.gmra.mxu0 %v2595_v14  ;;  %2971 = vmatmul.mubr.bf16.gmra.mxu1 %v2595_v14  ;;  %v2562_v4 = vmul.f32 %v6886_v51, %v2540_v26 }
 0x91b   : > { %2867 = vmatprep.mubr.bf16.mxu0 %v5743_v23  ;;  %2980 = vmatprep.mubr.bf16.mxu1 %v5743_v23  ;;  %v6923_v12 = vadd.f32 %v6891_v36, %v2561_v20  ;;  %v2541_v60 = vmul.f32 %v5428_v1, %v6820_v31 }
 0x91c   : > { %v6940_v45 = vadd.f32 %v6891_v36, %v2562_v4  ;;  %v5256_v4 = vld [vmem:[%s5918_s16 + $0xb8] sm:$0xff]  }
 0x91d   : > { %v2596_v47 = vpack.c.bf16 %v6923_v12, %v6927_v17  ;;  %v2563_v35 = vmul.f32 %v6886_v51, %v2541_v60  ;;  %v5254_v60 = vld [vmem:[%s5918_s16 + $0xf8] sm:$0xff]  }
 0x91e   : > { %4713 = vmatprep.subr.bf16.mxu1 %v5254_v60  ;;  %v5280_v60 = vld [vmem:[%s5918_s16 + $0x88] sm:$0xff]  }
 0x91f   : > { %v6937_v31 = vadd.f32 %v6891_v36, %v2563_v35  ;;  %v5255_v35 = vld [vmem:[%s5918_s16 + $0x38] sm:$0xff]   ;;  %4714 = vmatpush3.bf16.msra.mxu1 %v5256_v4  ;;  %v5284_v4 = vld [vmem:[%s5918_s16 + $0x80] sm:$0xff]  }
 0x921   : > { %7789 = vst [vmem:[#allocation21_spill] sm:$0xff] %v6937_v31  ;;  %v2597_v32 = vpack.c.bf16 %v6937_v31, %v6940_v45 }
 0x922   : > { %2868 = vmatmul.mubr.bf16.gmra.mxu0 %v2596_v47  ;;  %2981 = vmatmul.mubr.bf16.gmra.mxu1 %v2596_v47 }
 0x923   : > { %2877 = vmatprep.mubr.bf16.mxu0 %v5743_v23  ;;  %2990 = vmatprep.mubr.bf16.mxu1 %v5743_v23 }
 0x92a   : > { %2878 = vmatmul.mubr.bf16.gmra.mxu0 %v2597_v32  ;;  %2991 = vmatmul.mubr.bf16.gmra.mxu1 %v2597_v32 }
 0x92b   : > { %2887 = vmatprep.mubr.bf16.mxu0 %v5743_v23  ;;  %3000 = vmatprep.mubr.bf16.mxu1 %v5743_v23 }
 0x935   : > { %v2471_v43 = vpop.xlane.xlu0 %2470 }
 0x936   : > { %v2494_v22 = vmul.f32 0.0078125, %v2471_v43 }
 0x938   : > { %v2510_v39 = vadd.f32 1e-12, %v2494_v22 }
 0x939   : > { %v2473_v55 = vpop.xlane.xlu1 %2472  ;;  %v2475_v54 = vpop.xlane.xlu0 %2474 }
 0x93a   : > { %5429 = vrsqrt.f32 %v2510_v39  ;;  %v2495_v21 = vmul.f32 0.0078125, %v2473_v55  ;;  %v2496_v44 = vmul.f32 0.0078125, %v2475_v54  ;;  %v5257_v39 = vld [vmem:[%s5918_s16 + $0x70] sm:$0xff]  }
 0x93b   : > { %v5258_v55 = vld [vmem:[%s5918_s16 + $0xf0] sm:$0xff]  }
 0x93c   : > { %v2511_v53 = vadd.f32 1e-12, %v2495_v21  ;;  %v2512_v27 = vadd.f32 1e-12, %v2496_v44  ;;  %v5259_v54 = vld [vmem:[%s5918_s16 + $0x30] sm:$0xff]   ;;  %4715 = vmatprep.subr.bf16.mxu1 %v5258_v55 }
 0x93d   : > { %v2477_v33 = vpop.xlane.xlu1 %2476  ;;  %v2479_v46 = vpop.xlane.xlu0 %2478  ;;  %v5260_v21 = vld [vmem:[%s5918_s16 + $0xb0] sm:$0xff]  }
 0x93e   : > { %5431 = vrsqrt.f32 %v2511_v53  ;;  %v2497_v2 = vmul.f32 0.0078125, %v2477_v33  ;;  %v2498_v0 = vmul.f32 0.0078125, %v2479_v46  ;;  %4716 = vmatpush3.bf16.msra.mxu1 %v5260_v21  ;;  %v5261_v33 = vld [vmem:[%s5918_s16 + $0x68] sm:$0xff]  }
 0x93f   : > { %5433 = vrsqrt.f32 %v2512_v27  ;;  %v5262_v46 = vld [vmem:[%s5918_s16 + $0xe8] sm:$0xff]  }
 0x940   : > { %v2513_v6 = vadd.f32 1e-12, %v2497_v2  ;;  %v2514_v15 = vadd.f32 1e-12, %v2498_v0  ;;  %v5264_v0 = vld [vmem:[%s5918_s16 + $0xa8] sm:$0xff]   ;;  %4717 = vmatprep.subr.bf16.mxu1 %v5262_v46 }
 0x941   : > { %v2481_v59 = vpop.xlane.xlu1 %2480  ;;  %v2483_v40 = vpop.xlane.xlu0 %2482 }
 0x942   : > { %5435 = vrsqrt.f32 %v2513_v6  ;;  %v2499_v29 = vmul.f32 0.0078125, %v2481_v59  ;;  %v2500_v11 = vmul.f32 0.0078125, %v2483_v40  ;;  %v5263_v6 = vld [vmem:[%s5918_s16 + $0x28] sm:$0xff]   ;;  %v5266_v40 = vld [vmem:[%s5918_s16 + $0xe0] sm:$0xff]   ;;  %4718 = vmatpush3.bf16.msra.mxu1 %v5264_v0 }
 0x943   : > { %4719 = vmatprep.subr.bf16.mxu1 %v5266_v40 }
 0x944   : > { %v2515_v48 = vadd.f32 1e-12, %v2499_v29  ;;  %v2516_v49 = vadd.f32 1e-12, %v2500_v11 }
 0x945   : > { %v2485_v50 = vpop.xlane.xlu1 %2484 }
 0x946   : > { %5437 = vrsqrt.f32 %v2515_v48  ;;  %v2501_v24 = vmul.f32 0.0078125, %v2485_v50  ;;  %v5265_v48 = vld [vmem:[%s5918_s16 + $0x60] sm:$0xff]  }
 0x947   : > { %v5430_v13 = vpop.eup %5429  ;;  %5439 = vrsqrt.f32 %v2514_v15  ;;  %v5267_v50 = vld [vmem:[%s5918_s16 + $0x20] sm:$0xff]  }
 0x948   : > { %v2542_v18 = vmul.f32 %v5430_v13, %v6845_v5  ;;  %v2517_v28 = vadd.f32 1e-12, %v2501_v24  ;;  %v5268_v24 = vld [vmem:[%s5918_s16 + $0xa0] sm:$0xff]  }
 0x949   : > { %4720 = vmatpush3.bf16.msra.mxu1 %v5268_v24 }
 0x94a   : > { %v2564_v25 = vmul.f32 %v6886_v51, %v2542_v18  ;;  %5441 = vrsqrt.f32 %v2517_v28  ;;  %v5269_v28 = vld [vmem:[%s5918_s16 + $0x58] sm:$0xff]  }
 0x94b   : > { %v5432_v61 = vpop.eup %5431  ;;  %5443 = vrsqrt.f32 %v2516_v49 }
 0x94c   : > { %v2543_v56 = vmul.f32 %v5432_v61, %v6850_v3  ;;  %v5434_v19 = vpop.eup %5433  ;;  %v6951_v20 = vadd.f32 %v6891_v36, %v2564_v25  ;;  %v5253_v3 = vld [vmem:[%s5918_s16 + $0x78] sm:$0xff]  }
 0x94d   : > { %v2544_v1 = vmul.f32 %v5434_v19, %v6853_v42  ;;  %4649 = vmatprep.subr.bf16.mxu0 %v5253_v3  ;;  %v5270_v61 = vld [vmem:[%s5918_s16 + $0xd8] sm:$0xff]   ;;  %v5279_v3 = vld [vmem:[%s5918_s16 + $0x8] sm:$0xff]  }
 0x94e   : > { %v2565_v14 = vmul.f32 %v6886_v51, %v2543_v56  ;;  %7790 = vst [vmem:[#allocation22_spill] sm:$0xff] %v6951_v20  ;;  %4650 = vmatpush3.bf16.msra.mxu0 %v5255_v35  ;;  %v5271_v56 = vld [vmem:[%s5918_s16 + $0x18] sm:$0xff]   ;;  %4721 = vmatprep.subr.bf16.mxu1 %v5270_v61  ;;  %v5283_v35 = vld [vmem:[%s5918_s16] sm:$0xff]  }
 0x94f   : > { %v5436_v38 = vpop.eup %5435  ;;  %v2566_v42 = vmul.f32 %v6886_v51, %v2544_v1  ;;  %4651 = vmatprep.subr.bf16.mxu0 %v5257_v39  ;;  %v5276_v1 = vld [vmem:[%s5918_s16 + $0x90] sm:$0xff]   ;;  %v2649_v39 = vsub.s32 3, %v6118_v8 }
 0x950   : > { %v6954_v5 = vadd.f32 %v6891_v36, %v2565_v14  ;;  %v2545_v58 = vmul.f32 %v5436_v38, %v6860_v30  ;;  %v5274_v14 = vld [vmem:[%s5918_s16 + $0xd0] sm:$0xff]  }
 0x951   : > { %v6977_v44 = vadd.f32 %v6891_v36, %v2566_v42  ;;  %v5275_v38 = vld [vmem:[%s5918_s16 + $0x10] sm:$0xff]  }
 0x952   : > { %7791 = vst [vmem:[#allocation23_spill] sm:$0xff] %v6954_v5  ;;  %v2598_v26 = vpack.c.bf16 %v6954_v5, %v6951_v20  ;;  %v2567_v47 = vmul.f32 %v6886_v51, %v2545_v58  ;;  %4652 = vmatpush3.bf16.msra.mxu0 %v5259_v54  ;;  %v5277_v58 = vld [vmem:[%s5918_s16 + $0x48] sm:$0xff]  }
 0x953   : > { %v5438_v32 = vpop.eup %5437  ;;  %7793 = vst [vmem:[#allocation25_spill] sm:$0xff] %v6977_v44  ;;  %4653 = vmatprep.subr.bf16.mxu0 %v5261_v33 }
 0x954   : > { %2888 = vmatmul.mubr.bf16.gmra.mxu0 %v2598_v26  ;;  %3001 = vmatmul.mubr.bf16.gmra.mxu1 %v2598_v26  ;;  %v5440_v30 = vpop.eup %5439  ;;  %v6969_v43 = vadd.f32 %v6891_v36, %v2567_v47  ;;  %v2547_v22 = vmul.f32 %v5438_v32, %v6870_v16  ;;  %v5281_v26 = vld [vmem:[%s5918_s16 + $0x40] sm:$0xff]  }
 0x955   : > { %2897 = vmatprep.mubr.bf16.mxu0 %v5743_v23  ;;  %3010 = vmatprep.mubr.bf16.mxu1 %v5743_v23  ;;  %v2546_v53 = vmul.f32 %v5440_v30, %v6863_v41  ;;  %v5282_v47 = vld [vmem:[%s5918_s16 + $0xc0] sm:$0xff]  }
 0x956   : > { %7792 = vst [vmem:[#allocation24_spill] sm:$0xff] %v6969_v43  ;;  %v2599_v27 = vpack.c.bf16 %v6969_v43, %v6977_v44  ;;  %v2569_v16 = vmul.f32 %v6886_v51, %v2547_v22  ;;  %4654 = vmatpush3.bf16.msra.mxu0 %v5263_v6  ;;  %v716_v32 = vld [vmem:[%s5923_s27 + $0x6] sm:$0xf] }
 0x957   : > { %v5442_v2 = vpop.eup %5441  ;;  %v2568_v41 = vmul.f32 %v6886_v51, %v2546_v53  ;;  %4655 = vmatprep.subr.bf16.mxu0 %v5265_v48  ;;  %v7035_v42 = vrot.slane %v716_v32, %v763_v10  ;;  %v7040_v55 = vrot.slane %v716_v32, %v771_v62  ;;  %v7044_v53 = vrot.slane %v716_v32, %v767_v9 }
 0x958   : > { %v5444_v59 = vpop.eup %5443  ;;  %v6991_v29 = vadd.f32 %v6891_v36, %v2569_v16  ;;  %v2549_v15 = vmul.f32 %v5442_v2, %v6880_v34  ;;  %v7047_v16 = vrot.slane %v716_v32, %v2649_v39 }
 0x959   : > { %v6999_v13 = vadd.f32 %v6891_v36, %v2568_v41  ;;  %v2548_v11 = vmul.f32 %v5444_v59, %v6873_v7  ;;  %v5272_v7 = vld [vmem:[%s5918_s16 + $0x98] sm:$0xff]  }
 0x95a   : > { %7794 = vst [vmem:[#allocation26_spill] sm:$0xff] %v6991_v29  ;;  %v2571_v18 = vmul.f32 %v6886_v51, %v2549_v15  ;;  %4656 = vmatpush3.bf16.msra.mxu0 %v5267_v50  ;;  %4722 = vmatpush3.bf16.msra.mxu1 %v5272_v7 }
 0x95b   : > { %7795 = vst [vmem:[#allocation27_spill] sm:$0xff] %v6999_v13  ;;  %v2600_v34 = vpack.c.bf16 %v6991_v29, %v6999_v13  ;;  %v2570_v49 = vmul.f32 %v6886_v51, %v2548_v11  ;;  %4657 = vmatprep.subr.bf16.mxu0 %v5269_v28  ;;  %4723 = vmatprep.subr.bf16.mxu1 %v5274_v14 }
 0x95c   : > { %2898 = vmatmul.mubr.bf16.gmra.mxu0 %v2599_v27  ;;  %3011 = vmatmul.mubr.bf16.gmra.mxu1 %v2599_v27  ;;  %v7013_v25 = vadd.f32 %v6891_v36, %v2571_v18 }
 0x95d   : > { %2907 = vmatprep.mubr.bf16.mxu0 %v5743_v23  ;;  %3020 = vmatprep.mubr.bf16.mxu1 %v5743_v23  ;;  %v7016_v51 = vadd.f32 %v6891_v36, %v2570_v49  ;;  %v5278_v36 = vld [vmem:[%s5918_s16 + $0xc8] sm:$0xff]  }
 0x95e   : > { %7796 = vst [vmem:[#allocation28_spill] sm:$0xff] %v7013_v25  ;;  %4658 = vmatpush3.bf16.msra.mxu0 %v5271_v56  ;;  %4724 = vmatpush3.bf16.msra.mxu1 %v5276_v1 }
 0x95f   : > { %7797 = vst [vmem:[#allocation29_spill] sm:$0xff] %v7016_v51  ;;  %v2601_v19 = vpack.c.bf16 %v7013_v25, %v7016_v51  ;;  %4725 = vmatprep.subr.bf16.mxu1 %v5278_v36 }
 0x962   : > { %4726 = vmatpush3.bf16.msra.mxu1 %v5280_v60 }
 0x963   : > { %4727 = vmatprep.subr.bf16.mxu1 %v5282_v47 }
 0x964   : > { %2908 = vmatmul.mubr.bf16.gmra.mxu0 %v2600_v34  ;;  %3021 = vmatmul.mubr.bf16.gmra.mxu1 %v2600_v34 }
 0x965   : > { %2917 = vmatprep.mubr.bf16.mxu0 %v5743_v23  ;;  %3030 = vmatprep.mubr.bf16.mxu1 %v5743_v23  ;;  %v5273_v23 = vld [vmem:[%s5918_s16 + $0x50] sm:$0xff]   ;;  %s7640_s16 = sld [smem:[#allocation4 + %s4133_s0]] (!%p4534_p11) }
 0x966   : > { %4659 = vmatprep.subr.bf16.mxu0 %v5273_v23  ;;  %4728 = vmatpush3.bf16.msra.mxu1 %v5284_v4 }
 0x967   : > { %4660 = vmatpush3.bf16.msra.mxu0 %v5275_v38 }
 0x968   : > { %4661 = vmatprep.subr.bf16.mxu0 %v5277_v58 }
 0x96b   : > { %4662 = vmatpush3.bf16.msra.mxu0 %v5279_v3 }
 0x96c   : > { %2918 = vmatmul.mubr.bf16.gmra.mxu0 %v2601_v19  ;;  %3031 = vmatmul.mubr.bf16.gmra.mxu1 %v2601_v19 }
 0x96d   : > { %4663 = vmatprep.subr.bf16.mxu0 %v5281_v26 }
 0x96f   : > { %4664 = vmatpush3.bf16.msra.mxu0 %v5283_v35 }
 0x9d2   : > { %v2849_v30 = vpop.f32.mrf.mxu0  ;;  %v2962_v22 = vpop.f32.mrf.mxu1 }
 0x9d3   : > { %v2850_v27 = vadd.f32 %v2849_v30, %v7035_v42  ;;  %v2963_v46 = vadd.f32 %v2962_v22, %v7040_v55 }
 0x9d4   : > { %v2851_v54 = vpop.f32.mrf.mxu0  ;;  %v2964_v21 = vpop.f32.mrf.mxu1 }
 0x9d5   : > { %v2852_v62 = vadd.f32 %v2851_v54, %v7044_v53  ;;  %v3105_v59 = vmul.f32 0.70710677, %v2850_v27  ;;  %v2965_v41 = vadd.f32 %v2964_v21, %v7047_v16  ;;  %v3107_v48 = vmul.f32 0.70710677, %v2963_v46 }
 0x9d6   : > { %v2853_v10 = vpop.f32.mrf.mxu0  ;;  %v2966_v33 = vpop.f32.mrf.mxu1  ;;  %v7064_v47 = vmul.f32 0.5, %v2850_v27  ;;  %v7067_v30 = vmul.f32 0.5, %v2963_v46 }
 0x9d7   : > { %v2854_v2 = vadd.f32 %v2853_v10, %v7035_v42  ;;  %v2967_v50 = vadd.f32 %v2966_v33, %v7040_v55  ;;  %v3106_v34 = vmul.f32 0.70710677, %v2852_v62  ;;  %5445 = verf.f32 %v3105_v59 }
 0x9d8   : > { %v2855_v6 = vpop.f32.mrf.mxu0  ;;  %v2968_v0 = vpop.f32.mrf.mxu1  ;;  %v3108_v18 = vmul.f32 0.70710677, %v2965_v41  ;;  %5447 = verf.f32 %v3107_v48  ;;  %v7069_v22 = vmul.f32 0.5, %v2852_v62  ;;  %v7075_v33 = vmul.f32 0.5, %v2965_v41 }
 0x9d9   : > { %v3109_v40 = vmul.f32 0.70710677, %v2854_v2  ;;  %v2856_v28 = vadd.f32 %v2855_v6, %v7044_v53  ;;  %v2969_v56 = vadd.f32 %v2968_v0, %v7047_v16  ;;  %v3111_v7 = vmul.f32 0.70710677, %v2967_v50 }
 0x9da   : > { %v2859_v15 = vpop.f32.mrf.mxu0  ;;  %v2972_v9 = vpop.f32.mrf.mxu1  ;;  %v3045_v62 = vmul.f32 0.5, %v2854_v2  ;;  %v7081_v48 = vmul.f32 0.5, %v2967_v50 }
 0x9db   : > { %5449 = verf.f32 %v3109_v40  ;;  %v3110_v14 = vmul.f32 0.70710677, %v2856_v28  ;;  %v3112_v36 = vmul.f32 0.70710677, %v2969_v56  ;;  %v2860_v35 = vadd.f32 %v2859_v15, %v7035_v42 }
 0x9dc   : > { %v2861_v24 = vpop.f32.mrf.mxu0  ;;  %v2974_v11 = vpop.f32.mrf.mxu1  ;;  %5451 = verf.f32 %v3106_v34  ;;  %v2973_v39 = vadd.f32 %v2972_v9, %v7040_v55  ;;  %v7086_v41 = vmul.f32 0.5, %v2856_v28 }
 0x9dd   : > { %5453 = verf.f32 %v3108_v18  ;;  %v2862_v38 = vadd.f32 %v2861_v24, %v7044_v53  ;;  %v2975_v3 = vadd.f32 %v2974_v11, %v7047_v16  ;;  %v3113_v15 = vmul.f32 0.70710677, %v2860_v35 }
 0x9de   : > { %v2863_v61 = vpop.f32.mrf.mxu0  ;;  %v2976_v49 = vpop.f32.mrf.mxu1  ;;  %5455 = verf.f32 %v3111_v7  ;;  %v3115_v40 = vmul.f32 0.70710677, %v2973_v39  ;;  %v7091_v18 = vmul.f32 0.5, %v2969_v56  ;;  %v7098_v28 = vmul.f32 0.5, %v2973_v39 }
 0x9df   : > { %5457 = verf.f32 %v3110_v14  ;;  %v3114_v21 = vmul.f32 0.70710677, %v2862_v38  ;;  %v2864_v10 = vadd.f32 %v2863_v61, %v7035_v42  ;;  %v3116_v6 = vmul.f32 0.70710677, %v2975_v3 }
 0x9e0   : > { %v2865_v19 = vpop.f32.mrf.mxu0  ;;  %v2978_v23 = vpop.f32.mrf.mxu1  ;;  %5459 = verf.f32 %v3112_v36  ;;  %v2977_v0 = vadd.f32 %v2976_v49, %v7040_v55  ;;  %v7101_v36 = vmul.f32 0.5, %v2862_v38  ;;  %v7103_v56 = vmul.f32 0.5, %v2975_v3 }
 0x9e1   : > { %v7059_v60 = vadd.f32 %v2865_v19, %v7044_v53  ;;  %v7062_v26 = vadd.f32 %v2978_v23, %v7047_v16  ;;  %v3117_v11 = vmul.f32 0.70710677, %v2864_v10  ;;  %v7096_v23 = vmul.f32 0.5, %v2860_v35 }
 0x9e2   : > { %v2869_v1 = vpop.f32.mrf.mxu0  ;;  %v2982_v58 = vpop.f32.mrf.mxu1  ;;  %v3119_v61 = vmul.f32 0.70710677, %v2977_v0 }
 0x9e3   : > { %v3118_v54 = vmul.f32 0.70710677, %v7059_v60  ;;  %v3120_v27 = vmul.f32 0.70710677, %v7062_v26  ;;  %v7079_v9 = vadd.f32 %v2869_v1, %v7035_v42  ;;  %v7094_v50 = vadd.f32 %v2982_v58, %v7040_v55 }
 0x9e4   : > { %v2871_v4 = vpop.f32.mrf.mxu0  ;;  %v2984_v32 = vpop.f32.mrf.mxu1  ;;  %v3056_v25 = vmul.f32 0.5, %v7062_v26 }
 0x9e5   : > { %5461 = verf.f32 %v3118_v54  ;;  %v7084_v24 = vadd.f32 %v2871_v4, %v7044_v53  ;;  %v7089_v34 = vadd.f32 %v2984_v32, %v7047_v16  ;;  %v5446_v2 = vpop.eup %5445  ;;  %v3121_v14 = vmul.f32 0.70710677, %v7079_v9 }
 0x9e6   : > { %v2873_v46 = vpop.f32.mrf.mxu0  ;;  %v2986_v59 = vpop.f32.mrf.mxu1  ;;  %5463 = verf.f32 %v3120_v27  ;;  %v7106_v32 = vmul.f32 0.5, %v2864_v10  ;;  %v7108_v54 = vmul.f32 0.5, %v2977_v0  ;;  %v3123_v27 = vmul.f32 0.70710677, %v7094_v50 }
 0x9e7   : > { %5465 = verf.f32 %v3114_v21  ;;  %v5448_v19 = vpop.eup %5447  ;;  %v3122_v4 = vmul.f32 0.70710677, %v7084_v24  ;;  %v3124_v35 = vmul.f32 0.70710677, %v7089_v34  ;;  %v3233_v21 = vadd.f32 1.0, %v5446_v2 }
 0x9e8   : > { %5467 = verf.f32 %v3116_v6  ;;  %v2875_v49 = vpop.f32.mrf.mxu0  ;;  %v2988_v7 = vpop.f32.mrf.mxu1  ;;  %v7113_v38 = vadd.f32 %v2873_v46, %v7035_v42  ;;  %v7116_v10 = vadd.f32 %v2986_v59, %v7040_v55  ;;  %v3054_v46 = vmul.f32 0.5, %v7059_v60 }
 0x9e9   : > { %5469 = verf.f32 %v3113_v15  ;;  %v5450_v1 = vpop.eup %5449  ;;  %v7119_v0 = vadd.f32 %v2875_v49, %v7044_v53  ;;  %v7122_v2 = vadd.f32 %v2988_v7, %v7047_v16  ;;  %v7127_v59 = vmul.f32 %v3233_v21, %v7064_v47 }
 0x9ea   : > { %5471 = verf.f32 %v3115_v40  ;;  %v5452_v58 = vpop.eup %5451  ;;  %v2879_v3 = vpop.f32.mrf.mxu0  ;;  %v3237_v15 = vadd.f32 1.0, %v5450_v1  ;;  %v3125_v49 = vmul.f32 0.70710677, %v7113_v38  ;;  %v3127_v60 = vmul.f32 0.70710677, %v7116_v10 }
 0x9eb   : > { %5473 = verf.f32 %v3117_v11  ;;  %v5454_v39 = vpop.eup %5453  ;;  %v2992_v6 = vpop.f32.mrf.mxu1  ;;  %v3235_v11 = vadd.f32 1.0, %v5448_v19  ;;  %v3234_v8 = vadd.f32 1.0, %v5452_v58  ;;  %v3126_v19 = vmul.f32 0.70710677, %v7119_v0 }
 0x9ec   : > { %5475 = verf.f32 %v3119_v61  ;;  %v5456_v40 = vpop.eup %5455  ;;  %v3236_v61 = vadd.f32 1.0, %v5454_v39  ;;  %v2881_v1 = vpop.f32.mrf.mxu0  ;;  %v7131_v7 = vmul.f32 %v3237_v15, %v3045_v62  ;;  %v3128_v26 = vmul.f32 0.70710677, %v7122_v2 }
 0x9ed   : > { %5477 = verf.f32 %v3121_v14  ;;  %v5458_v14 = vpop.eup %5457  ;;  %v3239_v39 = vadd.f32 1.0, %v5456_v40  ;;  %v7136_v51 = vmul.f32 %v3235_v11, %v7067_v30  ;;  %v7139_v47 = vmul.f32 %v3234_v8, %v7069_v22 }
 0x9ee   : > { %5479 = verf.f32 %v3122_v4  ;;  %v2994_v4 = vpop.f32.mrf.mxu1  ;;  %v5460_v58 = vpop.eup %5459  ;;  %v7142_v21 = vadd.f32 %v2879_v3, %v7035_v42  ;;  %v3300_v62 = vmul.f32 %v3236_v61, %v7075_v33  ;;  %v3238_v15 = vadd.f32 1.0, %v5458_v14 }
 0x9ef   : > { %5481 = verf.f32 %v3124_v35  ;;  %v7146_v40 = vadd.f32 %v2992_v6, %v7040_v55  ;;  %v3240_v13 = vadd.f32 1.0, %v5460_v58  ;;  %v7149_v30 = vmul.f32 0.5, %v7084_v24  ;;  %v2883_v22 = vpop.f32.mrf.mxu0 }
 0x9f0   : > { %5483 = verf.f32 %v3123_v27  ;;  %v3129_v8 = vmul.f32 0.70710677, %v7142_v21  ;;  %v2996_v11 = vpop.f32.mrf.mxu1  ;;  %v3303_v33 = vmul.f32 %v3239_v39, %v7081_v48  ;;  %v7157_v24 = vadd.f32 %v2881_v1, %v7044_v53 }
 0x9f1   : > { %5485 = verf.f32 %v3126_v19  ;;  %v3361_v19 = vpack.c.bf16 %v7131_v7, %v7127_v59  ;;  %v3131_v6 = vmul.f32 0.70710677, %v7146_v40  ;;  %v3302_v43 = vmul.f32 %v3238_v15, %v7086_v41 }
 0x9f2   : > { %v5462_v35 = vpop.eup %5461  ;;  %5487 = verf.f32 %v3128_v26  ;;  %v7164_v59 = vadd.f32 %v2883_v22, %v7035_v42  ;;  %v7167_v48 = vadd.f32 %v2996_v11, %v7040_v55  ;;  %v3304_v39 = vmul.f32 %v3240_v13, %v7091_v18 }
 0x9f3   : > { %v5464_v27 = vpop.eup %5463  ;;  %5489 = verf.f32 %v3125_v49  ;;  %v3246_v14 = vadd.f32 1.0, %v5462_v35  ;;  %v7160_v49 = vadd.f32 %v2994_v4, %v7047_v16  ;;  %v3130_v1 = vmul.f32 0.70710677, %v7157_v24  ;;  %v2885_v35 = vpop.f32.mrf.mxu0 }
 0x9f4   : > { %v5466_v29 = vpop.eup %5465  ;;  %5491 = verf.f32 %v3127_v60  ;;  %v3248_v58 = vadd.f32 1.0, %v5464_v27  ;;  %v2998_v4 = vpop.f32.mrf.mxu1  ;;  %v3363_v5 = vpack.c.bf16 %v3303_v33, %v7136_v51  ;;  %v3133_v41 = vmul.f32 0.70710677, %v7164_v59 }
 0x9f5   : > { %v5468_v3 = vpop.eup %5467  ;;  %v3242_v44 = vadd.f32 1.0, %v5466_v29  ;;  %5493 = verf.f32 %v3129_v8  ;;  %v3132_v29 = vmul.f32 0.70710677, %v7160_v49  ;;  %v3310_v22 = vmul.f32 %v3246_v14, %v3054_v46 }
 0x9f6   : > { %v5470_v61 = vpop.eup %5469  ;;  %v3244_v60 = vadd.f32 1.0, %v5468_v3  ;;  %5495 = verf.f32 %v3131_v6  ;;  %v3312_v11 = vmul.f32 %v3248_v58, %v3056_v25  ;;  %v3135_v13 = vmul.f32 0.70710677, %v7167_v48 }
 0x9f7   : > { %v5472_v26 = vpop.eup %5471  ;;  %5497 = verf.f32 %v3130_v1  ;;  %v3306_v8 = vmul.f32 %v3242_v44, %v7101_v36  ;;  %v7177_v3 = vadd.f32 %v2885_v35, %v7044_v53  ;;  %v7180_v51 = vadd.f32 %v2998_v4, %v7047_v16 }
 0x9f8   : > { %v5474_v7 = vpop.eup %5473  ;;  %5499 = verf.f32 %v3132_v29  ;;  %v3308_v6 = vmul.f32 %v3244_v60, %v7103_v56  ;;  %v3362_v46 = vpack.c.bf16 %v3302_v43, %v7139_v47  ;;  %v3364_v25 = vpack.c.bf16 %v3304_v39, %v3300_v62 }
 0x9f9   : > { %v5476_v27 = vpop.eup %5475  ;;  %5501 = verf.f32 %v3133_v41  ;;  %v3245_v58 = vadd.f32 1.0, %v5474_v7  ;;  %v3134_v44 = vmul.f32 0.70710677, %v7177_v3  ;;  %v3136_v35 = vmul.f32 0.70710677, %v7180_v51 }
 0x9fa   : > { %v5478_v15 = vpop.eup %5477  ;;  %v3247_v1 = vadd.f32 1.0, %v5476_v27  ;;  %5503 = verf.f32 %v3135_v13  ;;  %3687 = vmatprep.mubr.bf16.mxu0 %v3362_v46  ;;  %3784 = vmatprep.mubr.bf16.mxu1 %v3364_v25  ;;  %v3366_v4 = vpack.c.bf16 %v3310_v22, %v3306_v8  ;;  %v3368_v29 = vpack.c.bf16 %v3312_v11, %v3308_v6 }
 0x9fb   : > { %v5480_v18 = vpop.eup %5479  ;;  %v3241_v31 = vadd.f32 1.0, %v5470_v61  ;;  %v3243_v56 = vadd.f32 1.0, %v5472_v26  ;;  %5505 = verf.f32 %v3134_v44  ;;  %3688 = vmatmul.mubr.bf16.vlgmr.msra.gmra.mxu0 %v3361_v19  ;;  %3785 = vmatmul.mubr.bf16.vlgmr.msra.gmra.mxu1 %v3363_v5  ;;  %v3060_v47 = vmul.f32 0.5, %v7089_v34 }
 0x9fc   : > { %v5482_v33 = vpop.eup %5481  ;;  %v3250_v36 = vadd.f32 1.0, %v5480_v18  ;;  %v3062_v62 = vmul.f32 0.5, %v7119_v0  ;;  %5507 = verf.f32 %v3136_v35  ;;  %3695 = vmatprep.mubr.bf16.mxu0 %v3366_v4  ;;  %3792 = vmatprep.mubr.bf16.mxu1 %v3368_v29  ;;  %v3309_v27 = vmul.f32 %v3245_v58, %v7106_v32 }
 0x9fd   : > { %v5484_v14 = vpop.eup %5483  ;;  %v3252_v60 = vadd.f32 1.0, %v5482_v33  ;;  %v3311_v41 = vmul.f32 %v3247_v1, %v7108_v54  ;;  %v3064_v61 = vmul.f32 0.5, %v7122_v2  ;;  %v3305_v34 = vmul.f32 %v3241_v31, %v7096_v23 }
 0x9fe   : > { %v5486_v20 = vpop.eup %5485  ;;  %v3314_v5 = vmul.f32 %v3250_v36, %v7149_v30  ;;  %v3307_v0 = vmul.f32 %v3243_v56, %v7098_v28  ;;  %v3249_v2 = vadd.f32 1.0, %v5478_v15  ;;  %v3061_v25 = vmul.f32 0.5, %v7113_v38 }
 0x9ff   : > { %v5488_v43 = vpop.eup %5487  ;;  %v3254_v7 = vadd.f32 1.0, %v5486_v20  ;;  %v3316_v20 = vmul.f32 %v3252_v60, %v3060_v47  ;;  %v3365_v33 = vpack.c.bf16 %v3309_v27, %v3305_v34  ;;  %v3251_v30 = vadd.f32 1.0, %v5484_v14 }
 0xa00   : > { %v5490_v39 = vpop.eup %5489  ;;  %v3256_v26 = vadd.f32 1.0, %v5488_v43  ;;  %v3367_v6 = vpack.c.bf16 %v3311_v41, %v3307_v0  ;;  %v3063_v1 = vmul.f32 0.5, %v7116_v10  ;;  %v3057_v23 = vmul.f32 0.5, %v7079_v9 }
 0xa01   : > { %v5492_v22 = vpop.eup %5491  ;;  %v3318_v19 = vmul.f32 %v3254_v7, %v3062_v62  ;;  %v3253_v13 = vadd.f32 1.0, %v5490_v39  ;;  %v3059_v36 = vmul.f32 0.5, %v7094_v50  ;;  %v3066_v38 = vmul.f32 0.5, %v7157_v24 }
 0xa02   : > { %v3320_v11 = vmul.f32 %v3256_v26, %v3064_v61  ;;  %v5494_v8 = vpop.eup %5493  ;;  %v3255_v32 = vadd.f32 1.0, %v5492_v22  ;;  %v3313_v15 = vmul.f32 %v3249_v2, %v3057_v23  ;;  %v3068_v60 = vmul.f32 0.5, %v7160_v49 }
 0xa03   : > { %v3370_v18 = vpack.c.bf16 %v3318_v19, %v3314_v5  ;;  %v5496_v46 = vpop.eup %5495  ;;  %3696 = vmatmul.mubr.bf16.gmra.mxu0 %v3365_v33  ;;  %3793 = vmatmul.mubr.bf16.gmra.mxu1 %v3367_v6  ;;  %v3317_v28 = vmul.f32 %v3253_v13, %v3061_v25  ;;  %v3315_v29 = vmul.f32 %v3251_v30, %v3059_v36  ;;  %v3070_v9 = vmul.f32 0.5, %v7177_v3 }
 0xa04   : > { %v3372_v54 = vpack.c.bf16 %v3320_v11, %v3316_v20  ;;  %v5498_v58 = vpop.eup %5497  ;;  %v3319_v35 = vmul.f32 %v3255_v32, %v3063_v1  ;;  %v3069_v50 = vmul.f32 0.5, %v7164_v59  ;;  %v3071_v41 = vmul.f32 0.5, %v7167_v48 }
 0xa05   : > { %v5500_v31 = vpop.eup %5499  ;;  %3703 = vmatprep.mubr.bf16.mxu0 %v3370_v18  ;;  %v3258_v14 = vadd.f32 1.0, %v5498_v58  ;;  %v3369_v10 = vpack.c.bf16 %v3317_v28, %v3313_v15  ;;  %v3072_v61 = vmul.f32 0.5, %v7180_v51  ;;  %v3257_v26 = vadd.f32 1.0, %v5494_v8 }
 0xa06   : > { %3800 = vmatprep.mubr.bf16.mxu1 %v3372_v54  ;;  %v5502_v44 = vpop.eup %5501  ;;  %v3260_v43 = vadd.f32 1.0, %v5500_v31  ;;  %v3371_v27 = vpack.c.bf16 %v3319_v35, %v3315_v29  ;;  %v3259_v22 = vadd.f32 1.0, %v5496_v46  ;;  %v3065_v49 = vmul.f32 0.5, %v7142_v21 }
 0xa07   : > { %v5504_v4 = vpop.eup %5503  ;;  %v3261_v62 = vadd.f32 1.0, %v5502_v44  ;;  %v3322_v5 = vmul.f32 %v3258_v14, %v3066_v38  ;;  %v3067_v0 = vmul.f32 0.5, %v7146_v40 }
 0xa08   : > { %v5506_v56 = vpop.eup %5505  ;;  %v3263_v7 = vadd.f32 1.0, %v5504_v4  ;;  %v3324_v3 = vmul.f32 %v3260_v43, %v3068_v60  ;;  %v3321_v51 = vmul.f32 %v3257_v26, %v3065_v49 }
 0xa09   : > { %v5508_v47 = vpop.eup %5507  ;;  %v3262_v39 = vadd.f32 1.0, %v5506_v56  ;;  %v3325_v20 = vmul.f32 %v3261_v62, %v3069_v50  ;;  %v3323_v33 = vmul.f32 %v3259_v22, %v3067_v0 }
 0xa0a   : > { %v3264_v24 = vadd.f32 1.0, %v5508_v47  ;;  %v3327_v11 = vmul.f32 %v3263_v7, %v3071_v41 }
 0xa0b   : > { %v3326_v19 = vmul.f32 %v3262_v39, %v3070_v9  ;;  %3704 = vmatmul.mubr.bf16.gmra.mxu0 %v3369_v10  ;;  %3801 = vmatmul.mubr.bf16.gmra.mxu1 %v3371_v27  ;;  %v3373_v54 = vpack.c.bf16 %v3325_v20, %v3321_v51 }
 0xa0c   : > { %v3328_v34 = vmul.f32 %v3264_v24, %v3072_v61  ;;  %v3375_v21 = vpack.c.bf16 %v3327_v11, %v3323_v33 }
 0xa0d   : > { %v3374_v59 = vpack.c.bf16 %v3326_v19, %v3322_v5 }
 0xa0e   : > { %v3376_v18 = vpack.c.bf16 %v3328_v34, %v3324_v3 }
 0xa0f   : > { %3711 = vmatprep.mubr.bf16.mxu0 %v3374_v59 }
 0xa10   : > { %3808 = vmatprep.mubr.bf16.mxu1 %v3376_v18 }
 0xa13   : > { %3712 = vmatmul.mubr.bf16.gmra.mxu0 %v3373_v54  ;;  %3809 = vmatmul.mubr.bf16.gmra.mxu1 %v3375_v21 }
 0xa14   : > { %v2889_v13 = vpop.f32.mrf.mxu0  ;;  %v3002_v48 = vpop.f32.mrf.mxu1 }
 0xa15   : > { %v2890_v6 = vadd.f32 %v2889_v13, %v7035_v42  ;;  %v3003_v46 = vadd.f32 %v3002_v48, %v7040_v55 }
 0xa16   : > { %v2891_v8 = vpop.f32.mrf.mxu0  ;;  %v3004_v32 = vpop.f32.mrf.mxu1 }
 0xa17   : > { %v2892_v25 = vadd.f32 %v2891_v8, %v7044_v53  ;;  %v3005_v58 = vadd.f32 %v3004_v32, %v7047_v16  ;;  %v3137_v31 = vmul.f32 0.70710677, %v2890_v6  ;;  %v3139_v28 = vmul.f32 0.70710677, %v3003_v46 }
 0xa18   : > { %v2893_v2 = vpop.f32.mrf.mxu0  ;;  %v3006_v40 = vpop.f32.mrf.mxu1  ;;  %v7227_v51 = vmul.f32 0.5, %v2890_v6  ;;  %v7229_v33 = vmul.f32 0.5, %v3003_v46 }
 0xa19   : > { %v2894_v23 = vadd.f32 %v2893_v2, %v7035_v42  ;;  %v3007_v44 = vadd.f32 %v3006_v40, %v7040_v55  ;;  %v3138_v4 = vmul.f32 0.70710677, %v2892_v25  ;;  %v3140_v15 = vmul.f32 0.70710677, %v3005_v58 }
 0xa1a   : > { %v2895_v30 = vpop.f32.mrf.mxu0  ;;  %v3008_v1 = vpop.f32.mrf.mxu1  ;;  %5509 = verf.f32 %v3137_v31  ;;  %v7232_v32 = vmul.f32 0.5, %v2892_v25  ;;  %v7237_v40 = vmul.f32 0.5, %v3005_v58 }
 0xa1b   : > { %v3141_v14 = vmul.f32 0.70710677, %v2894_v23  ;;  %v2896_v56 = vadd.f32 %v2895_v30, %v7044_v53  ;;  %5511 = verf.f32 %v3139_v28  ;;  %v3143_v10 = vmul.f32 0.70710677, %v3007_v44 }
 0xa1c   : > { %v2899_v36 = vpop.f32.mrf.mxu0  ;;  %v3012_v35 = vpop.f32.mrf.mxu1  ;;  %v3009_v60 = vadd.f32 %v3008_v1, %v7047_v16  ;;  %5513 = verf.f32 %v3138_v4  ;;  %v7239_v30 = vmul.f32 0.5, %v2894_v23  ;;  %v7244_v1 = vmul.f32 0.5, %v3007_v44 }
 0xa1d   : > { %v2900_v47 = vadd.f32 %v2899_v36, %v7035_v42  ;;  %5515 = verf.f32 %v3140_v15  ;;  %v3142_v27 = vmul.f32 0.70710677, %v2896_v56  ;;  %v7222_v19 = vadd.f32 %v3012_v35, %v7040_v55 }
 0xa1e   : > { %v2901_v29 = vpop.f32.mrf.mxu0  ;;  %v3014_v38 = vpop.f32.mrf.mxu1  ;;  %5517 = verf.f32 %v3141_v14  ;;  %v3144_v50 = vmul.f32 0.70710677, %v3009_v60  ;;  %v7249_v4 = vmul.f32 0.5, %v2896_v56  ;;  %v7251_v58 = vmul.f32 0.5, %v3009_v60 }
 0xa1f   : > { %v2902_v62 = vadd.f32 %v2901_v29, %v7044_v53  ;;  %5519 = verf.f32 %v3143_v10  ;;  %v3145_v24 = vmul.f32 0.70710677, %v2900_v47  ;;  %v3015_v26 = vadd.f32 %v3014_v38, %v7047_v16 }
 0xa20   : > { %v2903_v43 = vpop.f32.mrf.mxu0  ;;  %v3016_v9 = vpop.f32.mrf.mxu1  ;;  %5521 = verf.f32 %v3142_v27  ;;  %v3147_v8 = vmul.f32 0.70710677, %v7222_v19  ;;  %v7256_v29 = vmul.f32 0.5, %v2900_v47 }
 0xa21   : > { %v3146_v49 = vmul.f32 0.70710677, %v2902_v62  ;;  %v2904_v0 = vadd.f32 %v2903_v43, %v7035_v42  ;;  %5523 = verf.f32 %v3144_v50  ;;  %v3148_v59 = vmul.f32 0.70710677, %v3015_v26 }
 0xa22   : > { %v2905_v7 = vpop.f32.mrf.mxu0  ;;  %v3018_v39 = vpop.f32.mrf.mxu1  ;;  %5525 = verf.f32 %v3145_v24  ;;  %v3017_v13 = vadd.f32 %v3016_v9, %v7040_v55  ;;  %v7258_v44 = vmul.f32 0.5, %v2902_v62  ;;  %v7261_v10 = vmul.f32 0.5, %v3015_v26 }
 0xa23   : > { %v2906_v22 = vadd.f32 %v2905_v7, %v7044_v53  ;;  %v7219_v5 = vadd.f32 %v3018_v39, %v7047_v16  ;;  %5527 = verf.f32 %v3146_v49  ;;  %v3149_v54 = vmul.f32 0.70710677, %v2904_v0 }
 0xa24   : > { %v2909_v41 = vpop.f32.mrf.mxu0  ;;  %v3022_v61 = vpop.f32.mrf.mxu1  ;;  %v3151_v25 = vmul.f32 0.70710677, %v3017_v13  ;;  %v7263_v43 = vmul.f32 0.5, %v2904_v0  ;;  %v7265_v56 = vmul.f32 0.5, %v3017_v13 }
 0xa25   : > { %v3150_v20 = vmul.f32 0.70710677, %v2906_v22  ;;  %v3152_v11 = vmul.f32 0.70710677, %v7219_v5  ;;  %v7247_v31 = vadd.f32 %v2909_v41, %v7035_v42  ;;  %v7254_v23 = vadd.f32 %v3022_v61, %v7040_v55 }
 0xa26   : > { %v2911_v3 = vpop.f32.mrf.mxu0  ;;  %v3024_v34 = vpop.f32.mrf.mxu1  ;;  %v7272_v50 = vmul.f32 0.5, %v2906_v22  ;;  %v3088_v22 = vmul.f32 0.5, %v7219_v5 }
 0xa27   : > { %5529 = verf.f32 %v3150_v20  ;;  %v7235_v21 = vadd.f32 %v2911_v3, %v7044_v53  ;;  %v5510_v2 = vpop.eup %5509  ;;  %v7242_v6 = vadd.f32 %v3024_v34, %v7047_v16  ;;  %v3153_v47 = vmul.f32 0.70710677, %v7247_v31 }
 0xa28   : > { %v2913_v48 = vpop.f32.mrf.mxu0  ;;  %v3026_v18 = vpop.f32.mrf.mxu1  ;;  %5531 = verf.f32 %v3152_v11  ;;  %v3265_v7 = vadd.f32 1.0, %v5510_v2  ;;  %v3155_v41 = vmul.f32 0.70710677, %v7254_v23 }
 0xa29   : > { %v5512_v46 = vpop.eup %5511  ;;  %5533 = verf.f32 %v3148_v59  ;;  %v3154_v38 = vmul.f32 0.70710677, %v7235_v21  ;;  %v3156_v60 = vmul.f32 0.70710677, %v7242_v6  ;;  %v7270_v62 = vadd.f32 %v2913_v48, %v7035_v42 }
 0xa2a   : > { %v2915_v28 = vpop.f32.mrf.mxu0  ;;  %v3028_v36 = vpop.f32.mrf.mxu1  ;;  %5535 = verf.f32 %v3147_v8  ;;  %v7276_v61 = vadd.f32 %v3026_v18, %v7040_v55  ;;  %v3267_v26 = vadd.f32 1.0, %v5512_v46  ;;  %v7290_v2 = vmul.f32 %v3265_v7, %v7227_v51 }
 0xa2b   : > { %v5514_v35 = vpop.eup %5513  ;;  %5537 = verf.f32 %v3149_v54  ;;  %v7279_v24 = vadd.f32 %v2915_v28, %v7044_v53  ;;  %v7282_v3 = vadd.f32 %v3028_v36, %v7047_v16  ;;  %v3157_v13 = vmul.f32 0.70710677, %v7270_v62 }
 0xa2c   : > { %v5516_v15 = vpop.eup %5515  ;;  %5539 = verf.f32 %v3151_v25  ;;  %v2919_v39 = vpop.f32.mrf.mxu0  ;;  %v3266_v49 = vadd.f32 1.0, %v5514_v35  ;;  %v3159_v46 = vmul.f32 0.70710677, %v7276_v61  ;;  %v7295_v28 = vmul.f32 %v3267_v26, %v7229_v33 }
 0xa2d   : > { %v5518_v14 = vpop.eup %5517  ;;  %v3032_v27 = vpop.f32.mrf.mxu1  ;;  %5541 = verf.f32 %v3154_v38  ;;  %v3268_v0 = vadd.f32 1.0, %v5516_v15  ;;  %v3158_v48 = vmul.f32 0.70710677, %v7279_v24  ;;  %v3160_v5 = vmul.f32 0.70710677, %v7282_v3 }
 0xa2e   : > { %v5520_v9 = vpop.eup %5519  ;;  %v3269_v20 = vadd.f32 1.0, %v5518_v14  ;;  %5543 = verf.f32 %v3156_v60  ;;  %v2921_v18 = vpop.f32.mrf.mxu0  ;;  %v7298_v36 = vmul.f32 %v3266_v49, %v7232_v32  ;;  %v7301_v35 = vadd.f32 %v2919_v39, %v7035_v42 }
 0xa2f   : > { %v5522_v34 = vpop.eup %5521  ;;  %v3271_v59 = vadd.f32 1.0, %v5520_v9  ;;  %5545 = verf.f32 %v3153_v47  ;;  %v3034_v8 = vpop.f32.mrf.mxu1  ;;  %v7304_v51 = vmul.f32 %v3268_v0, %v7237_v40  ;;  %v7310_v14 = vadd.f32 %v3032_v27, %v7040_v55 }
 0xa30   : > { %v5524_v11 = vpop.eup %5523  ;;  %5547 = verf.f32 %v3155_v41  ;;  %v7307_v38 = vmul.f32 %v3269_v20, %v7239_v30  ;;  %v3270_v32 = vadd.f32 1.0, %v5522_v34  ;;  %v7316_v9 = vmul.f32 0.5, %v7235_v21  ;;  %v2923_v7 = vpop.f32.mrf.mxu0 }
 0xa31   : > { %v7287_v54 = vpop.eup %5525  ;;  %5549 = verf.f32 %v3158_v48  ;;  %v7313_v60 = vmul.f32 %v3271_v59, %v7244_v1  ;;  %v3036_v47 = vpop.f32.mrf.mxu1  ;;  %v3272_v39 = vadd.f32 1.0, %v5524_v11  ;;  %v3161_v30 = vmul.f32 0.70710677, %v7301_v35 }
 0xa32   : > { %v5528_v25 = vpop.eup %5527  ;;  %5551 = verf.f32 %v3160_v5  ;;  %v3163_v49 = vmul.f32 0.70710677, %v7310_v14  ;;  %v7321_v1 = vadd.f32 %v2921_v18, %v7044_v53  ;;  %v7324_v34 = vadd.f32 %v3034_v8, %v7047_v16 }
 0xa33   : > { %5553 = verf.f32 %v3157_v13  ;;  %v3274_v41 = vadd.f32 1.0, %v5528_v25  ;;  %v3377_v0 = vpack.c.bf16 %v7307_v38, %v7290_v2  ;;  %v7329_v11 = vadd.f32 %v2923_v7, %v7035_v42 }
 0xa34   : > { %v5530_v15 = vpop.eup %5529  ;;  %5555 = verf.f32 %v3159_v46  ;;  %v7332_v59 = vadd.f32 %v3036_v47, %v7040_v55  ;;  %v3379_v13 = vpack.c.bf16 %v7313_v60, %v7295_v28  ;;  %v3334_v48 = vmul.f32 %v3270_v32, %v7249_v4  ;;  %v2925_v46 = vpop.f32.mrf.mxu0 }
 0xa35   : > { %v5532_v33 = vpop.eup %5531  ;;  %v3278_v27 = vadd.f32 1.0, %v5530_v15  ;;  %v3162_v8 = vmul.f32 0.70710677, %v7321_v1  ;;  %v3336_v25 = vmul.f32 %v3272_v39, %v7251_v58  ;;  %v3338_v2 = vmul.f32 %v3274_v41, %v7258_v44  ;;  %v3038_v15 = vpop.f32.mrf.mxu1 }
 0xa36   : > { %v5534_v40 = vpop.eup %5533  ;;  %v3280_v20 = vadd.f32 1.0, %v5532_v33  ;;  %5557 = verf.f32 %v3161_v30  ;;  %v3164_v42 = vmul.f32 0.70710677, %v7324_v34  ;;  %v3165_v28 = vmul.f32 0.70710677, %v7329_v11 }
 0xa37   : > { %v5536_v26 = vpop.eup %5535  ;;  %v3276_v18 = vadd.f32 1.0, %v5534_v40  ;;  %v3342_v38 = vmul.f32 %v3278_v27, %v7272_v50  ;;  %5559 = verf.f32 %v3163_v49  ;;  %v3167_v60 = vmul.f32 0.70710677, %v7332_v59 }
 0xa38   : > { %v5538_v21 = vpop.eup %5537  ;;  %v3344_v33 = vmul.f32 %v3280_v20, %v3088_v22  ;;  %5561 = verf.f32 %v3162_v8  ;;  %v7345_v32 = vadd.f32 %v2925_v46, %v7044_v53  ;;  %v7349_v7 = vadd.f32 %v3038_v15, %v7047_v16 }
 0xa39   : > { %v5540_v5 = vpop.eup %5539  ;;  %v3277_v55 = vadd.f32 1.0, %v5538_v21  ;;  %v3340_v44 = vmul.f32 %v3276_v18, %v7261_v10  ;;  %5563 = verf.f32 %v3164_v42  ;;  %v3378_v50 = vpack.c.bf16 %v3334_v48, %v7298_v36 }
 0xa3a   : > { %v5542_v4 = vpop.eup %5541  ;;  %v3279_v40 = vadd.f32 1.0, %v5540_v5  ;;  %5565 = verf.f32 %v3165_v28  ;;  %v3166_v22 = vmul.f32 0.70710677, %v7345_v32  ;;  %v3380_v39 = vpack.c.bf16 %v3336_v25, %v7304_v51 }
 0xa3b   : > { %v5544_v58 = vpop.eup %5543  ;;  %v3282_v30 = vadd.f32 1.0, %v5542_v4  ;;  %5567 = verf.f32 %v3167_v60  ;;  %v3168_v53 = vmul.f32 0.70710677, %v7349_v7  ;;  %3719 = vmatprep.mubr.bf16.mxu0 %v3378_v50  ;;  %v3382_v10 = vpack.c.bf16 %v3342_v38, %v3338_v2 }
 0xa3c   : > { %v5546_v47 = vpop.eup %5545  ;;  %v3273_v16 = vadd.f32 1.0, %v7287_v54  ;;  %v3284_v49 = vadd.f32 1.0, %v5544_v58  ;;  %5569 = verf.f32 %v3166_v22  ;;  %3816 = vmatprep.mubr.bf16.mxu1 %v3380_v39  ;;  %3720 = vmatmul.mubr.bf16.gmra.mxu0 %v3377_v0  ;;  %v3384_v36 = vpack.c.bf16 %v3344_v33, %v3340_v44 }
 0xa3d   : > { %v5548_v41 = vpop.eup %5547  ;;  %v3275_v20 = vadd.f32 1.0, %v5536_v26  ;;  %v3094_v48 = vmul.f32 0.5, %v7279_v24  ;;  %5571 = verf.f32 %v3168_v53  ;;  %3817 = vmatmul.mubr.bf16.gmra.mxu1 %v3379_v13  ;;  %3727 = vmatprep.mubr.bf16.mxu0 %v3382_v10  ;;  %v3341_v8 = vmul.f32 %v3277_v55, %v7263_v43 }
 0xa3e   : > { %v5550_v27 = vpop.eup %5549  ;;  %v3092_v46 = vmul.f32 0.5, %v7242_v6  ;;  %v3096_v54 = vmul.f32 0.5, %v7282_v3  ;;  %3824 = vmatprep.mubr.bf16.mxu1 %v3384_v36  ;;  %v3083_v0 = vmul.f32 0.5, %v7222_v19  ;;  %v3343_v26 = vmul.f32 %v3279_v40, %v7265_v56 }
 0xa3f   : > { %v5552_v21 = vpop.eup %5551  ;;  %v3286_v51 = vadd.f32 1.0, %v5550_v27  ;;  %v3346_v24 = vmul.f32 %v3282_v30, %v7316_v9  ;;  %v3337_v13 = vmul.f32 %v3273_v16, %v7256_v29  ;;  %v3281_v58 = vadd.f32 1.0, %v5546_v47 }
 0xa40   : > { %v5554_v18 = vpop.eup %5553  ;;  %v3288_v5 = vadd.f32 1.0, %v5552_v21  ;;  %v3348_v42 = vmul.f32 %v3284_v49, %v3092_v46  ;;  %v3339_v38 = vmul.f32 %v3275_v20, %v3083_v0  ;;  %v3093_v19 = vmul.f32 0.5, %v7270_v62 }
 0xa41   : > { %v5556_v25 = vpop.eup %5555  ;;  %v3350_v2 = vmul.f32 %v3286_v51, %v3094_v48  ;;  %v3381_v55 = vpack.c.bf16 %v3341_v8, %v3337_v13  ;;  %v3285_v6 = vadd.f32 1.0, %v5554_v18  ;;  %v3283_v9 = vadd.f32 1.0, %v5548_v41 }
 0xa42   : > { %v3352_v15 = vmul.f32 %v3288_v5, %v3096_v54  ;;  %v3383_v4 = vpack.c.bf16 %v3343_v26, %v3339_v38  ;;  %v3287_v33 = vadd.f32 1.0, %v5556_v25  ;;  %v3095_v44 = vmul.f32 0.5, %v7276_v61 }
 0xa43   : > { %v3386_v43 = vpack.c.bf16 %v3350_v2, %v3346_v24  ;;  %v5558_v3 = vpop.eup %5557  ;;  %v3089_v50 = vmul.f32 0.5, %v7247_v31  ;;  %v3349_v40 = vmul.f32 %v3285_v6, %v3093_v19  ;;  %v3091_v39 = vmul.f32 0.5, %v7254_v23 }
 0xa44   : > { %v3388_v28 = vpack.c.bf16 %v3352_v15, %v3348_v42  ;;  %v5560_v60 = vpop.eup %5559  ;;  %3728 = vmatmul.mubr.bf16.gmra.mxu0 %v3381_v55  ;;  %v3351_v30 = vmul.f32 %v3287_v33, %v3095_v44  ;;  %v3098_v41 = vmul.f32 0.5, %v7321_v1  ;;  %v3100_v61 = vmul.f32 0.5, %v7324_v34  ;;  %v7377_v55 = vld [vmem:[%s5923_s27 + $0xa] ss:$0 sm:$0xff] }
 0xa45   : > { %v5562_v56 = vpop.eup %5561  ;;  %3825 = vmatmul.mubr.bf16.gmra.mxu1 %v3383_v4  ;;  %3735 = vmatprep.mubr.bf16.mxu0 %v3386_v43  ;;  %v3345_v47 = vmul.f32 %v3281_v58, %v3089_v50  ;;  %v3347_v27 = vmul.f32 %v3283_v9, %v3091_v39  ;;  %v3102_v31 = vmul.f32 0.5, %v7345_v32  ;;  %v3104_v23 = vmul.f32 0.5, %v7349_v7 }
 0xa46   : > { %v5564_v29 = vpop.eup %5563  ;;  %3832 = vmatprep.mubr.bf16.mxu1 %v3388_v28  ;;  %v3290_v10 = vadd.f32 1.0, %v5562_v56  ;;  %v3289_v8 = vadd.f32 1.0, %v5558_v3  ;;  %v3101_v54 = vmul.f32 0.5, %v7329_v11  ;;  %v3291_v1 = vadd.f32 1.0, %v5560_v60 }
 0xa47   : > { %v5566_v22 = vpop.eup %5565  ;;  %v3292_v16 = vadd.f32 1.0, %v5564_v29  ;;  %v3385_v36 = vpack.c.bf16 %v3349_v40, %v3345_v47  ;;  %v3387_v48 = vpack.c.bf16 %v3351_v30, %v3347_v27  ;;  %v3103_v25 = vmul.f32 0.5, %v7332_v59 }
 0xa48   : > { %v5568_v53 = vpop.eup %5567  ;;  %v3293_v21 = vadd.f32 1.0, %v5566_v22  ;;  %v3354_v46 = vmul.f32 %v3290_v10, %v3098_v41  ;;  %v3097_v32 = vmul.f32 0.5, %v7301_v35  ;;  %v3099_v7 = vmul.f32 0.5, %v7310_v14 }
 0xa49   : > { %v5570_v62 = vpop.eup %5569  ;;  %v3295_v51 = vadd.f32 1.0, %v5568_v53  ;;  %v3356_v34 = vmul.f32 %v3292_v16, %v3100_v61 }
 0xa4a   : > { %v5572_v49 = vpop.eup %5571  ;;  %v3294_v20 = vadd.f32 1.0, %v5570_v62  ;;  %v3357_v26 = vmul.f32 %v3293_v21, %v3101_v54  ;;  %v3353_v42 = vmul.f32 %v3289_v8, %v3097_v32  ;;  %v3355_v11 = vmul.f32 %v3291_v1, %v3099_v7 }
 0xa4b   : > { %v3296_v18 = vadd.f32 1.0, %v5572_v49  ;;  %v3359_v2 = vmul.f32 %v3295_v51, %v3103_v25 }
 0xa4c   : > { %v3358_v5 = vmul.f32 %v3294_v20, %v3102_v31  ;;  %3736 = vmatmul.mubr.bf16.gmra.mxu0 %v3385_v36  ;;  %v3389_v15 = vpack.c.bf16 %v3357_v26, %v3353_v42 }
 0xa4d   : > { %v3360_v0 = vmul.f32 %v3296_v18, %v3104_v23  ;;  %3833 = vmatmul.mubr.bf16.gmra.mxu1 %v3387_v48  ;;  %v3391_v38 = vpack.c.bf16 %v3359_v2, %v3355_v11 }
 0xa4e   : > { %v3390_v24 = vpack.c.bf16 %v3358_v5, %v3354_v46 }
 0xa4f   : > { %v3392_v13 = vpack.c.bf16 %v3360_v0, %v3356_v34 }
 0xa50   : > { %3743 = vmatprep.mubr.bf16.mxu0 %v3390_v24 }
 0xa51   : > { %3840 = vmatprep.mubr.bf16.mxu1 %v3392_v13 }
 0xa54   : > { %3744 = vmatmul.mubr.bf16.gmra.mxu0 %v3389_v15 }
 0xa55   : > { %3841 = vmatmul.mubr.bf16.gmra.mxu1 %v3391_v38 }
 0xabb   : > { %v4665_v59 = vpop.f32.mrf.mxu0  ;;  %v4729_v43 = vpop.f32.mrf.mxu1 }
 0xabd   : > { %v4666_v35 = vpop.f32.mrf.mxu0  ;;  %v4730_v6 = vpop.f32.mrf.mxu1 }
 0xabe   : > { %v4667_v28 = vadd.f32 %v4666_v35, %v4665_v59  ;;  %v4731_v33 = vadd.f32 %v4730_v6, %v4729_v43 }
 0xabf   : > { %v4668_v3 = vpop.f32.mrf.mxu0  ;;  %v4732_v4 = vpop.f32.mrf.mxu1 }
 0xac0   : > { %v3690_v14 = vadd.f32 %v4667_v28, %v7377_v55 }
 0xac1   : > { %v4669_v60 = vpop.f32.mrf.mxu0  ;;  %v4733_v58 = vpop.f32.mrf.mxu1 }
 0xac2   : > { %v3787_v19 = vadd.f32 %v4731_v33, %v3690_v14  ;;  %v4670_v56 = vadd.f32 %v4669_v60, %v4668_v3  ;;  %v4734_v50 = vadd.f32 %v4733_v58, %v4732_v4  ;;  %v7798_v58 = vld [vmem:[#allocation21_spill] sm:$0xff] }
 0xac3   : > { %v4671_v9 = vpop.f32.mrf.mxu0  ;;  %v4735_v44 = vpop.f32.mrf.mxu1 }
 0xac4   : > { %v3693_v29 = vadd.f32 %v4670_v56, %v7377_v55  ;;  %v7382_v40 = vadd.f32 %v3787_v19, %v6895_v63 }
 0xac5   : > { %v4672_v22 = vpop.f32.mrf.mxu0  ;;  %v4736_v39 = vpop.f32.mrf.mxu1 }
 0xac6   : > { %v3790_v30 = vadd.f32 %v4734_v50, %v3693_v29  ;;  %v4673_v53 = vadd.f32 %v4672_v22, %v4671_v9  ;;  %3865 = vadd.xlane.f32.xlu0 %v7382_v40  ;;  %v4737_v27 = vadd.f32 %v4736_v39, %v4735_v44 }
 0xac7   : > { %v4674_v47 = vpop.f32.mrf.mxu0  ;;  %v4738_v10 = vpop.f32.mrf.mxu1 }
 0xac8   : > { %v3698_v62 = vadd.f32 %v4673_v53, %v7377_v55  ;;  %v7387_v41 = vadd.f32 %v3790_v30, %v6898_v37 }
 0xac9   : > { %v4675_v61 = vpop.f32.mrf.mxu0  ;;  %v4739_v16 = vpop.f32.mrf.mxu1 }
 0xaca   : > { %v3795_v49 = vadd.f32 %v4737_v27, %v3698_v62  ;;  %v4676_v36 = vadd.f32 %v4675_v61, %v4674_v47  ;;  %3867 = vadd.xlane.f32.xlu1 %v7387_v41  ;;  %v4740_v20 = vadd.f32 %v4739_v16, %v4738_v10 }
 0xacb   : > { %v4677_v63 = vpop.f32.mrf.mxu0  ;;  %v4741_v21 = vpop.f32.mrf.mxu1 }
 0xacc   : > { %v3701_v31 = vadd.f32 %v4676_v36, %v7377_v55  ;;  %v7392_v48 = vadd.f32 %v3795_v49, %v6912_v52  ;;  %v7799_v49 = vld [vmem:[#allocation22_spill] sm:$0xff] }
 0xacd   : > { %v4678_v51 = vpop.f32.mrf.mxu0  ;;  %v4742_v23 = vpop.f32.mrf.mxu1 }
 0xace   : > { %v3798_v18 = vadd.f32 %v4740_v20, %v3701_v31  ;;  %v4679_v8 = vadd.f32 %v4678_v51, %v4677_v63  ;;  %3869 = vadd.xlane.f32.xlu0 %v7392_v48  ;;  %v4743_v5 = vadd.f32 %v4742_v23, %v4741_v21 }
 0xacf   : > { %v4680_v37 = vpop.f32.mrf.mxu0  ;;  %v4744_v46 = vpop.f32.mrf.mxu1 }
 0xad0   : > { %v3706_v54 = vadd.f32 %v4679_v8, %v7377_v55  ;;  %v7397_v1 = vadd.f32 %v3798_v18, %v6909_v57 }
 0xad1   : > { %v4681_v34 = vpop.f32.mrf.mxu0  ;;  %v4745_v25 = vpop.f32.mrf.mxu1 }
 0xad2   : > { %v3803_v0 = vadd.f32 %v4743_v5, %v3706_v54  ;;  %v4682_v32 = vadd.f32 %v4681_v34, %v4680_v37  ;;  %3871 = vadd.xlane.f32.xlu1 %v7397_v1  ;;  %v4746_v7 = vadd.f32 %v4745_v25, %v4744_v46  ;;  %v7800_v37 = vld [vmem:[#allocation23_spill] sm:$0xff] }
 0xad3   : > { %v4683_v52 = vpop.f32.mrf.mxu0  ;;  %v4747_v26 = vpop.f32.mrf.mxu1 }
 0xad4   : > { %v3709_v24 = vadd.f32 %v4682_v32, %v7377_v55  ;;  %v7402_v2 = vadd.f32 %v3803_v0, %v6927_v17 }
 0xad5   : > { %v4684_v13 = vpop.f32.mrf.mxu0  ;;  %v4748_v42 = vpop.f32.mrf.mxu1 }
 0xad6   : > { %v3806_v11 = vadd.f32 %v4746_v7, %v3709_v24  ;;  %v4685_v15 = vadd.f32 %v4684_v13, %v4683_v52  ;;  %3873 = vadd.xlane.f32.xlu0 %v7402_v2  ;;  %v4749_v43 = vadd.f32 %v4748_v42, %v4747_v26  ;;  %v7801_v24 = vld [vmem:[#allocation25_spill] sm:$0xff] }
 0xad7   : > { %v4686_v57 = vpop.f32.mrf.mxu0  ;;  %v4750_v38 = vpop.f32.mrf.mxu1 }
 0xad8   : > { %v3714_v59 = vadd.f32 %v4685_v15, %v7377_v55  ;;  %v7407_v35 = vadd.f32 %v3806_v11, %v6923_v12 }
 0xad9   : > { %v4687_v6 = vpop.f32.mrf.mxu0  ;;  %v4751_v28 = vpop.f32.mrf.mxu1 }
 0xada   : > { %v3811_v3 = vadd.f32 %v4749_v43, %v3714_v59  ;;  %v4688_v4 = vadd.f32 %v4687_v6, %v4686_v57  ;;  %3875 = vadd.xlane.f32.xlu1 %v7407_v35  ;;  %v4752_v14 = vadd.f32 %v4751_v28, %v4750_v38  ;;  %v7802_v6 = vld [vmem:[#allocation24_spill] sm:$0xff] }
 0xadc   : > { %v3717_v17 = vadd.f32 %v4688_v4, %v7377_v55  ;;  %v7412_v33 = vadd.f32 %v3811_v3, %v6940_v45 }
 0xade   : > { %v3814_v60 = vadd.f32 %v4752_v14, %v3717_v17  ;;  %3877 = vadd.xlane.f32.xlu0 %v7412_v33 }
 0xae0   : > { %v7416_v19 = vadd.f32 %v3814_v60, %v7798_v58 }
 0xae2   : > { %3879 = vadd.xlane.f32.xlu1 %v7416_v19 }
 0xafc   : > { %v4689_v12 = vpop.f32.mrf.mxu0 }
 0xafd   : > { %v4753_v56 = vpop.f32.mrf.mxu1 }
 0xafe   : > { %v4690_v9 = vpop.f32.mrf.mxu0 }
 0xaff   : > { %v4691_v44 = vadd.f32 %v4690_v9, %v4689_v12  ;;  %v4754_v29 = vpop.f32.mrf.mxu1  ;;  %v7803_v9 = vld [vmem:[#allocation27_spill] sm:$0xff] }
 0xb00   : > { %v4692_v50 = vpop.f32.mrf.mxu0  ;;  %v4755_v39 = vadd.f32 %v4754_v29, %v4753_v56 }
 0xb01   : > { %v3722_v22 = vadd.f32 %v4691_v44, %v7377_v55  ;;  %v4756_v30 = vpop.f32.mrf.mxu1 }
 0xb02   : > { %v4693_v45 = vpop.f32.mrf.mxu0 }
 0xb03   : > { %v3819_v53 = vadd.f32 %v4755_v39, %v3722_v22  ;;  %v4694_v47 = vadd.f32 %v4693_v45, %v4692_v50  ;;  %v4757_v10 = vpop.f32.mrf.mxu1 }
 0xb04   : > { %v4695_v62 = vpop.f32.mrf.mxu0  ;;  %v4758_v61 = vadd.f32 %v4757_v10, %v4756_v30  ;;  %v7804_v10 = vld [vmem:[#allocation26_spill] sm:$0xff] }
 0xb05   : > { %v3725_v27 = vadd.f32 %v4694_v47, %v7377_v55  ;;  %v4759_v16 = vpop.f32.mrf.mxu1  ;;  %v7422_v36 = vadd.f32 %v3819_v53, %v7799_v49 }
 0xb06   : > { %v4696_v63 = vpop.f32.mrf.mxu0 }
 0xb07   : > { %v3822_v21 = vadd.f32 %v4758_v61, %v3725_v27  ;;  %v4697_v31 = vadd.f32 %v4696_v63, %v4695_v62  ;;  %v4760_v20 = vpop.f32.mrf.mxu1  ;;  %3881 = vadd.xlane.f32.xlu0 %v7422_v36 }
 0xb08   : > { %v4698_v51 = vpop.f32.mrf.mxu0  ;;  %v4761_v18 = vadd.f32 %v4760_v20, %v4759_v16 }
 0xb09   : > { %v3730_v23 = vadd.f32 %v4697_v31, %v7377_v55  ;;  %v4762_v8 = vpop.f32.mrf.mxu1  ;;  %v7427_v46 = vadd.f32 %v3822_v21, %v7800_v37  ;;  %v7805_v31 = vld [vmem:[#allocation29_spill] sm:$0xff] }
 0xb0a   : > { %v4699_v54 = vpop.f32.mrf.mxu0 }
 0xb0b   : > { %v3827_v5 = vadd.f32 %v4761_v18, %v3730_v23  ;;  %v4700_v34 = vadd.f32 %v4699_v54, %v4698_v51  ;;  %v4763_v25 = vpop.f32.mrf.mxu1  ;;  %3883 = vadd.xlane.f32.xlu1 %v7427_v46  ;;  %v7806_v23 = vld [vmem:[#allocation28_spill] sm:$0xff] }
 0xb0c   : > { %v4701_v0 = vpop.f32.mrf.mxu0  ;;  %v4764_v52 = vadd.f32 %v4763_v25, %v4762_v8 }
 0xb0d   : > { %v3733_v32 = vadd.f32 %v4700_v34, %v7377_v55  ;;  %v4765_v26 = vpop.f32.mrf.mxu1  ;;  %v7432_v7 = vadd.f32 %v3827_v5, %v7801_v24 }
 0xb0e   : > { %v4702_v13 = vpop.f32.mrf.mxu0 }
 0xb0f   : > { %v3830_v42 = vadd.f32 %v4764_v52, %v3733_v32  ;;  %v4703_v11 = vadd.f32 %v4702_v13, %v4701_v0  ;;  %v4766_v15 = vpop.f32.mrf.mxu1  ;;  %3885 = vadd.xlane.f32.xlu0 %v7432_v7 }
 0xb10   : > { %v4704_v57 = vpop.f32.mrf.mxu0  ;;  %v4767_v59 = vadd.f32 %v4766_v15, %v4765_v26 }
 0xb11   : > { %v3738_v38 = vadd.f32 %v4703_v11, %v7377_v55  ;;  %v4768_v43 = vpop.f32.mrf.mxu1  ;;  %v7437_v28 = vadd.f32 %v3830_v42, %v7802_v6 }
 0xb12   : > { %v4705_v3 = vpop.f32.mrf.mxu0 }
 0xb13   : > { %v3835_v4 = vadd.f32 %v4767_v59, %v3738_v38  ;;  %v4706_v17 = vadd.f32 %v4705_v3, %v4704_v57  ;;  %v4769_v14 = vpop.f32.mrf.mxu1  ;;  %3887 = vadd.xlane.f32.xlu1 %v7437_v28 }
 0xb14   : > { %v4707_v60 = vpop.f32.mrf.mxu0  ;;  %v4770_v12 = vadd.f32 %v4769_v14, %v4768_v43 }
 0xb15   : > { %v3741_v58 = vadd.f32 %v4706_v17, %v7377_v55  ;;  %v4771_v56 = vpop.f32.mrf.mxu1  ;;  %v7442_v44 = vadd.f32 %v3835_v4, %v7803_v9 }
 0xb16   : > { %v4708_v29 = vpop.f32.mrf.mxu0 }
 0xb17   : > { %v3838_v50 = vadd.f32 %v4770_v12, %v3741_v58  ;;  %v4709_v22 = vadd.f32 %v4708_v29, %v4707_v60  ;;  %v4772_v39 = vpop.f32.mrf.mxu1  ;;  %3889 = vadd.xlane.f32.xlu0 %v7442_v44 }
 0xb18   : > { %v4710_v30 = vpop.f32.mrf.mxu0  ;;  %v4773_v53 = vadd.f32 %v4772_v39, %v4771_v56 }
 0xb19   : > { %v3746_v45 = vadd.f32 %v4709_v22, %v7377_v55  ;;  %v4774_v47 = vpop.f32.mrf.mxu1  ;;  %v7447_v62 = vadd.f32 %v3838_v50, %v7804_v10 }
 0xb1a   : > { %v4711_v27 = vpop.f32.mrf.mxu0 }
 0xb1b   : > { %v3843_v61 = vadd.f32 %v4773_v53, %v3746_v45  ;;  %v4712_v16 = vadd.f32 %v4711_v27, %v4710_v30  ;;  %v4775_v49 = vpop.f32.mrf.mxu1  ;;  %3891 = vadd.xlane.f32.xlu1 %v7447_v62 }
 0xb1c   : > { %v4776_v21 = vadd.f32 %v4775_v49, %v4774_v47 }
 0xb1d   : > { %v3749_v63 = vadd.f32 %v4712_v16, %v7377_v55  ;;  %v7452_v20 = vadd.f32 %v3843_v61, %v7805_v31 }
 0xb1f   : > { %v3846_v51 = vadd.f32 %v4776_v21, %v3749_v63  ;;  %3893 = vadd.xlane.f32.xlu0 %v7452_v20 }
 0xb21   : > { %v7456_v18 = vadd.f32 %v3846_v51, %v7806_v23 }
 0xb23   : > { %3895 = vadd.xlane.f32.xlu1 %v7456_v18 }
 0xb4f   : > { %v3866_v8 = vpop.xlane.xlu0 %3865 }
 0xb50   : > { %v3897_v37 = vmul.f32 0.0078125, %v3866_v8 }
 0xb52   : > { %v7460_v54 = vsub.f32 %v7382_v40, %v3897_v37 }
 0xb53   : > { %v3868_v5 = vpop.xlane.xlu1 %3867 }
 0xb54   : > { %v3898_v34 = vmul.f32 0.0078125, %v3868_v5  ;;  %v3929_v55 = vmul.f32 %v7460_v54, %v7460_v54 }
 0xb56   : > { %v7465_v25 = vsub.f32 %v7387_v41, %v3898_v34  ;;  %3945 = vadd.xlane.f32.xlu0 %v3929_v55 }
 0xb57   : > { %v3870_v0 = vpop.xlane.xlu0 %3869 }
 0xb58   : > { %v3899_v32 = vmul.f32 0.0078125, %v3870_v0  ;;  %v3930_v52 = vmul.f32 %v7465_v25, %v7465_v25 }
 0xb5a   : > { %v7470_v26 = vsub.f32 %v7392_v48, %v3899_v32  ;;  %3947 = vadd.xlane.f32.xlu1 %v3930_v52 }
 0xb5b   : > { %v3872_v40 = vpop.xlane.xlu1 %3871 }
 0xb5c   : > { %v3900_v24 = vmul.f32 0.0078125, %v3872_v40  ;;  %v3931_v13 = vmul.f32 %v7470_v26, %v7470_v26 }
 0xb5e   : > { %v7475_v42 = vsub.f32 %v7397_v1, %v3900_v24  ;;  %3949 = vadd.xlane.f32.xlu0 %v3931_v13 }
 0xb5f   : > { %v3874_v41 = vpop.xlane.xlu0 %3873 }
 0xb60   : > { %v3901_v11 = vmul.f32 0.0078125, %v3874_v41  ;;  %v3932_v15 = vmul.f32 %v7475_v42, %v7475_v42 }
 0xb62   : > { %v7480_v57 = vsub.f32 %v7402_v2, %v3901_v11  ;;  %3951 = vadd.xlane.f32.xlu1 %v3932_v15 }
 0xb63   : > { %v3876_v48 = vpop.xlane.xlu1 %3875 }
 0xb64   : > { %v3902_v38 = vmul.f32 0.0078125, %v3876_v48  ;;  %v3933_v59 = vmul.f32 %v7480_v57, %v7480_v57 }
 0xb66   : > { %v7485_v43 = vsub.f32 %v7407_v35, %v3902_v38  ;;  %3953 = vadd.xlane.f32.xlu0 %v3933_v59  ;;  %v7540_v38 = vld [vmem:[%s5923_s27 + $0xb] ss:$0 sm:$0xff] }
 0xb67   : > { %v3878_v1 = vpop.xlane.xlu0 %3877 }
 0xb68   : > { %v3903_v6 = vmul.f32 0.0078125, %v3878_v1  ;;  %v3934_v3 = vmul.f32 %v7485_v43, %v7485_v43 }
 0xb6a   : > { %v7490_v4 = vsub.f32 %v7412_v33, %v3903_v6  ;;  %3955 = vadd.xlane.f32.xlu1 %v3934_v3  ;;  %v7544_v6 = vld [vmem:[%s5923_s27 + $0xc] ss:$0 sm:$0xff]  ;;  %s7646_s27 = sld [smem:[#allocation4 + %s4138_s23]] (!%p4534_p11) }
 0xb6b   : > { %v3880_v2 = vpop.xlane.xlu1 %3879 }
 0xb6c   : > { %v3904_v17 = vmul.f32 0.0078125, %v3880_v2  ;;  %v3935_v14 = vmul.f32 %v7490_v4, %v7490_v4 }
 0xb6e   : > { %v7495_v60 = vsub.f32 %v7416_v19, %v3904_v17  ;;  %3957 = vadd.xlane.f32.xlu0 %v3935_v14 }
 0xb70   : > { %v3936_v35 = vmul.f32 %v7495_v60, %v7495_v60 }
 0xb72   : > { %3959 = vadd.xlane.f32.xlu1 %v3936_v35 }
 0xb90   : > { %v3882_v58 = vpop.xlane.xlu0 %3881 }
 0xb91   : > { %v3905_v12 = vmul.f32 0.0078125, %v3882_v58 }
 0xb93   : > { %v7500_v56 = vsub.f32 %v7422_v36, %v3905_v12 }
 0xb94   : > { %v3884_v33 = vpop.xlane.xlu1 %3883 }
 0xb95   : > { %v3906_v9 = vmul.f32 0.0078125, %v3884_v33  ;;  %v3937_v29 = vmul.f32 %v7500_v56, %v7500_v56 }
 0xb97   : > { %v7505_v50 = vsub.f32 %v7427_v46, %v3906_v9  ;;  %3961 = vadd.xlane.f32.xlu0 %v3937_v29 }
 0xb98   : > { %v3886_v19 = vpop.xlane.xlu0 %3885 }
 0xb99   : > { %v3907_v22 = vmul.f32 0.0078125, %v3886_v19  ;;  %v3938_v39 = vmul.f32 %v7505_v50, %v7505_v50 }
 0xb9b   : > { %v7510_v30 = vsub.f32 %v7432_v7, %v3907_v22  ;;  %3963 = vadd.xlane.f32.xlu1 %v3938_v39 }
 0xb9c   : > { %v3888_v36 = vpop.xlane.xlu1 %3887 }
 0xb9d   : > { %v3908_v45 = vmul.f32 0.0078125, %v3888_v36  ;;  %v3939_v53 = vmul.f32 %v7510_v30, %v7510_v30 }
 0xb9f   : > { %v7515_v47 = vsub.f32 %v7437_v28, %v3908_v45  ;;  %3965 = vadd.xlane.f32.xlu0 %v3939_v53 }
 0xba0   : > { %v3890_v46 = vpop.xlane.xlu0 %3889 }
 0xba1   : > { %v3909_v10 = vmul.f32 0.0078125, %v3890_v46  ;;  %v3940_v27 = vmul.f32 %v7515_v47, %v7515_v47 }
 0xba3   : > { %v7520_v61 = vsub.f32 %v7442_v44, %v3909_v10  ;;  %3967 = vadd.xlane.f32.xlu1 %v3940_v27 }
 0xba4   : > { %v3892_v7 = vpop.xlane.xlu1 %3891 }
 0xba5   : > { %v3910_v16 = vmul.f32 0.0078125, %v3892_v7  ;;  %v3941_v49 = vmul.f32 %v7520_v61, %v7520_v61 }
 0xba7   : > { %v7525_v63 = vsub.f32 %v7447_v62, %v3910_v16  ;;  %3969 = vadd.xlane.f32.xlu0 %v3941_v49 }
 0xba8   : > { %v3894_v28 = vpop.xlane.xlu0 %3893 }
 0xba9   : > { %v3911_v21 = vmul.f32 0.0078125, %v3894_v28  ;;  %v3942_v31 = vmul.f32 %v7525_v63, %v7525_v63 }
 0xbab   : > { %v7530_v51 = vsub.f32 %v7452_v20, %v3911_v21  ;;  %3971 = vadd.xlane.f32.xlu1 %v3942_v31 }
 0xbac   : > { %v3896_v44 = vpop.xlane.xlu1 %3895 }
 0xbad   : > { %v3912_v23 = vmul.f32 0.0078125, %v3896_v44  ;;  %v3943_v8 = vmul.f32 %v7530_v51, %v7530_v51 }
 0xbaf   : > { %v7535_v37 = vsub.f32 %v7456_v18, %v3912_v23  ;;  %3973 = vadd.xlane.f32.xlu0 %v3943_v8 }
 0xbb1   : > { %v3944_v62 = vmul.f32 %v7535_v37, %v7535_v37 }
 0xbb3   : > { %3975 = vadd.xlane.f32.xlu1 %v3944_v62 }
 0xbdf   : > { %v3946_v5 = vpop.xlane.xlu0 %3945 }
 0xbe0   : > { %v3977_v34 = vmul.f32 0.0078125, %v3946_v5 }
 0xbe2   : > { %v3993_v55 = vadd.f32 1e-12, %v3977_v34 }
 0xbe3   : > { %v3948_v0 = vpop.xlane.xlu1 %3947 }
 0xbe4   : > { %5573 = vrsqrt.f32 %v3993_v55  ;;  %v3978_v20 = vmul.f32 0.0078125, %v3948_v0 }
 0xbe6   : > { %v3994_v32 = vadd.f32 1e-12, %v3978_v20 }
 0xbe7   : > { %v3950_v52 = vpop.xlane.xlu0 %3949 }
 0xbe8   : > { %5575 = vrsqrt.f32 %v3994_v32  ;;  %v3979_v40 = vmul.f32 0.0078125, %v3950_v52 }
 0xbea   : > { %v3995_v24 = vadd.f32 1e-12, %v3979_v40 }
 0xbeb   : > { %v3952_v18 = vpop.xlane.xlu1 %3951 }
 0xbec   : > { %5577 = vrsqrt.f32 %v3995_v24  ;;  %v3980_v13 = vmul.f32 0.0078125, %v3952_v18 }
 0xbee   : > { %v3996_v41 = vadd.f32 1e-12, %v3980_v13 }
 0xbef   : > { %v3954_v11 = vpop.xlane.xlu0 %3953 }
 0xbf0   : > { %5579 = vrsqrt.f32 %v3996_v41  ;;  %v3981_v15 = vmul.f32 0.0078125, %v3954_v11 }
 0xbf1   : > { %v5574_v48 = vpop.eup %5573 }
 0xbf2   : > { %v4025_v59 = vmul.f32 %v5574_v48, %v7460_v54  ;;  %v3997_v1 = vadd.f32 1e-12, %v3981_v15 }
 0xbf3   : > { %v3956_v3 = vpop.xlane.xlu1 %3955 }
 0xbf4   : > { %v4047_v2 = vmul.f32 %v7540_v38, %v4025_v59  ;;  %5581 = vrsqrt.f32 %v3997_v1  ;;  %v3982_v17 = vmul.f32 0.0078125, %v3956_v3 }
 0xbf5   : > { %v5576_v14 = vpop.eup %5575 }
 0xbf6   : > { %v7548_v35 = vadd.f32 %v7544_v6, %v4047_v2  ;;  %v4026_v58 = vmul.f32 %v5576_v14, %v7465_v25  ;;  %v3998_v12 = vadd.f32 1e-12, %v3982_v17 }
 0xbf7   : > { %v3958_v33 = vpop.xlane.xlu0 %3957 }
 0xbf8   : > { %4085 = vst [vmem:[#allocation2 + $0x30] sm:$0xff] %v7548_v35  ;;  %v4048_v54 = vmul.f32 %v7540_v38, %v4026_v58  ;;  %5583 = vrsqrt.f32 %v3998_v12  ;;  %v3983_v9 = vmul.f32 0.0078125, %v3958_v33 }
 0xbf9   : > { %v5578_v29 = vpop.eup %5577 }
 0xbfa   : > { %v7554_v19 = vadd.f32 %v7544_v6, %v4048_v54  ;;  %v4027_v22 = vmul.f32 %v5578_v29, %v7470_v26  ;;  %v3999_v39 = vadd.f32 1e-12, %v3983_v9 }
 0xbfb   : > { %v3960_v36 = vpop.xlane.xlu1 %3959 }
 0xbfc   : > { %4086 = vst [vmem:[#allocation2] sm:$0xff] %v7554_v19  ;;  %v4049_v25 = vmul.f32 %v7540_v38, %v4027_v22  ;;  %5585 = vrsqrt.f32 %v3999_v39  ;;  %v3984_v45 = vmul.f32 0.0078125, %v3960_v36 }
 0xbfd   : > { %v5580_v53 = vpop.eup %5579 }
 0xbfe   : > { %v7560_v46 = vadd.f32 %v7544_v6, %v4049_v25  ;;  %v4028_v10 = vmul.f32 %v5580_v53, %v7475_v42  ;;  %v4000_v27 = vadd.f32 1e-12, %v3984_v45 }
 0xc00   : > { %4087 = vst [vmem:[#allocation2 + $0x58] sm:$0xff] %v7560_v46  ;;  %v4050_v7 = vmul.f32 %v7540_v38, %v4028_v10  ;;  %5587 = vrsqrt.f32 %v4000_v27 }
 0xc01   : > { %v5582_v26 = vpop.eup %5581 }
 0xc02   : > { %v7566_v16 = vadd.f32 %v7544_v6, %v4050_v7  ;;  %v4029_v49 = vmul.f32 %v5582_v26, %v7480_v57 }
 0xc04   : > { %4088 = vst [vmem:[#allocation2 + $0x18] sm:$0xff] %v7566_v16  ;;  %v4051_v28 = vmul.f32 %v7540_v38, %v4029_v49 }
 0xc05   : > { %v5584_v21 = vpop.eup %5583 }
 0xc06   : > { %v7572_v31 = vadd.f32 %v7544_v6, %v4051_v28  ;;  %v4030_v42 = vmul.f32 %v5584_v21, %v7485_v43 }
 0xc08   : > { %4089 = vst [vmem:[#allocation2 + $0x50] sm:$0xff] %v7572_v31  ;;  %v4052_v44 = vmul.f32 %v7540_v38, %v4030_v42 }
 0xc09   : > { %v5586_v23 = vpop.eup %5585 }
 0xc0a   : > { %v7578_v8 = vadd.f32 %v7544_v6, %v4052_v44  ;;  %v4031_v57 = vmul.f32 %v5586_v23, %v7490_v4 }
 0xc0c   : > { %4090 = vst [vmem:[#allocation2 + $0x68] sm:$0xff] %v7578_v8  ;;  %v4053_v62 = vmul.f32 %v7540_v38, %v4031_v57 }
 0xc0d   : > { %v5588_v5 = vpop.eup %5587 }
 0xc0e   : > { %v7584_v34 = vadd.f32 %v7544_v6, %v4053_v62  ;;  %v4032_v43 = vmul.f32 %v5588_v5, %v7495_v60 }
 0xc10   : > { %4091 = vst [vmem:[#allocation2 + $0x8] sm:$0xff] %v7584_v34  ;;  %v4054_v55 = vmul.f32 %v7540_v38, %v4032_v43 }
 0xc12   : > { %v7590_v0 = vadd.f32 %v7544_v6, %v4054_v55 }
 0xc14   : > { %4092 = vst [vmem:[#allocation2 + $0x48] sm:$0xff] %v7590_v0 }
 0xc20   : > { %v3962_v4 = vpop.xlane.xlu0 %3961 }
 0xc21   : > { %v3985_v20 = vmul.f32 0.0078125, %v3962_v4 }
 0xc23   : > { %v4001_v32 = vadd.f32 1e-12, %v3985_v20 }
 0xc24   : > { %v3964_v52 = vpop.xlane.xlu1 %3963 }
 0xc25   : > { %5589 = vrsqrt.f32 %v4001_v32  ;;  %v3986_v40 = vmul.f32 0.0078125, %v3964_v52 }
 0xc27   : > { %v4002_v24 = vadd.f32 1e-12, %v3986_v40 }
 0xc28   : > { %v3966_v18 = vpop.xlane.xlu0 %3965 }
 0xc29   : > { %5591 = vrsqrt.f32 %v4002_v24  ;;  %v3987_v13 = vmul.f32 0.0078125, %v3966_v18 }
 0xc2b   : > { %v4003_v60 = vadd.f32 1e-12, %v3987_v13 }
 0xc2c   : > { %v3968_v41 = vpop.xlane.xlu1 %3967 }
 0xc2d   : > { %5593 = vrsqrt.f32 %v4003_v60  ;;  %v3988_v11 = vmul.f32 0.0078125, %v3968_v41 }
 0xc2f   : > { %v4004_v15 = vadd.f32 1e-12, %v3988_v11 }
 0xc30   : > { %v3970_v48 = vpop.xlane.xlu0 %3969 }
 0xc31   : > { %5595 = vrsqrt.f32 %v4004_v15  ;;  %v3989_v59 = vmul.f32 0.0078125, %v3970_v48 }
 0xc32   : > { %v5590_v1 = vpop.eup %5589 }
 0xc33   : > { %v4033_v3 = vmul.f32 %v5590_v1, %v7500_v56  ;;  %v4005_v2 = vadd.f32 1e-12, %v3989_v59 }
 0xc34   : > { %v3972_v17 = vpop.xlane.xlu1 %3971 }
 0xc35   : > { %v4055_v14 = vmul.f32 %v7540_v38, %v4033_v3  ;;  %5597 = vrsqrt.f32 %v4005_v2  ;;  %v3990_v58 = vmul.f32 0.0078125, %v3972_v17 }
 0xc36   : > { %v5592_v12 = vpop.eup %5591 }
 0xc37   : > { %v7596_v33 = vadd.f32 %v7544_v6, %v4055_v14  ;;  %v4034_v54 = vmul.f32 %v5592_v12, %v7505_v50  ;;  %v4006_v9 = vadd.f32 1e-12, %v3990_v58 }
 0xc38   : > { %v3974_v29 = vpop.xlane.xlu0 %3973 }
 0xc39   : > { %4093 = vst [vmem:[#allocation2 + $0x40] sm:$0xff] %v7596_v33  ;;  %v4056_v22 = vmul.f32 %v7540_v38, %v4034_v54  ;;  %5599 = vrsqrt.f32 %v4006_v9  ;;  %v3991_v56 = vmul.f32 0.0078125, %v3974_v29 }
 0xc3a   : > { %v5594_v39 = vpop.eup %5593 }
 0xc3b   : > { %v7602_v36 = vadd.f32 %v7544_v6, %v4056_v22  ;;  %v4035_v25 = vmul.f32 %v5594_v39, %v7510_v30  ;;  %v4007_v45 = vadd.f32 1e-12, %v3991_v56 }
 0xc3c   : > { %v3976_v53 = vpop.xlane.xlu1 %3975 }
 0xc3d   : > { %4094 = vst [vmem:[#allocation2 + $0x20] sm:$0xff] %v7602_v36  ;;  %v4057_v50 = vmul.f32 %v7540_v38, %v4035_v25  ;;  %5601 = vrsqrt.f32 %v4007_v45  ;;  %v3992_v10 = vmul.f32 0.0078125, %v3976_v53 }
 0xc3e   : > { %v5596_v27 = vpop.eup %5595 }
 0xc3f   : > { %v7608_v7 = vadd.f32 %v7544_v6, %v4057_v50  ;;  %v4036_v26 = vmul.f32 %v5596_v27, %v7515_v47  ;;  %v4008_v49 = vadd.f32 1e-12, %v3992_v10 }
 0xc41   : > { %4095 = vst [vmem:[#allocation2 + $0x10] sm:$0xff] %v7608_v7  ;;  %v4058_v28 = vmul.f32 %v7540_v38, %v4036_v26  ;;  %5603 = vrsqrt.f32 %v4008_v49 }
 0xc42   : > { %v5598_v30 = vpop.eup %5597 }
 0xc43   : > { %v4080_v21 = vadd.f32 %v7544_v6, %v4058_v28  ;;  %v4037_v42 = vmul.f32 %v5598_v30, %v7520_v61 }
 0xc45   : > { %4096 = vst [vmem:[#allocation2 + $0x38] sm:$0xff] %v4080_v21  ;;  %v4059_v44 = vmul.f32 %v7540_v38, %v4037_v42 }
 0xc46   : > { %v5600_v23 = vpop.eup %5599 }
 0xc47   : > { %v4081_v57 = vadd.f32 %v7544_v6, %v4059_v44  ;;  %v4038_v62 = vmul.f32 %v5600_v23, %v7525_v63 }
 0xc49   : > { %4097 = vst [vmem:[#allocation2 + $0x60] sm:$0xff] %v4081_v57  ;;  %v4060_v47 = vmul.f32 %v7540_v38, %v4038_v62 }
 0xc4a   : > { %v5602_v5 = vpop.eup %5601 }
 0xc4b   : > { %v4082_v43 = vadd.f32 %v7544_v6, %v4060_v47  ;;  %v4039_v55 = vmul.f32 %v5602_v5, %v7530_v51 }
 0xc4d   : > { %4098 = vst [vmem:[#allocation2 + $0x70] sm:$0xff] %v4082_v43  ;;  %v4061_v4 = vmul.f32 %v7540_v38, %v4039_v55 }
 0xc4e   : > { %v5604_v61 = vpop.eup %5603 }
 0xc4f   : > { %v4083_v20 = vadd.f32 %v7544_v6, %v4061_v4  ;;  %v4040_v32 = vmul.f32 %v5604_v61, %v7535_v37 }
 0xc51   : > { %4099 = vst [vmem:[#allocation2 + $0x78] sm:$0xff] %v4083_v20  ;;  %v4062_v52 = vmul.f32 %v7540_v38, %v4040_v32  ;;  %4104 = sbr.rel (%p4534_p11) target bundleno = 3386 (0xd3a), region = 60 }
 0xc53   : > { %v4084_v63 = vadd.f32 %v7544_v6, %v4062_v52 }
 0xc55   : > { %4100 = vst [vmem:[#allocation2 + $0x28] sm:$0xff] %v4084_v63 }
 0xc56   : > { %v5745_v51 = vmov 0.0   ;;  %vm5746_vm1 = vmmov 0   ;;  %v7807_v37 = vld [vmem:[#allocation20_spill] sm:$0xff]  ;;  %v4115_v38 = vstv %s4114_s20  ;;  %v4120_v40 = vstv %s4119_s24  ;;  %s7830_s1 = smov (!%p4106_p12, %s7650_s1), 8 }
 0xc57   : > { %5002 = vmatprep.subr.mxu0 %v5745_v51  ;;  %5034 = vmatprep.mubr.msk.f32.mxu0 %vm5746_vm1, %v5745_v51  ;;  %vm4112_vm2 = vcmp.eq.s32.totalorder %v7807_v37, 0  ;;  %vm4117_vm3 = vcmp.eq.s32.totalorder %v7807_v37, 1  ;;  %vm4122_vm4 = vcmp.eq.s32.totalorder %v7807_v37, 2  ;;  %v4125_v18 = vstv %s4124_s29 }
 0xc58   : > { %5003 = vmatpush3.msra.mxu0 %v4084_v63  ;;  %v4116_v6 = vsel %vm4112_vm2, %v4115_v38, 0  ;;  %vm4127_vm5 = vcmp.eq.s32.totalorder %v7807_v37, 3  ;;  %v4130_v60 = vstv %s4129_s12  ;;  %vm4132_vm6 = vcmp.eq.s32.totalorder %v7807_v37, 4 }
 0xc59   : > { %5004 = vmatprep.subr.mxu0 %v5745_v51  ;;  %v4121_v24 = vsel %vm4117_vm3, %v4120_v40, %v4116_v6  ;;  %v4135_v11 = vstv %s7640_s16  ;;  %vm4137_vm7 = vcmp.eq.s32.totalorder %v7807_v37, 5  ;;  %v4140_v48 = vstv %s7646_s27 }
 0xc5a   : > { %5005 = vmatpush3.msra.mxu0 %v4083_v20  ;;  %v4126_v13 = vsel %vm4122_vm4, %v4125_v18, %v4121_v24  ;;  %vm4142_vm8 = vcmp.eq.s32.totalorder %v7807_v37, 6  ;;  %v4145_v1 = vstv %s4144_s26  ;;  %vm4147_vm9 = vcmp.eq.s32.totalorder %v7807_v37, 7 }
 0xc5b   : > { %5006 = vmatprep.subr.mxu0 %v5745_v51  ;;  %v4131_v41 = vsel %vm4127_vm5, %v4130_v60, %v4126_v13  ;;  %v4150_v2 = vstv %s4149_s11  ;;  %v4153_v58 = vstv %s7830_s1 }
 0xc5c   : > { %5007 = vmatpush3.msra.mxu0 %v4082_v43  ;;  %v4136_v15 = vsel %vm4132_vm6, %v4135_v11, %v4131_v41  ;;  %vm4154_vm11 = vcmp.lt.s32.totalorder %v7807_v37, %v4153_v58 }
 0xc5d   : > { %5008 = vmatprep.subr.mxu0 %v5745_v51  ;;  %v4141_v59 = vsel %vm4137_vm7, %v4140_v48, %v4136_v15 }
 0xc5e   : > { %5009 = vmatpush3.msra.mxu0 %v4081_v57  ;;  %v4146_v3 = vsel %vm4142_vm8, %v4145_v1, %v4141_v59 }
 0xc5f   : > { %5010 = vmatprep.subr.mxu0 %v5745_v51  ;;  %v4151_v14 = vsel %vm4147_vm9, %v4150_v2, %v4146_v3 }
 0xc60   : > { %5011 = vmatpush3.msra.mxu0 %v4080_v21 }
 0xc61   : > { %5012 = vmatprep.subr.mxu0 %v5745_v51 }
 0xc62   : > { %5013 = vmatpush3.msra.mxu0 %v7608_v7 }
 0xc63   : > { %5014 = vmatprep.subr.mxu0 %v5745_v51 }
 0xc64   : > { %5015 = vmatpush3.msra.mxu0 %v7602_v36 }
 0xc65   : > { %5016 = vmatprep.subr.mxu0 %v5745_v51 }
 0xc66   : > { %5017 = vmatpush3.msra.mxu0 %v7596_v33 }
 0xc67   : > { %5018 = vmatprep.subr.mxu0 %v5745_v51 }
 0xc68   : > { %5019 = vmatpush3.msra.mxu0 %v7590_v0  ;;  %v7808_v0 = vlaneseq }
 0xc69   : > { %5020 = vmatprep.subr.mxu0 %v5745_v51 }
 0xc6a   : > { %5021 = vmatpush3.msra.mxu0 %v7584_v34  ;;  %v4111_v17 = vand.u32 127, %v7808_v0 }
 0xc6b   : > { %5022 = vmatprep.subr.mxu0 %v5745_v51 }
 0xc6c   : > { %5023 = vmatpush3.msra.mxu0 %v7578_v8  ;;  %vm4152_vm10 = vcmp.eq.s32.totalorder %v4111_v17, %v4151_v14 }
 0xc6d   : > { %5024 = vmatprep.subr.mxu0 %v5745_v51  ;;  %vm4155_vm12 = vmand %vm4152_vm10, %vm4154_vm11 }
 0xc6e   : > { %5025 = vmatpush3.msra.mxu0 %v7572_v31  ;;  %v5747_v31 = vmov 1.0  }
 0xc6f   : > { %5026 = vmatprep.subr.mxu0 %v5745_v51 }
 0xc70   : > { %5027 = vmatpush3.msra.mxu0 %v7566_v16 }
 0xc71   : > { %5028 = vmatprep.subr.mxu0 %v5745_v51 }
 0xc72   : > { %5029 = vmatpush3.msra.mxu0 %v7560_v46 }
 0xc73   : > { %5030 = vmatprep.subr.mxu0 %v5745_v51 }
 0xc74   : > { %5031 = vmatpush3.msra.mxu0 %v7554_v19 }
 0xc75   : > { %5032 = vmatprep.subr.mxu0 %v5745_v51 }
 0xc76   : > { %5033 = vmatpush3.msra.mxu0 %v7548_v35 }
 0xc77   : > { %5035 = vmatmul.mubr.msk.f32.vlgmr.msra.gmra.mxu0 %vm4155_vm12, %v5747_v31 }
 0xd37   : > { %v4223_v8 = vpop.f32.mrf.mxu0 }
 0xd38   : > { %4227 = vst [vmem:[%s406_s17] sm:$0xff] %v4223_v8 }
 0xd39   : > { %v5036_v16 = vpop.f32.mrf.mxu0 }
 0xd3a PF: > { %s4538_s14 = sshll.u32 %s5727_s25, 7  ;;  %s7810_s20 = sld [smem:[#allocation31_spill]] }
 0xd3b   : > { %s4242_s24 = sshll.u32 %s406_s17, 4  ;;  %s7811_s15 = sand.u32 1, %s5715_s22   ;;  %s4243_s24 = int_to_ptr.vmem [resolvable:$true] %s4242_s24 }
 0xd3c   : > { %s4229_s29 = scalar_lea.sflag [#allocation7], %s7811_s15  ;;  %s5645_s30 = scalar_lea.vmem %s4243_s24, 128 }
 0xd3d   : > { %p5646_p0 = scmp.ne.s32.totalorder %s4243_s24, %s5645_s30  ;;  %s5748_s12 = smov [#allocation6]  }
 0xd3e   : > { %s5649_s0 = sshll.u32 %s5748_s12, 4  ;;  %s5650_s0 = int_to_ptr.vmem [resolvable:$false] %s5649_s0 }
 0xd3f   : > { %p5647_p1 = pnand %p5646_p0, %p5859_p13  ;;  %s5651_s16 = scalar_lea.vmem %s5650_s0, 256 }
 0xd40   : > { %s4240_s21 = scalar_lea.hbm %s7810_s20, %s4538_s14  ;;  %p5652_p3 = scmp.lt.s32.totalorder %s4243_s24, %s5650_s0 }
 0xd41   : > { %p5648_p2 = pneg %p5647_p1  ;;  %p5653_p4 = scmp.lt.s32.totalorder %s5651_s16, %s5645_s30 }
 0xd43   : > { %p5654_p6 = por %p5653_p4, %p5652_p3 }
 0xd45   : > { %p5655_p7 = pnand %p5654_p6, %p5648_p2 }
 0xd47   : > { %5658 = shalt.err (!%p5655_p7)
}
 0xd48   : > { %s5659_s25 = scalar_lea.hbm %s4240_s21, 128  ;;  %s5663_s23 = scalar_lea.hbm %s7810_s20, 256 }
 0xd49   : > { %p5660_p8 = scmp.ne.s32.totalorder %s4240_s21, %s5659_s25  ;;  %p5664_p11 = scmp.lt.s32.totalorder %s4240_s21, %s7810_s20 }
 0xd4a   : > { %p5665_p12 = scmp.lt.s32.totalorder %s5663_s23, %s5659_s25 }
 0xd4b   : > { %p5661_p9 = pnand %p5660_p8, %p5859_p13 }
 0xd4c   : > { %p5666_p0 = por %p5665_p12, %p5664_p11 }
 0xd4d   : > { %p5662_p10 = pneg %p5661_p9 }
 0xd4f   : > { %p5667_p1 = pnand %p5666_p0, %p5662_p10 }
 0xd51   : > { %5670 = shalt.err (!%p5667_p1)
}
 0xd52   : > { %5055 = dma.vmem_to_hbm [thread:$0]  (%p5859_p13), %s4243_s24, 128, %s4240_s21, %s4229_s29  }
 0xd53 PF: > { %s7812_s1 = sld [smem:[#allocation14_spill]] }
 0xd54   : > { %s7813_s26 = sld [smem:[#allocation10_spill]] }
 0xd59   : > { %p5061_p2 = scmp.ge.s32.totalorder %s7812_s1, 2 }
 0xd5a   : > { %s4254_s11 = sand.u32 1, %s7813_s26  }
 0xd5b   : > { %p5058_p3 = pnand %p5061_p2, %p5869_p5  ;;  %s4255_s14 = scalar_lea.sflag [#allocation7], %s4254_s11 }
 0xd5d   : > { %p5059_p4 = pneg %p5058_p3 }
 0xd5f   : > { %5706 = dma.done.wait (%p5059_p4), %s4255_s14, 128  }
 0xd60   : > { %5708 = vsyncadd (%p5059_p4), %s4255_s14, 4294967168  ;;  %s33_s28 = sadd.s32 1, %s7812_s1   ;;  %s7815_s18 = sld [smem:[#allocation11_spill]] }
 0xd61   : > { %p30_p6 = scmp.ge.s32.totalorder %s33_s28, 6   ;;  %s7816_s23 = sld [smem:[#allocation19_spill]] }
 0xd62   : > { %s7817_s24 = sld [smem:[#allocation12_spill]]  ;;  %s7821_s1 = smov %s5715_s22 }
 0xd63   : > { %s7818_s25 = sld [smem:[#allocation13_spill]]  ;;  %32 = sbr.rel (!%p30_p6) target bundleno = 31 (0x1f), region = 113 }
 0xd64   : > { %s7819_s26 = sld [smem:[#allocation15_spill]] }
 0xd65   : > { %s7820_s27 = sld [smem:[#allocation17_spill]] }
 0xd66   : > { %s7822_s22 = smov %s7815_s18 }
 0xd68   :  { %4260 = vsyncpa [#allocation7], 1 }
 0xd69   :  { %4262 = vsyncpa [#allocation7 + $0x1], 1 }

</bundles_post_ra>
